<compile_context>
chip_gen: v7x
topology: tpu7x:2x2x1
jax: 0.10.0
libtpu: 0.0.40
codegen_flags: <defaults>
</compile_context>

<pallas_src>
import functools

import jax
import jax.numpy as jnp
import numpy as np
from jax.experimental import pallas as pl
from jax.experimental.pallas import tpu as pltpu

LEAD = 7  # leading zero rows in the padded conv2 buffer so interior band starts are 8-aligned


# ---------------------------------------------------------------------------
# Fused kernel: conv1+pool+relu -> conv2+pool+relu -> FC+sigmoid (one batch/step)
# ---------------------------------------------------------------------------
def cnn_fused_kernel(xcol_ref, w1_ref, b1_ref, w2_ref, b2_ref, wfc_ref, bfc_ref,
                     o_ref, p2_ref, vrow2_ref, *, H0, W0):
    # xcol_ref : (H1*4*40, 9*Cin) bf16  host im2col, pool-blocked row order (see wrapper)
    # w1_ref   : (9*Cin, 64) bf16       conv1 weights, rows = (ky*3+kx)*Cin + c
    # w2_ref   : (9*64, 32) bf16        conv2 weights, rows = (ky*3+kx)*64 + c
    # wfc_ref  : (2*H2*24, 32) f32      FC weights, row = o*(H2*24) + h*24 + w, lane = c
    # o_ref    : (1, 1, 128) f32        lanes 0..1 = sigmoid outputs (rest zero)
    # p2_ref   : (p2_rows, 64) f32      zero-padded conv2 input (h1 interior bands)
    # vrow2_ref: (40, 32) f32           pool-2 vertical-max staging row
    H1, W1 = H0 // 2, W0 // 2          # 8, 38
    H2, W2 = H1 // 2, W1 // 2          # 4, 19
    W1p = W1 + 2                       # 40 (padded conv2 row width)
    Wb = W1p                           # 40 (pool-blocked half-width in xcol, 38 padded to 40)
    CH1 = 4 * Wb                       # 160 conv1 rows per pool-output row
    Wfcb = ((W2 + 7) // 8) * 8         # 24 (8-aligned wfc rows per pool row)
    p2_rows = p2_ref.shape[0]

    # ---- zero only the p2 border rows that the band stores below never overwrite ----
    head = LEAD + W1p + 1                                                # 48
    p2_ref[pl.ds(0, head), :] = jnp.zeros((head, 64), jnp.float32)
    tail = LEAD + (H1 + 1) * W1p + 1                                     # 368
    p2_ref[pl.ds(tail, p2_rows - tail), :] = jnp.zeros((p2_rows - tail, 64), jnp.float32)

    # ---------------- layer 1: chunk per pool row, one MXU dot + aligned-slice pool ----------------
    bias1 = jnp.broadcast_to(b1_ref[...], (W1, 64))        # hoisted (no per-iter broadcast)
    for i in range(H1):
        c = jnp.dot(xcol_ref[pl.ds(i * CH1, CH1), :], w1_ref[...],
                    preferred_element_type=jnp.float32)                 # (160, 64) f32
        # 2x2 max-pool = max over the four 40-row pool blocks (8-aligned static slices)
        v = jnp.maximum(jnp.maximum(c[0 * Wb:1 * Wb], c[1 * Wb:2 * Wb]),
                        jnp.maximum(c[2 * Wb:3 * Wb], c[3 * Wb:4 * Wb]))  # (40, 64)
        h1row = jnp.maximum(v[:W1] + bias1, 0.0)                         # (38, 64)
        band = LEAD + (i + 1) * W1p + 1                                  # 48 + 40*i (8-aligned)
        p2_ref[pl.ds(band, W1), :] = h1row
        # right zero-pad of this band + left zero-pad of the next band
        p2_ref[pl.ds(band + W1, 2), :] = jnp.zeros((2, 64), jnp.float32)

    # ---------------- layer 2: chunk per pool row, 9 accumulating tap dots (no concat) ----------------
    bias2 = jnp.broadcast_to(b2_ref[...], (W2, 32))
    fc0 = jnp.zeros((W2, 32), jnp.float32)
    fc1 = jnp.zeros((W2, 32), jnp.float32)
    for i in range(H2):
        acc = None
        for t in range(9):
            ky, kx = divmod(t, 3)
            start = LEAD + (2 * i + ky) * W1p + kx
            tap = p2_ref[pl.ds(start, 2 * W1p), :].astype(jnp.bfloat16)  # (80, 64)
            part = jnp.dot(tap, w2_ref[pl.ds(t * 64, 64), :],
                           preferred_element_type=jnp.float32)           # (80, 32)
            acc = part if acc is None else acc + part                    # register accumulate
        # acc rows j = y_local*40 + x; x = 38,39 are wrap-around junk, never picked below.
        v2 = jnp.maximum(acc[:W1p], acc[W1p:])                           # (40, 32) vertical max
        vrow2_ref[...] = v2
        pooled = jnp.maximum(vrow2_ref[pl.ds(0, W2, stride=2), :],
                             vrow2_ref[pl.ds(1, W2, stride=2), :])        # (19, 32)
        h2row = jnp.maximum(pooled + bias2, 0.0)                          # (19, 32)
        fc0 = fc0 + h2row * wfc_ref[pl.ds(i * Wfcb, W2), :]
        fc1 = fc1 + h2row * wfc_ref[pl.ds(H2 * Wfcb + i * Wfcb, W2), :]

    # ---------------- FC reduce (N=2 -> VPU/XLU) + bias + stable sigmoid ----------------
    y0 = jnp.sum(jnp.sum(fc0, axis=1, keepdims=True), axis=0, keepdims=True)   # (1, 1)
    y1 = jnp.sum(jnp.sum(fc1, axis=1, keepdims=True), axis=0, keepdims=True)   # (1, 1)
    y = jnp.concatenate([y0, y1], axis=1) + bfc_ref[...]                        # (1, 2)
    z = jnp.exp(-jnp.abs(y))
    sig = jnp.where(y >= 0.0, 1.0 / (1.0 + z), z / (1.0 + z))                   # (1, 2)
    out_lane = jnp.concatenate([sig, jnp.zeros((1, 126), jnp.float32)], axis=1)
    o_ref[...] = out_lane.reshape(1, 1, 128)                                    # lane-dense store


# ---------------------------------------------------------------------------
# Host wrapper
# ---------------------------------------------------------------------------
def _build_xcol_pool_blocked(x_nhwc, Wb):
    """im2col for conv1 with rows pre-ordered so the 2x2 max-pool reduces over four
    8-aligned contiguous 40-row blocks (zero strided loads in-kernel)."""
    B, H, W, C = x_nhwc.shape
    H1, W1 = H // 2, W // 2
    xpad = jnp.pad(x_nhwc, ((0, 0), (1, 1), (1, 1), (0, 0)))
    taps = [xpad[:, ky:ky + H, kx:kx + W, :] for ky in range(3) for kx in range(3)]
    col = jnp.concatenate(taps, axis=-1)                       # (B, H, W, 9C)
    col = col.reshape(B, H1, 2, W1, 2, 9 * C)                  # y = 2*i + r, x = 2*w + p
    col = jnp.transpose(col, (0, 1, 2, 4, 3, 5))               # (B, i, r, p, w, 9C)
    col = jnp.pad(col, ((0, 0), (0, 0), (0, 0), (0, 0), (0, Wb - W1), (0, 0)))
    return col.reshape(B, H1 * 4 * Wb, 9 * C)                  # (B, H1*160, 9C)


@jax.jit
def cnn_forward(x_nchw, params):
    B, C, H, W = x_nchw.shape
    H1, W1 = H // 2, W // 2
    H2, W2 = H1 // 2, W1 // 2
    W1p = W1 + 2
    Wb = W1p
    Wfcb = ((W2 + 7) // 8) * 8

    x = jnp.transpose(x_nchw, (0, 2, 3, 1))                             # NCHW -> NHWC
    xcol = _build_xcol_pool_blocked(x, Wb).astype(jnp.bfloat16)         # (B, 1280, 72)
    w1k = params["w1"].reshape(9 * C, 64).astype(jnp.bfloat16)
    w2k = params["w2"].reshape(9 * 64, 32).astype(jnp.bfloat16)
    b1 = params["b1"].reshape(1, 64)
    b2 = params["b2"].reshape(1, 32)
    # PyTorch flattens CHW (idx = c*H2*W2 + h*W2 + w).  Repack as [o, h (padded to 24), w, c]
    # so every in-kernel slice starts 8-aligned.
    wfck = params["wfc"].reshape(32, H2, W2, 2)
    wfck = jnp.transpose(wfck, (3, 1, 2, 0))                             # (2, H2, W2, 32)
    wfck = jnp.pad(wfck, ((0, 0), (0, 0), (0, Wfcb - W2), (0, 0)))
    wfck = wfck.reshape(2 * H2 * Wfcb, 32)                               # (192, 32)
    bfc = params["bfc"].reshape(1, 2)

    # conv2 taps read up to LEAD + (H1+2)*W1p + 2 rows (trailing reads are unused junk cols)
    p2_rows = -(-(LEAD + (H1 + 2) * W1p + 2) // 8) * 8                   # 416

    kernel = functools.partial(cnn_fused_kernel, H0=H, W0=W)
    out_pad = pl.pallas_call(
        kernel,
        out_shape=jax.ShapeDtypeStruct((B, 1, 128), jnp.float32),
        grid_spec=pltpu.PrefetchScalarGridSpec(
            num_scalar_prefetch=0,
            grid=(B,),
            in_specs=[
                pl.BlockSpec((None, H1 * 4 * Wb, 9 * C), lambda b: (b, 0, 0)),
                pl.BlockSpec((9 * C, 64), lambda b: (0, 0)),
                pl.BlockSpec((1, 64), lambda b: (0, 0)),
                pl.BlockSpec((9 * 64, 32), lambda b: (0, 0)),
                pl.BlockSpec((1, 32), lambda b: (0, 0)),
                pl.BlockSpec((2 * H2 * Wfcb, 32), lambda b: (0, 0)),
                pl.BlockSpec((1, 2), lambda b: (0, 0)),
            ],
            out_specs=pl.BlockSpec((1, 1, 128), lambda b: (b, 0, 0)),
            scratch_shapes=[
                pltpu.VMEM((p2_rows, 64), jnp.float32),   # zero-padded conv2 input
                pltpu.VMEM((W1p, 32), jnp.float32),       # pool-2 vertical-max staging
            ],
        ),
        compiler_params=pltpu.CompilerParams(
            dimension_semantics=("parallel",)),            # keeps both v7x TCs busy
    )(xcol, w1k, b1, w2k, b2, wfck, bfc)
    # TODO(synk): nn.Dropout(0.2) has no effect in eval mode; implemented as identity.
    return out_pad[:, 0, :2]


# ---------------------------------------------------------------------------
# Pure-JAX reference (for correctness check)
# ---------------------------------------------------------------------------
def reference_forward(x_nchw, params):
    x = jnp.transpose(x_nchw, (0, 2, 3, 1))

    def block(h, w, b):
        y = jax.lax.conv_general_dilated(
            h, w, window_strides=(1, 1), padding=((1, 1), (1, 1)),
            dimension_numbers=("NHWC", "HWIO", "NHWC"),
            precision=jax.lax.Precision.HIGHEST) + b
        y = jax.lax.reduce_window(y, -jnp.inf, jax.lax.max,
                                  (1, 2, 2, 1), (1, 2, 2, 1), "VALID")
        return jnp.maximum(y, 0.0)

    h = block(block(x, params["w1"], params["b1"]), params["w2"], params["b2"])
    flat = jnp.transpose(h, (0, 3, 1, 2)).reshape(h.shape[0], -1)       # PyTorch CHW flatten
    y = jnp.dot(flat, params["wfc"], precision=jax.lax.Precision.HIGHEST) + params["bfc"]
    return jax.nn.sigmoid(y)


if __name__ == "__main__":
    B, C_IN, H, W = 2, 8, 16, 76            # fc expects 32 * (H/4) * (W/4) = 32*4*19

    key = jax.random.PRNGKey(0)
    k1, k2, k3, k4, k5, k6, kx = jax.random.split(key, 7)
    params = {
        "w1": jax.random.normal(k1, (3, 3, C_IN, 64), jnp.float32) * 0.10,
        "b1": jax.random.normal(k2, (64,), jnp.float32) * 0.10,
        "w2": jax.random.normal(k3, (3, 3, 64, 32), jnp.float32) * 0.05,
        "b2": jax.random.normal(k4, (32,), jnp.float32) * 0.10,
        "wfc": jax.random.normal(k5, (32 * 4 * 19, 2), jnp.float32) * 0.02,
        "bfc": jax.random.normal(k6, (2,), jnp.float32) * 0.10,
    }
    x = jax.random.normal(kx, (B, C_IN, H, W), jnp.float32)

    out = jax.block_until_ready(cnn_forward(x, params))
    ref = jax.block_until_ready(reference_forward(x, params))

    assert out.shape == (B, 2), out.shape
    # Conv matmuls run with bf16 MXU inputs (f32 accumulation); tolerance sized
    # for bf16 rounding vs. the f32 HIGHEST-precision reference.
    np.testing.assert_allclose(np.asarray(out), np.asarray(ref), atol=3e-3, rtol=3e-3)

    print("KERNEL_OK")
</pallas_src>

<mosaic_0001>
module attributes {stable_mosaic.version = 11 : i64} {
  func.func @cnn_fused_kernel(%arg0: i32, %arg1: memref<1x1280x72xbf16, #tpu.memory_space<vmem>>, %arg2: memref<72x64xbf16, #tpu.memory_space<vmem>>, %arg3: memref<1x64xf32, #tpu.memory_space<vmem>>, %arg4: memref<576x32xbf16, #tpu.memory_space<vmem>>, %arg5: memref<1x32xf32, #tpu.memory_space<vmem>>, %arg6: memref<192x32xf32, #tpu.memory_space<vmem>>, %arg7: memref<1x2xf32, #tpu.memory_space<vmem>>, %arg8: memref<1x1x128xf32, #tpu.memory_space<vmem>>, %arg9: memref<416x64xf32, #tpu.memory_space<vmem>>, %arg10: memref<40x32xf32, #tpu.memory_space<vmem>>) attributes {dimension_semantics = [#tpu.dimension_semantics<parallel>], iteration_bounds = array<i64: 2>, scalar_prefetch = 0 : i64, scratch_operands = 2 : i64, tpu.core_type = #tpu.core_type<tc>, window_params = [{transform_indices = @transform_0, window_bounds = array<i64: 1, 1280, 72>}, {pipeline_mode = #tpu.pipeline_mode<synchronous>, transform_indices = @transform_1, window_bounds = array<i64: 72, 64>}, {pipeline_mode = #tpu.pipeline_mode<synchronous>, transform_indices = @transform_2, window_bounds = array<i64: 1, 64>}, {pipeline_mode = #tpu.pipeline_mode<synchronous>, transform_indices = @transform_3, window_bounds = array<i64: 576, 32>}, {pipeline_mode = #tpu.pipeline_mode<synchronous>, transform_indices = @transform_4, window_bounds = array<i64: 1, 32>}, {pipeline_mode = #tpu.pipeline_mode<synchronous>, transform_indices = @transform_5, window_bounds = array<i64: 192, 32>}, {pipeline_mode = #tpu.pipeline_mode<synchronous>, transform_indices = @transform_6, window_bounds = array<i64: 1, 2>}, {transform_indices = @transform_7, window_bounds = array<i64: 1, 1, 128>}]} {
    %cst = arith.constant 0.000000e+00 : f32
    %0 = vector.broadcast %cst : f32 to vector<48x64xf32>
    %c0 = arith.constant 0 : index
    %c0_0 = arith.constant 0 : index
    %1 = vector.load %arg9[%c0, %c0_0] : memref<416x64xf32, #tpu.memory_space<vmem>>, vector<48x64xf32>
    tpu.vector_store %arg9[%c0, %c0_0], %0 {strides = array<i32>} : memref<416x64xf32, #tpu.memory_space<vmem>>, vector<48x64xf32>,
    %cst_1 = arith.constant 0.000000e+00 : f32
    %2 = vector.broadcast %cst_1 : f32 to vector<48x64xf32>
    %c368 = arith.constant 368 : index
    %c0_2 = arith.constant 0 : index
    %3 = vector.load %arg9[%c368, %c0_2] : memref<416x64xf32, #tpu.memory_space<vmem>>, vector<48x64xf32>
    tpu.vector_store %arg9[%c368, %c0_2], %2 {strides = array<i32>} : memref<416x64xf32, #tpu.memory_space<vmem>>, vector<48x64xf32>,
    %c0_3 = arith.constant 0 : index
    %c0_4 = arith.constant 0 : index
    %4 = vector.load %arg3[%c0_3, %c0_4] : memref<1x64xf32, #tpu.memory_space<vmem>>, vector<1x64xf32>
    %5 = vector.shape_cast %4 : vector<1x64xf32> to vector<1x64xf32>
    %6 = vector.broadcast %5 : vector<1x64xf32> to vector<38x64xf32>
    %c0_5 = arith.constant 0 : index
    %c0_6 = arith.constant 0 : index
    %c0_7 = arith.constant 0 : index
    %7 = vector.load %arg1[%c0_5, %c0_6, %c0_7] : memref<1x1280x72xbf16, #tpu.memory_space<vmem>>, vector<1x160x72xbf16>
    %8 = vector.shape_cast %7 : vector<1x160x72xbf16> to vector<160x72xbf16>
    %c0_8 = arith.constant 0 : index
    %c0_9 = arith.constant 0 : index
    %9 = vector.load %arg2[%c0_8, %c0_9] : memref<72x64xbf16, #tpu.memory_space<vmem>>, vector<72x64xbf16>
    %cst_10 = arith.constant dense<0.000000e+00> : vector<160x64xf32>
    %10 = tpu.matmul %8, %9, %cst_10 {dimension_numbers = #tpu.dot_dimension_numbers<[1], [0], [0], [1], [0, 0, 1, 1], [], []>} : vector<160x72xbf16>, vector<72x64xbf16>, vector<160x64xf32> -> vector<160x64xf32>
    %11 = vector.extract_strided_slice %10 {offsets = [0, 0], sizes = [40, 64], strides = [1, 1]} : vector<160x64xf32> to vector<40x64xf32>
    %12 = vector.extract_strided_slice %10 {offsets = [40, 0], sizes = [40, 64], strides = [1, 1]} : vector<160x64xf32> to vector<40x64xf32>
    %13 = arith.maximumf %11, %12 : vector<40x64xf32>
    %14 = vector.extract_strided_slice %10 {offsets = [80, 0], sizes = [40, 64], strides = [1, 1]} : vector<160x64xf32> to vector<40x64xf32>
    %15 = vector.extract_strided_slice %10 {offsets = [120, 0], sizes = [40, 64], strides = [1, 1]} : vector<160x64xf32> to vector<40x64xf32>
    %16 = arith.maximumf %14, %15 : vector<40x64xf32>
    %17 = arith.maximumf %13, %16 : vector<40x64xf32>
    %18 = vector.extract_strided_slice %17 {offsets = [0, 0], sizes = [38, 64], strides = [1, 1]} : vector<40x64xf32> to vector<38x64xf32>
    %19 = arith.addf %18, %6 : vector<38x64xf32>
    %cst_11 = arith.constant 0.000000e+00 : f32
    %20 = vector.broadcast %cst_11 : f32 to vector<38x64xf32>
    %21 = arith.maximumf %19, %20 : vector<38x64xf32>
    %c48 = arith.constant 48 : index
    %c0_12 = arith.constant 0 : index
    %22 = vector.load %arg9[%c48, %c0_12] : memref<416x64xf32, #tpu.memory_space<vmem>>, vector<38x64xf32>
    tpu.vector_store %arg9[%c48, %c0_12], %21 {strides = array<i32>} : memref<416x64xf32, #tpu.memory_space<vmem>>, vector<38x64xf32>,
    %cst_13 = arith.constant 0.000000e+00 : f32
    %23 = vector.broadcast %cst_13 : f32 to vector<2x64xf32>
    %c86 = arith.constant 86 : index
    %c0_14 = arith.constant 0 : index
    %24 = vector.load %arg9[%c86, %c0_14] : memref<416x64xf32, #tpu.memory_space<vmem>>, vector<2x64xf32>
    tpu.vector_store %arg9[%c86, %c0_14], %23 {strides = array<i32>} : memref<416x64xf32, #tpu.memory_space<vmem>>, vector<2x64xf32>,
    %c0_15 = arith.constant 0 : index
    %c160 = arith.constant 160 : index
    %c0_16 = arith.constant 0 : index
    %25 = vector.load %arg1[%c0_15, %c160, %c0_16] : memref<1x1280x72xbf16, #tpu.memory_space<vmem>>, vector<1x160x72xbf16>
    %26 = vector.shape_cast %25 : vector<1x160x72xbf16> to vector<160x72xbf16>
    %c0_17 = arith.constant 0 : index
    %c0_18 = arith.constant 0 : index
    %27 = vector.load %arg2[%c0_17, %c0_18] : memref<72x64xbf16, #tpu.memory_space<vmem>>, vector<72x64xbf16>
    %cst_19 = arith.constant dense<0.000000e+00> : vector<160x64xf32>
    %28 = tpu.matmul %26, %27, %cst_19 {dimension_numbers = #tpu.dot_dimension_numbers<[1], [0], [0], [1], [0, 0, 1, 1], [], []>} : vector<160x72xbf16>, vector<72x64xbf16>, vector<160x64xf32> -> vector<160x64xf32>
    %29 = vector.extract_strided_slice %28 {offsets = [0, 0], sizes = [40, 64], strides = [1, 1]} : vector<160x64xf32> to vector<40x64xf32>
    %30 = vector.extract_strided_slice %28 {offsets = [40, 0], sizes = [40, 64], strides = [1, 1]} : vector<160x64xf32> to vector<40x64xf32>
    %31 = arith.maximumf %29, %30 : vector<40x64xf32>
    %32 = vector.extract_strided_slice %28 {offsets = [80, 0], sizes = [40, 64], strides = [1, 1]} : vector<160x64xf32> to vector<40x64xf32>
    %33 = vector.extract_strided_slice %28 {offsets = [120, 0], sizes = [40, 64], strides = [1, 1]} : vector<160x64xf32> to vector<40x64xf32>
    %34 = arith.maximumf %32, %33 : vector<40x64xf32>
    %35 = arith.maximumf %31, %34 : vector<40x64xf32>
    %36 = vector.extract_strided_slice %35 {offsets = [0, 0], sizes = [38, 64], strides = [1, 1]} : vector<40x64xf32> to vector<38x64xf32>
    %37 = arith.addf %36, %6 : vector<38x64xf32>
    %cst_20 = arith.constant 0.000000e+00 : f32
    %38 = vector.broadcast %cst_20 : f32 to vector<38x64xf32>
    %39 = arith.maximumf %37, %38 : vector<38x64xf32>
    %c88 = arith.constant 88 : index
    %c0_21 = arith.constant 0 : index
    %40 = vector.load %arg9[%c88, %c0_21] : memref<416x64xf32, #tpu.memory_space<vmem>>, vector<38x64xf32>
    tpu.vector_store %arg9[%c88, %c0_21], %39 {strides = array<i32>} : memref<416x64xf32, #tpu.memory_space<vmem>>, vector<38x64xf32>,
    %cst_22 = arith.constant 0.000000e+00 : f32
    %41 = vector.broadcast %cst_22 : f32 to vector<2x64xf32>
    %c126 = arith.constant 126 : index
    %c0_23 = arith.constant 0 : index
    %42 = vector.load %arg9[%c126, %c0_23] : memref<416x64xf32, #tpu.memory_space<vmem>>, vector<2x64xf32>
    tpu.vector_store %arg9[%c126, %c0_23], %41 {strides = array<i32>} : memref<416x64xf32, #tpu.memory_space<vmem>>, vector<2x64xf32>,
    %c0_24 = arith.constant 0 : index
    %c320 = arith.constant 320 : index
    %c0_25 = arith.constant 0 : index
    %43 = vector.load %arg1[%c0_24, %c320, %c0_25] : memref<1x1280x72xbf16, #tpu.memory_space<vmem>>, vector<1x160x72xbf16>
    %44 = vector.shape_cast %43 : vector<1x160x72xbf16> to vector<160x72xbf16>
    %c0_26 = arith.constant 0 : index
    %c0_27 = arith.constant 0 : index
    %45 = vector.load %arg2[%c0_26, %c0_27] : memref<72x64xbf16, #tpu.memory_space<vmem>>, vector<72x64xbf16>
    %cst_28 = arith.constant dense<0.000000e+00> : vector<160x64xf32>
    %46 = tpu.matmul %44, %45, %cst_28 {dimension_numbers = #tpu.dot_dimension_numbers<[1], [0], [0], [1], [0, 0, 1, 1], [], []>} : vector<160x72xbf16>, vector<72x64xbf16>, vector<160x64xf32> -> vector<160x64xf32>
    %47 = vector.extract_strided_slice %46 {offsets = [0, 0], sizes = [40, 64], strides = [1, 1]} : vector<160x64xf32> to vector<40x64xf32>
    %48 = vector.extract_strided_slice %46 {offsets = [40, 0], sizes = [40, 64], strides = [1, 1]} : vector<160x64xf32> to vector<40x64xf32>
    %49 = arith.maximumf %47, %48 : vector<40x64xf32>
    %50 = vector.extract_strided_slice %46 {offsets = [80, 0], sizes = [40, 64], strides = [1, 1]} : vector<160x64xf32> to vector<40x64xf32>
    %51 = vector.extract_strided_slice %46 {offsets = [120, 0], sizes = [40, 64], strides = [1, 1]} : vector<160x64xf32> to vector<40x64xf32>
    %52 = arith.maximumf %50, %51 : vector<40x64xf32>
    %53 = arith.maximumf %49, %52 : vector<40x64xf32>
    %54 = vector.extract_strided_slice %53 {offsets = [0, 0], sizes = [38, 64], strides = [1, 1]} : vector<40x64xf32> to vector<38x64xf32>
    %55 = arith.addf %54, %6 : vector<38x64xf32>
    %cst_29 = arith.constant 0.000000e+00 : f32
    %56 = vector.broadcast %cst_29 : f32 to vector<38x64xf32>
    %57 = arith.maximumf %55, %56 : vector<38x64xf32>
    %c128 = arith.constant 128 : index
    %c0_30 = arith.constant 0 : index
    %58 = vector.load %arg9[%c128, %c0_30] : memref<416x64xf32, #tpu.memory_space<vmem>>, vector<38x64xf32>
    tpu.vector_store %arg9[%c128, %c0_30], %57 {strides = array<i32>} : memref<416x64xf32, #tpu.memory_space<vmem>>, vector<38x64xf32>,
    %cst_31 = arith.constant 0.000000e+00 : f32
    %59 = vector.broadcast %cst_31 : f32 to vector<2x64xf32>
    %c166 = arith.constant 166 : index
    %c0_32 = arith.constant 0 : index
    %60 = vector.load %arg9[%c166, %c0_32] : memref<416x64xf32, #tpu.memory_space<vmem>>, vector<2x64xf32>
    tpu.vector_store %arg9[%c166, %c0_32], %59 {strides = array<i32>} : memref<416x64xf32, #tpu.memory_space<vmem>>, vector<2x64xf32>,
    %c0_33 = arith.constant 0 : index
    %c480 = arith.constant 480 : index
    %c0_34 = arith.constant 0 : index
    %61 = vector.load %arg1[%c0_33, %c480, %c0_34] : memref<1x1280x72xbf16, #tpu.memory_space<vmem>>, vector<1x160x72xbf16>
    %62 = vector.shape_cast %61 : vector<1x160x72xbf16> to vector<160x72xbf16>
    %c0_35 = arith.constant 0 : index
    %c0_36 = arith.constant 0 : index
    %63 = vector.load %arg2[%c0_35, %c0_36] : memref<72x64xbf16, #tpu.memory_space<vmem>>, vector<72x64xbf16>
    %cst_37 = arith.constant dense<0.000000e+00> : vector<160x64xf32>
    %64 = tpu.matmul %62, %63, %cst_37 {dimension_numbers = #tpu.dot_dimension_numbers<[1], [0], [0], [1], [0, 0, 1, 1], [], []>} : vector<160x72xbf16>, vector<72x64xbf16>, vector<160x64xf32> -> vector<160x64xf32>
    %65 = vector.extract_strided_slice %64 {offsets = [0, 0], sizes = [40, 64], strides = [1, 1]} : vector<160x64xf32> to vector<40x64xf32>
    %66 = vector.extract_strided_slice %64 {offsets = [40, 0], sizes = [40, 64], strides = [1, 1]} : vector<160x64xf32> to vector<40x64xf32>
    %67 = arith.maximumf %65, %66 : vector<40x64xf32>
    %68 = vector.extract_strided_slice %64 {offsets = [80, 0], sizes = [40, 64], strides = [1, 1]} : vector<160x64xf32> to vector<40x64xf32>
    %69 = vector.extract_strided_slice %64 {offsets = [120, 0], sizes = [40, 64], strides = [1, 1]} : vector<160x64xf32> to vector<40x64xf32>
    %70 = arith.maximumf %68, %69 : vector<40x64xf32>
    %71 = arith.maximumf %67, %70 : vector<40x64xf32>
    %72 = vector.extract_strided_slice %71 {offsets = [0, 0], sizes = [38, 64], strides = [1, 1]} : vector<40x64xf32> to vector<38x64xf32>
    %73 = arith.addf %72, %6 : vector<38x64xf32>
    %cst_38 = arith.constant 0.000000e+00 : f32
    %74 = vector.broadcast %cst_38 : f32 to vector<38x64xf32>
    %75 = arith.maximumf %73, %74 : vector<38x64xf32>
    %c168 = arith.constant 168 : index
    %c0_39 = arith.constant 0 : index
    %76 = vector.load %arg9[%c168, %c0_39] : memref<416x64xf32, #tpu.memory_space<vmem>>, vector<38x64xf32>
    tpu.vector_store %arg9[%c168, %c0_39], %75 {strides = array<i32>} : memref<416x64xf32, #tpu.memory_space<vmem>>, vector<38x64xf32>,
    %cst_40 = arith.constant 0.000000e+00 : f32
    %77 = vector.broadcast %cst_40 : f32 to vector<2x64xf32>
    %c206 = arith.constant 206 : index
    %c0_41 = arith.constant 0 : index
    %78 = vector.load %arg9[%c206, %c0_41] : memref<416x64xf32, #tpu.memory_space<vmem>>, vector<2x64xf32>
    tpu.vector_store %arg9[%c206, %c0_41], %77 {strides = array<i32>} : memref<416x64xf32, #tpu.memory_space<vmem>>, vector<2x64xf32>,
    %c0_42 = arith.constant 0 : index
    %c640 = arith.constant 640 : index
    %c0_43 = arith.constant 0 : index
    %79 = vector.load %arg1[%c0_42, %c640, %c0_43] : memref<1x1280x72xbf16, #tpu.memory_space<vmem>>, vector<1x160x72xbf16>
    %80 = vector.shape_cast %79 : vector<1x160x72xbf16> to vector<160x72xbf16>
    %c0_44 = arith.constant 0 : index
    %c0_45 = arith.constant 0 : index
    %81 = vector.load %arg2[%c0_44, %c0_45] : memref<72x64xbf16, #tpu.memory_space<vmem>>, vector<72x64xbf16>
    %cst_46 = arith.constant dense<0.000000e+00> : vector<160x64xf32>
    %82 = tpu.matmul %80, %81, %cst_46 {dimension_numbers = #tpu.dot_dimension_numbers<[1], [0], [0], [1], [0, 0, 1, 1], [], []>} : vector<160x72xbf16>, vector<72x64xbf16>, vector<160x64xf32> -> vector<160x64xf32>
    %83 = vector.extract_strided_slice %82 {offsets = [0, 0], sizes = [40, 64], strides = [1, 1]} : vector<160x64xf32> to vector<40x64xf32>
    %84 = vector.extract_strided_slice %82 {offsets = [40, 0], sizes = [40, 64], strides = [1, 1]} : vector<160x64xf32> to vector<40x64xf32>
    %85 = arith.maximumf %83, %84 : vector<40x64xf32>
    %86 = vector.extract_strided_slice %82 {offsets = [80, 0], sizes = [40, 64], strides = [1, 1]} : vector<160x64xf32> to vector<40x64xf32>
    %87 = vector.extract_strided_slice %82 {offsets = [120, 0], sizes = [40, 64], strides = [1, 1]} : vector<160x64xf32> to vector<40x64xf32>
    %88 = arith.maximumf %86, %87 : vector<40x64xf32>
    %89 = arith.maximumf %85, %88 : vector<40x64xf32>
    %90 = vector.extract_strided_slice %89 {offsets = [0, 0], sizes = [38, 64], strides = [1, 1]} : vector<40x64xf32> to vector<38x64xf32>
    %91 = arith.addf %90, %6 : vector<38x64xf32>
    %cst_47 = arith.constant 0.000000e+00 : f32
    %92 = vector.broadcast %cst_47 : f32 to vector<38x64xf32>
    %93 = arith.maximumf %91, %92 : vector<38x64xf32>
    %c208 = arith.constant 208 : index
    %c0_48 = arith.constant 0 : index
    %94 = vector.load %arg9[%c208, %c0_48] : memref<416x64xf32, #tpu.memory_space<vmem>>, vector<38x64xf32>
    tpu.vector_store %arg9[%c208, %c0_48], %93 {strides = array<i32>} : memref<416x64xf32, #tpu.memory_space<vmem>>, vector<38x64xf32>,
    %cst_49 = arith.constant 0.000000e+00 : f32
    %95 = vector.broadcast %cst_49 : f32 to vector<2x64xf32>
    %c246 = arith.constant 246 : index
    %c0_50 = arith.constant 0 : index
    %96 = vector.load %arg9[%c246, %c0_50] : memref<416x64xf32, #tpu.memory_space<vmem>>, vector<2x64xf32>
    tpu.vector_store %arg9[%c246, %c0_50], %95 {strides = array<i32>} : memref<416x64xf32, #tpu.memory_space<vmem>>, vector<2x64xf32>,
    %c0_51 = arith.constant 0 : index
    %c800 = arith.constant 800 : index
    %c0_52 = arith.constant 0 : index
    %97 = vector.load %arg1[%c0_51, %c800, %c0_52] : memref<1x1280x72xbf16, #tpu.memory_space<vmem>>, vector<1x160x72xbf16>
    %98 = vector.shape_cast %97 : vector<1x160x72xbf16> to vector<160x72xbf16>
    %c0_53 = arith.constant 0 : index
    %c0_54 = arith.constant 0 : index
    %99 = vector.load %arg2[%c0_53, %c0_54] : memref<72x64xbf16, #tpu.memory_space<vmem>>, vector<72x64xbf16>
    %cst_55 = arith.constant dense<0.000000e+00> : vector<160x64xf32>
    %100 = tpu.matmul %98, %99, %cst_55 {dimension_numbers = #tpu.dot_dimension_numbers<[1], [0], [0], [1], [0, 0, 1, 1], [], []>} : vector<160x72xbf16>, vector<72x64xbf16>, vector<160x64xf32> -> vector<160x64xf32>
    %101 = vector.extract_strided_slice %100 {offsets = [0, 0], sizes = [40, 64], strides = [1, 1]} : vector<160x64xf32> to vector<40x64xf32>
    %102 = vector.extract_strided_slice %100 {offsets = [40, 0], sizes = [40, 64], strides = [1, 1]} : vector<160x64xf32> to vector<40x64xf32>
    %103 = arith.maximumf %101, %102 : vector<40x64xf32>
    %104 = vector.extract_strided_slice %100 {offsets = [80, 0], sizes = [40, 64], strides = [1, 1]} : vector<160x64xf32> to vector<40x64xf32>
    %105 = vector.extract_strided_slice %100 {offsets = [120, 0], sizes = [40, 64], strides = [1, 1]} : vector<160x64xf32> to vector<40x64xf32>
    %106 = arith.maximumf %104, %105 : vector<40x64xf32>
    %107 = arith.maximumf %103, %106 : vector<40x64xf32>
    %108 = vector.extract_strided_slice %107 {offsets = [0, 0], sizes = [38, 64], strides = [1, 1]} : vector<40x64xf32> to vector<38x64xf32>
    %109 = arith.addf %108, %6 : vector<38x64xf32>
    %cst_56 = arith.constant 0.000000e+00 : f32
    %110 = vector.broadcast %cst_56 : f32 to vector<38x64xf32>
    %111 = arith.maximumf %109, %110 : vector<38x64xf32>
    %c248 = arith.constant 248 : index
    %c0_57 = arith.constant 0 : index
    %112 = vector.load %arg9[%c248, %c0_57] : memref<416x64xf32, #tpu.memory_space<vmem>>, vector<38x64xf32>
    tpu.vector_store %arg9[%c248, %c0_57], %111 {strides = array<i32>} : memref<416x64xf32, #tpu.memory_space<vmem>>, vector<38x64xf32>,
    %cst_58 = arith.constant 0.000000e+00 : f32
    %113 = vector.broadcast %cst_58 : f32 to vector<2x64xf32>
    %c286 = arith.constant 286 : index
    %c0_59 = arith.constant 0 : index
    %114 = vector.load %arg9[%c286, %c0_59] : memref<416x64xf32, #tpu.memory_space<vmem>>, vector<2x64xf32>
    tpu.vector_store %arg9[%c286, %c0_59], %113 {strides = array<i32>} : memref<416x64xf32, #tpu.memory_space<vmem>>, vector<2x64xf32>,
    %c0_60 = arith.constant 0 : index
    %c960 = arith.constant 960 : index
    %c0_61 = arith.constant 0 : index
    %115 = vector.load %arg1[%c0_60, %c960, %c0_61] : memref<1x1280x72xbf16, #tpu.memory_space<vmem>>, vector<1x160x72xbf16>
    %116 = vector.shape_cast %115 : vector<1x160x72xbf16> to vector<160x72xbf16>
    %c0_62 = arith.constant 0 : index
    %c0_63 = arith.constant 0 : index
    %117 = vector.load %arg2[%c0_62, %c0_63] : memref<72x64xbf16, #tpu.memory_space<vmem>>, vector<72x64xbf16>
    %cst_64 = arith.constant dense<0.000000e+00> : vector<160x64xf32>
    %118 = tpu.matmul %116, %117, %cst_64 {dimension_numbers = #tpu.dot_dimension_numbers<[1], [0], [0], [1], [0, 0, 1, 1], [], []>} : vector<160x72xbf16>, vector<72x64xbf16>, vector<160x64xf32> -> vector<160x64xf32>
    %119 = vector.extract_strided_slice %118 {offsets = [0, 0], sizes = [40, 64], strides = [1, 1]} : vector<160x64xf32> to vector<40x64xf32>
    %120 = vector.extract_strided_slice %118 {offsets = [40, 0], sizes = [40, 64], strides = [1, 1]} : vector<160x64xf32> to vector<40x64xf32>
    %121 = arith.maximumf %119, %120 : vector<40x64xf32>
    %122 = vector.extract_strided_slice %118 {offsets = [80, 0], sizes = [40, 64], strides = [1, 1]} : vector<160x64xf32> to vector<40x64xf32>
    %123 = vector.extract_strided_slice %118 {offsets = [120, 0], sizes = [40, 64], strides = [1, 1]} : vector<160x64xf32> to vector<40x64xf32>
    %124 = arith.maximumf %122, %123 : vector<40x64xf32>
    %125 = arith.maximumf %121, %124 : vector<40x64xf32>
    %126 = vector.extract_strided_slice %125 {offsets = [0, 0], sizes = [38, 64], strides = [1, 1]} : vector<40x64xf32> to vector<38x64xf32>
    %127 = arith.addf %126, %6 : vector<38x64xf32>
    %cst_65 = arith.constant 0.000000e+00 : f32
    %128 = vector.broadcast %cst_65 : f32 to vector<38x64xf32>
    %129 = arith.maximumf %127, %128 : vector<38x64xf32>
    %c288 = arith.constant 288 : index
    %c0_66 = arith.constant 0 : index
    %130 = vector.load %arg9[%c288, %c0_66] : memref<416x64xf32, #tpu.memory_space<vmem>>, vector<38x64xf32>
    tpu.vector_store %arg9[%c288, %c0_66], %129 {strides = array<i32>} : memref<416x64xf32, #tpu.memory_space<vmem>>, vector<38x64xf32>,
    %cst_67 = arith.constant 0.000000e+00 : f32
    %131 = vector.broadcast %cst_67 : f32 to vector<2x64xf32>
    %c326 = arith.constant 326 : index
    %c0_68 = arith.constant 0 : index
    %132 = vector.load %arg9[%c326, %c0_68] : memref<416x64xf32, #tpu.memory_space<vmem>>, vector<2x64xf32>
    tpu.vector_store %arg9[%c326, %c0_68], %131 {strides = array<i32>} : memref<416x64xf32, #tpu.memory_space<vmem>>, vector<2x64xf32>,
    %c0_69 = arith.constant 0 : index
    %c1120 = arith.constant 1120 : index
    %c0_70 = arith.constant 0 : index
    %133 = vector.load %arg1[%c0_69, %c1120, %c0_70] : memref<1x1280x72xbf16, #tpu.memory_space<vmem>>, vector<1x160x72xbf16>
    %134 = vector.shape_cast %133 : vector<1x160x72xbf16> to vector<160x72xbf16>
    %c0_71 = arith.constant 0 : index
    %c0_72 = arith.constant 0 : index
    %135 = vector.load %arg2[%c0_71, %c0_72] : memref<72x64xbf16, #tpu.memory_space<vmem>>, vector<72x64xbf16>
    %cst_73 = arith.constant dense<0.000000e+00> : vector<160x64xf32>
    %136 = tpu.matmul %134, %135, %cst_73 {dimension_numbers = #tpu.dot_dimension_numbers<[1], [0], [0], [1], [0, 0, 1, 1], [], []>} : vector<160x72xbf16>, vector<72x64xbf16>, vector<160x64xf32> -> vector<160x64xf32>
    %137 = vector.extract_strided_slice %136 {offsets = [0, 0], sizes = [40, 64], strides = [1, 1]} : vector<160x64xf32> to vector<40x64xf32>
    %138 = vector.extract_strided_slice %136 {offsets = [40, 0], sizes = [40, 64], strides = [1, 1]} : vector<160x64xf32> to vector<40x64xf32>
    %139 = arith.maximumf %137, %138 : vector<40x64xf32>
    %140 = vector.extract_strided_slice %136 {offsets = [80, 0], sizes = [40, 64], strides = [1, 1]} : vector<160x64xf32> to vector<40x64xf32>
    %141 = vector.extract_strided_slice %136 {offsets = [120, 0], sizes = [40, 64], strides = [1, 1]} : vector<160x64xf32> to vector<40x64xf32>
    %142 = arith.maximumf %140, %141 : vector<40x64xf32>
    %143 = arith.maximumf %139, %142 : vector<40x64xf32>
    %144 = vector.extract_strided_slice %143 {offsets = [0, 0], sizes = [38, 64], strides = [1, 1]} : vector<40x64xf32> to vector<38x64xf32>
    %145 = arith.addf %144, %6 : vector<38x64xf32>
    %cst_74 = arith.constant 0.000000e+00 : f32
    %146 = vector.broadcast %cst_74 : f32 to vector<38x64xf32>
    %147 = arith.maximumf %145, %146 : vector<38x64xf32>
    %c328 = arith.constant 328 : index
    %c0_75 = arith.constant 0 : index
    %148 = vector.load %arg9[%c328, %c0_75] : memref<416x64xf32, #tpu.memory_space<vmem>>, vector<38x64xf32>
    tpu.vector_store %arg9[%c328, %c0_75], %147 {strides = array<i32>} : memref<416x64xf32, #tpu.memory_space<vmem>>, vector<38x64xf32>,
    %cst_76 = arith.constant 0.000000e+00 : f32
    %149 = vector.broadcast %cst_76 : f32 to vector<2x64xf32>
    %c366 = arith.constant 366 : index
    %c0_77 = arith.constant 0 : index
    %150 = vector.load %arg9[%c366, %c0_77] : memref<416x64xf32, #tpu.memory_space<vmem>>, vector<2x64xf32>
    tpu.vector_store %arg9[%c366, %c0_77], %149 {strides = array<i32>} : memref<416x64xf32, #tpu.memory_space<vmem>>, vector<2x64xf32>,
    %c0_78 = arith.constant 0 : index
    %c0_79 = arith.constant 0 : index
    %151 = vector.load %arg5[%c0_78, %c0_79] : memref<1x32xf32, #tpu.memory_space<vmem>>, vector<1x32xf32>
    %152 = vector.shape_cast %151 : vector<1x32xf32> to vector<1x32xf32>
    %153 = vector.broadcast %152 : vector<1x32xf32> to vector<19x32xf32>
    %cst_80 = arith.constant 0.000000e+00 : f32
    %154 = vector.broadcast %cst_80 : f32 to vector<19x32xf32>
    %cst_81 = arith.constant 0.000000e+00 : f32
    %155 = vector.broadcast %cst_81 : f32 to vector<19x32xf32>
    %c7 = arith.constant 7 : index
    %c0_82 = arith.constant 0 : index
    %156 = vector.load %arg9[%c7, %c0_82] : memref<416x64xf32, #tpu.memory_space<vmem>>, vector<80x64xf32>
    %157 = arith.truncf %156 : vector<80x64xf32> to vector<80x64xbf16>
    %c0_83 = arith.constant 0 : index
    %c0_84 = arith.constant 0 : index
    %158 = vector.load %arg4[%c0_83, %c0_84] : memref<576x32xbf16, #tpu.memory_space<vmem>>, vector<64x32xbf16>
    %cst_85 = arith.constant dense<0.000000e+00> : vector<80x32xf32>
    %159 = tpu.matmul %157, %158, %cst_85 {dimension_numbers = #tpu.dot_dimension_numbers<[1], [0], [0], [1], [0, 0, 1, 1], [], []>} : vector<80x64xbf16>, vector<64x32xbf16>, vector<80x32xf32> -> vector<80x32xf32>
    %c8 = arith.constant 8 : index
    %c0_86 = arith.constant 0 : index
    %160 = vector.load %arg9[%c8, %c0_86] : memref<416x64xf32, #tpu.memory_space<vmem>>, vector<80x64xf32>
    %161 = arith.truncf %160 : vector<80x64xf32> to vector<80x64xbf16>
    %c64 = arith.constant 64 : index
    %c0_87 = arith.constant 0 : index
    %162 = vector.load %arg4[%c64, %c0_87] : memref<576x32xbf16, #tpu.memory_space<vmem>>, vector<64x32xbf16>
    %cst_88 = arith.constant dense<0.000000e+00> : vector<80x32xf32>
    %163 = tpu.matmul %161, %162, %cst_88 {dimension_numbers = #tpu.dot_dimension_numbers<[1], [0], [0], [1], [0, 0, 1, 1], [], []>} : vector<80x64xbf16>, vector<64x32xbf16>, vector<80x32xf32> -> vector<80x32xf32>
    %164 = arith.addf %159, %163 : vector<80x32xf32>
    %c9 = arith.constant 9 : index
    %c0_89 = arith.constant 0 : index
    %165 = vector.load %arg9[%c9, %c0_89] : memref<416x64xf32, #tpu.memory_space<vmem>>, vector<80x64xf32>
    %166 = arith.truncf %165 : vector<80x64xf32> to vector<80x64xbf16>
    %c128_90 = arith.constant 128 : index
    %c0_91 = arith.constant 0 : index
    %167 = vector.load %arg4[%c128_90, %c0_91] : memref<576x32xbf16, #tpu.memory_space<vmem>>, vector<64x32xbf16>
    %cst_92 = arith.constant dense<0.000000e+00> : vector<80x32xf32>
    %168 = tpu.matmul %166, %167, %cst_92 {dimension_numbers = #tpu.dot_dimension_numbers<[1], [0], [0], [1], [0, 0, 1, 1], [], []>} : vector<80x64xbf16>, vector<64x32xbf16>, vector<80x32xf32> -> vector<80x32xf32>
    %169 = arith.addf %164, %168 : vector<80x32xf32>
    %c47 = arith.constant 47 : index
    %c0_93 = arith.constant 0 : index
    %170 = vector.load %arg9[%c47, %c0_93] : memref<416x64xf32, #tpu.memory_space<vmem>>, vector<80x64xf32>
    %171 = arith.truncf %170 : vector<80x64xf32> to vector<80x64xbf16>
    %c192 = arith.constant 192 : index
    %c0_94 = arith.constant 0 : index
    %172 = vector.load %arg4[%c192, %c0_94] : memref<576x32xbf16, #tpu.memory_space<vmem>>, vector<64x32xbf16>
    %cst_95 = arith.constant dense<0.000000e+00> : vector<80x32xf32>
    %173 = tpu.matmul %171, %172, %cst_95 {dimension_numbers = #tpu.dot_dimension_numbers<[1], [0], [0], [1], [0, 0, 1, 1], [], []>} : vector<80x64xbf16>, vector<64x32xbf16>, vector<80x32xf32> -> vector<80x32xf32>
    %174 = arith.addf %169, %173 : vector<80x32xf32>
    %c48_96 = arith.constant 48 : index
    %c0_97 = arith.constant 0 : index
    %175 = vector.load %arg9[%c48_96, %c0_97] : memref<416x64xf32, #tpu.memory_space<vmem>>, vector<80x64xf32>
    %176 = arith.truncf %175 : vector<80x64xf32> to vector<80x64xbf16>
    %c256 = arith.constant 256 : index
    %c0_98 = arith.constant 0 : index
    %177 = vector.load %arg4[%c256, %c0_98] : memref<576x32xbf16, #tpu.memory_space<vmem>>, vector<64x32xbf16>
    %cst_99 = arith.constant dense<0.000000e+00> : vector<80x32xf32>
    %178 = tpu.matmul %176, %177, %cst_99 {dimension_numbers = #tpu.dot_dimension_numbers<[1], [0], [0], [1], [0, 0, 1, 1], [], []>} : vector<80x64xbf16>, vector<64x32xbf16>, vector<80x32xf32> -> vector<80x32xf32>
    %179 = arith.addf %174, %178 : vector<80x32xf32>
    %c49 = arith.constant 49 : index
    %c0_100 = arith.constant 0 : index
    %180 = vector.load %arg9[%c49, %c0_100] : memref<416x64xf32, #tpu.memory_space<vmem>>, vector<80x64xf32>
    %181 = arith.truncf %180 : vector<80x64xf32> to vector<80x64xbf16>
    %c320_101 = arith.constant 320 : index
    %c0_102 = arith.constant 0 : index
    %182 = vector.load %arg4[%c320_101, %c0_102] : memref<576x32xbf16, #tpu.memory_space<vmem>>, vector<64x32xbf16>
    %cst_103 = arith.constant dense<0.000000e+00> : vector<80x32xf32>
    %183 = tpu.matmul %181, %182, %cst_103 {dimension_numbers = #tpu.dot_dimension_numbers<[1], [0], [0], [1], [0, 0, 1, 1], [], []>} : vector<80x64xbf16>, vector<64x32xbf16>, vector<80x32xf32> -> vector<80x32xf32>
    %184 = arith.addf %179, %183 : vector<80x32xf32>
    %c87 = arith.constant 87 : index
    %c0_104 = arith.constant 0 : index
    %185 = vector.load %arg9[%c87, %c0_104] : memref<416x64xf32, #tpu.memory_space<vmem>>, vector<80x64xf32>
    %186 = arith.truncf %185 : vector<80x64xf32> to vector<80x64xbf16>
    %c384 = arith.constant 384 : index
    %c0_105 = arith.constant 0 : index
    %187 = vector.load %arg4[%c384, %c0_105] : memref<576x32xbf16, #tpu.memory_space<vmem>>, vector<64x32xbf16>
    %cst_106 = arith.constant dense<0.000000e+00> : vector<80x32xf32>
    %188 = tpu.matmul %186, %187, %cst_106 {dimension_numbers = #tpu.dot_dimension_numbers<[1], [0], [0], [1], [0, 0, 1, 1], [], []>} : vector<80x64xbf16>, vector<64x32xbf16>, vector<80x32xf32> -> vector<80x32xf32>
    %189 = arith.addf %184, %188 : vector<80x32xf32>
    %c88_107 = arith.constant 88 : index
    %c0_108 = arith.constant 0 : index
    %190 = vector.load %arg9[%c88_107, %c0_108] : memref<416x64xf32, #tpu.memory_space<vmem>>, vector<80x64xf32>
    %191 = arith.truncf %190 : vector<80x64xf32> to vector<80x64xbf16>
    %c448 = arith.constant 448 : index
    %c0_109 = arith.constant 0 : index
    %192 = vector.load %arg4[%c448, %c0_109] : memref<576x32xbf16, #tpu.memory_space<vmem>>, vector<64x32xbf16>
    %cst_110 = arith.constant dense<0.000000e+00> : vector<80x32xf32>
    %193 = tpu.matmul %191, %192, %cst_110 {dimension_numbers = #tpu.dot_dimension_numbers<[1], [0], [0], [1], [0, 0, 1, 1], [], []>} : vector<80x64xbf16>, vector<64x32xbf16>, vector<80x32xf32> -> vector<80x32xf32>
    %194 = arith.addf %189, %193 : vector<80x32xf32>
    %c89 = arith.constant 89 : index
    %c0_111 = arith.constant 0 : index
    %195 = vector.load %arg9[%c89, %c0_111] : memref<416x64xf32, #tpu.memory_space<vmem>>, vector<80x64xf32>
    %196 = arith.truncf %195 : vector<80x64xf32> to vector<80x64xbf16>
    %c512 = arith.constant 512 : index
    %c0_112 = arith.constant 0 : index
    %197 = vector.load %arg4[%c512, %c0_112] : memref<576x32xbf16, #tpu.memory_space<vmem>>, vector<64x32xbf16>
    %cst_113 = arith.constant dense<0.000000e+00> : vector<80x32xf32>
    %198 = tpu.matmul %196, %197, %cst_113 {dimension_numbers = #tpu.dot_dimension_numbers<[1], [0], [0], [1], [0, 0, 1, 1], [], []>} : vector<80x64xbf16>, vector<64x32xbf16>, vector<80x32xf32> -> vector<80x32xf32>
    %199 = arith.addf %194, %198 : vector<80x32xf32>
    %200 = vector.extract_strided_slice %199 {offsets = [0, 0], sizes = [40, 32], strides = [1, 1]} : vector<80x32xf32> to vector<40x32xf32>
    %201 = vector.extract_strided_slice %199 {offsets = [40, 0], sizes = [40, 32], strides = [1, 1]} : vector<80x32xf32> to vector<40x32xf32>
    %202 = arith.maximumf %200, %201 : vector<40x32xf32>
    %c0_114 = arith.constant 0 : index
    %c0_115 = arith.constant 0 : index
    %203 = vector.load %arg10[%c0_114, %c0_115] : memref<40x32xf32, #tpu.memory_space<vmem>>, vector<40x32xf32>
    tpu.vector_store %arg10[%c0_114, %c0_115], %202 {strides = array<i32>} : memref<40x32xf32, #tpu.memory_space<vmem>>, vector<40x32xf32>,
    %c0_116 = arith.constant 0 : index
    %c0_117 = arith.constant 0 : index
    %204 = tpu.strided_load %arg10[%c0_116, %c0_117] {strides = array<i32: 2, 1>} : memref<40x32xf32, #tpu.memory_space<vmem>>, vector<19x32xf32>
    %c1 = arith.constant 1 : index
    %c0_118 = arith.constant 0 : index
    %205 = tpu.strided_load %arg10[%c1, %c0_118] {strides = array<i32: 2, 1>} : memref<40x32xf32, #tpu.memory_space<vmem>>, vector<19x32xf32>
    %206 = arith.maximumf %204, %205 : vector<19x32xf32>
    %207 = arith.addf %206, %153 : vector<19x32xf32>
    %cst_119 = arith.constant 0.000000e+00 : f32
    %208 = vector.broadcast %cst_119 : f32 to vector<19x32xf32>
    %209 = arith.maximumf %207, %208 : vector<19x32xf32>
    %c0_120 = arith.constant 0 : index
    %c0_121 = arith.constant 0 : index
    %210 = vector.load %arg6[%c0_120, %c0_121] : memref<192x32xf32, #tpu.memory_space<vmem>>, vector<19x32xf32>
    %211 = arith.mulf %209, %210 : vector<19x32xf32>
    %212 = arith.addf %154, %211 : vector<19x32xf32>
    %c96 = arith.constant 96 : index
    %c0_122 = arith.constant 0 : index
    %213 = vector.load %arg6[%c96, %c0_122] : memref<192x32xf32, #tpu.memory_space<vmem>>, vector<19x32xf32>
    %214 = arith.mulf %209, %213 : vector<19x32xf32>
    %215 = arith.addf %155, %214 : vector<19x32xf32>
    %c87_123 = arith.constant 87 : index
    %c0_124 = arith.constant 0 : index
    %216 = vector.load %arg9[%c87_123, %c0_124] : memref<416x64xf32, #tpu.memory_space<vmem>>, vector<80x64xf32>
    %217 = arith.truncf %216 : vector<80x64xf32> to vector<80x64xbf16>
    %c0_125 = arith.constant 0 : index
    %c0_126 = arith.constant 0 : index
    %218 = vector.load %arg4[%c0_125, %c0_126] : memref<576x32xbf16, #tpu.memory_space<vmem>>, vector<64x32xbf16>
    %cst_127 = arith.constant dense<0.000000e+00> : vector<80x32xf32>
    %219 = tpu.matmul %217, %218, %cst_127 {dimension_numbers = #tpu.dot_dimension_numbers<[1], [0], [0], [1], [0, 0, 1, 1], [], []>} : vector<80x64xbf16>, vector<64x32xbf16>, vector<80x32xf32> -> vector<80x32xf32>
    %c88_128 = arith.constant 88 : index
    %c0_129 = arith.constant 0 : index
    %220 = vector.load %arg9[%c88_128, %c0_129] : memref<416x64xf32, #tpu.memory_space<vmem>>, vector<80x64xf32>
    %221 = arith.truncf %220 : vector<80x64xf32> to vector<80x64xbf16>
    %c64_130 = arith.constant 64 : index
    %c0_131 = arith.constant 0 : index
    %222 = vector.load %arg4[%c64_130, %c0_131] : memref<576x32xbf16, #tpu.memory_space<vmem>>, vector<64x32xbf16>
    %cst_132 = arith.constant dense<0.000000e+00> : vector<80x32xf32>
    %223 = tpu.matmul %221, %222, %cst_132 {dimension_numbers = #tpu.dot_dimension_numbers<[1], [0], [0], [1], [0, 0, 1, 1], [], []>} : vector<80x64xbf16>, vector<64x32xbf16>, vector<80x32xf32> -> vector<80x32xf32>
    %224 = arith.addf %219, %223 : vector<80x32xf32>
    %c89_133 = arith.constant 89 : index
    %c0_134 = arith.constant 0 : index
    %225 = vector.load %arg9[%c89_133, %c0_134] : memref<416x64xf32, #tpu.memory_space<vmem>>, vector<80x64xf32>
    %226 = arith.truncf %225 : vector<80x64xf32> to vector<80x64xbf16>
    %c128_135 = arith.constant 128 : index
    %c0_136 = arith.constant 0 : index
    %227 = vector.load %arg4[%c128_135, %c0_136] : memref<576x32xbf16, #tpu.memory_space<vmem>>, vector<64x32xbf16>
    %cst_137 = arith.constant dense<0.000000e+00> : vector<80x32xf32>
    %228 = tpu.matmul %226, %227, %cst_137 {dimension_numbers = #tpu.dot_dimension_numbers<[1], [0], [0], [1], [0, 0, 1, 1], [], []>} : vector<80x64xbf16>, vector<64x32xbf16>, vector<80x32xf32> -> vector<80x32xf32>
    %229 = arith.addf %224, %228 : vector<80x32xf32>
    %c127 = arith.constant 127 : index
    %c0_138 = arith.constant 0 : index
    %230 = vector.load %arg9[%c127, %c0_138] : memref<416x64xf32, #tpu.memory_space<vmem>>, vector<80x64xf32>
    %231 = arith.truncf %230 : vector<80x64xf32> to vector<80x64xbf16>
    %c192_139 = arith.constant 192 : index
    %c0_140 = arith.constant 0 : index
    %232 = vector.load %arg4[%c192_139, %c0_140] : memref<576x32xbf16, #tpu.memory_space<vmem>>, vector<64x32xbf16>
    %cst_141 = arith.constant dense<0.000000e+00> : vector<80x32xf32>
    %233 = tpu.matmul %231, %232, %cst_141 {dimension_numbers = #tpu.dot_dimension_numbers<[1], [0], [0], [1], [0, 0, 1, 1], [], []>} : vector<80x64xbf16>, vector<64x32xbf16>, vector<80x32xf32> -> vector<80x32xf32>
    %234 = arith.addf %229, %233 : vector<80x32xf32>
    %c128_142 = arith.constant 128 : index
    %c0_143 = arith.constant 0 : index
    %235 = vector.load %arg9[%c128_142, %c0_143] : memref<416x64xf32, #tpu.memory_space<vmem>>, vector<80x64xf32>
    %236 = arith.truncf %235 : vector<80x64xf32> to vector<80x64xbf16>
    %c256_144 = arith.constant 256 : index
    %c0_145 = arith.constant 0 : index
    %237 = vector.load %arg4[%c256_144, %c0_145] : memref<576x32xbf16, #tpu.memory_space<vmem>>, vector<64x32xbf16>
    %cst_146 = arith.constant dense<0.000000e+00> : vector<80x32xf32>
    %238 = tpu.matmul %236, %237, %cst_146 {dimension_numbers = #tpu.dot_dimension_numbers<[1], [0], [0], [1], [0, 0, 1, 1], [], []>} : vector<80x64xbf16>, vector<64x32xbf16>, vector<80x32xf32> -> vector<80x32xf32>
    %239 = arith.addf %234, %238 : vector<80x32xf32>
    %c129 = arith.constant 129 : index
    %c0_147 = arith.constant 0 : index
    %240 = vector.load %arg9[%c129, %c0_147] : memref<416x64xf32, #tpu.memory_space<vmem>>, vector<80x64xf32>
    %241 = arith.truncf %240 : vector<80x64xf32> to vector<80x64xbf16>
    %c320_148 = arith.constant 320 : index
    %c0_149 = arith.constant 0 : index
    %242 = vector.load %arg4[%c320_148, %c0_149] : memref<576x32xbf16, #tpu.memory_space<vmem>>, vector<64x32xbf16>
    %cst_150 = arith.constant dense<0.000000e+00> : vector<80x32xf32>
    %243 = tpu.matmul %241, %242, %cst_150 {dimension_numbers = #tpu.dot_dimension_numbers<[1], [0], [0], [1], [0, 0, 1, 1], [], []>} : vector<80x64xbf16>, vector<64x32xbf16>, vector<80x32xf32> -> vector<80x32xf32>
    %244 = arith.addf %239, %243 : vector<80x32xf32>
    %c167 = arith.constant 167 : index
    %c0_151 = arith.constant 0 : index
    %245 = vector.load %arg9[%c167, %c0_151] : memref<416x64xf32, #tpu.memory_space<vmem>>, vector<80x64xf32>
    %246 = arith.truncf %245 : vector<80x64xf32> to vector<80x64xbf16>
    %c384_152 = arith.constant 384 : index
    %c0_153 = arith.constant 0 : index
    %247 = vector.load %arg4[%c384_152, %c0_153] : memref<576x32xbf16, #tpu.memory_space<vmem>>, vector<64x32xbf16>
    %cst_154 = arith.constant dense<0.000000e+00> : vector<80x32xf32>
    %248 = tpu.matmul %246, %247, %cst_154 {dimension_numbers = #tpu.dot_dimension_numbers<[1], [0], [0], [1], [0, 0, 1, 1], [], []>} : vector<80x64xbf16>, vector<64x32xbf16>, vector<80x32xf32> -> vector<80x32xf32>
    %249 = arith.addf %244, %248 : vector<80x32xf32>
    %c168_155 = arith.constant 168 : index
    %c0_156 = arith.constant 0 : index
    %250 = vector.load %arg9[%c168_155, %c0_156] : memref<416x64xf32, #tpu.memory_space<vmem>>, vector<80x64xf32>
    %251 = arith.truncf %250 : vector<80x64xf32> to vector<80x64xbf16>
    %c448_157 = arith.constant 448 : index
    %c0_158 = arith.constant 0 : index
    %252 = vector.load %arg4[%c448_157, %c0_158] : memref<576x32xbf16, #tpu.memory_space<vmem>>, vector<64x32xbf16>
    %cst_159 = arith.constant dense<0.000000e+00> : vector<80x32xf32>
    %253 = tpu.matmul %251, %252, %cst_159 {dimension_numbers = #tpu.dot_dimension_numbers<[1], [0], [0], [1], [0, 0, 1, 1], [], []>} : vector<80x64xbf16>, vector<64x32xbf16>, vector<80x32xf32> -> vector<80x32xf32>
    %254 = arith.addf %249, %253 : vector<80x32xf32>
    %c169 = arith.constant 169 : index
    %c0_160 = arith.constant 0 : index
    %255 = vector.load %arg9[%c169, %c0_160] : memref<416x64xf32, #tpu.memory_space<vmem>>, vector<80x64xf32>
    %256 = arith.truncf %255 : vector<80x64xf32> to vector<80x64xbf16>
    %c512_161 = arith.constant 512 : index
    %c0_162 = arith.constant 0 : index
    %257 = vector.load %arg4[%c512_161, %c0_162] : memref<576x32xbf16, #tpu.memory_space<vmem>>, vector<64x32xbf16>
    %cst_163 = arith.constant dense<0.000000e+00> : vector<80x32xf32>
    %258 = tpu.matmul %256, %257, %cst_163 {dimension_numbers = #tpu.dot_dimension_numbers<[1], [0], [0], [1], [0, 0, 1, 1], [], []>} : vector<80x64xbf16>, vector<64x32xbf16>, vector<80x32xf32> -> vector<80x32xf32>
    %259 = arith.addf %254, %258 : vector<80x32xf32>
    %260 = vector.extract_strided_slice %259 {offsets = [0, 0], sizes = [40, 32], strides = [1, 1]} : vector<80x32xf32> to vector<40x32xf32>
    %261 = vector.extract_strided_slice %259 {offsets = [40, 0], sizes = [40, 32], strides = [1, 1]} : vector<80x32xf32> to vector<40x32xf32>
    %262 = arith.maximumf %260, %261 : vector<40x32xf32>
    %c0_164 = arith.constant 0 : index
    %c0_165 = arith.constant 0 : index
    %263 = vector.load %arg10[%c0_164, %c0_165] : memref<40x32xf32, #tpu.memory_space<vmem>>, vector<40x32xf32>
    tpu.vector_store %arg10[%c0_164, %c0_165], %262 {strides = array<i32>} : memref<40x32xf32, #tpu.memory_space<vmem>>, vector<40x32xf32>,
    %c0_166 = arith.constant 0 : index
    %c0_167 = arith.constant 0 : index
    %264 = tpu.strided_load %arg10[%c0_166, %c0_167] {strides = array<i32: 2, 1>} : memref<40x32xf32, #tpu.memory_space<vmem>>, vector<19x32xf32>
    %c1_168 = arith.constant 1 : index
    %c0_169 = arith.constant 0 : index
    %265 = tpu.strided_load %arg10[%c1_168, %c0_169] {strides = array<i32: 2, 1>} : memref<40x32xf32, #tpu.memory_space<vmem>>, vector<19x32xf32>
    %266 = arith.maximumf %264, %265 : vector<19x32xf32>
    %267 = arith.addf %266, %153 : vector<19x32xf32>
    %cst_170 = arith.constant 0.000000e+00 : f32
    %268 = vector.broadcast %cst_170 : f32 to vector<19x32xf32>
    %269 = arith.maximumf %267, %268 : vector<19x32xf32>
    %c24 = arith.constant 24 : index
    %c0_171 = arith.constant 0 : index
    %270 = vector.load %arg6[%c24, %c0_171] : memref<192x32xf32, #tpu.memory_space<vmem>>, vector<19x32xf32>
    %271 = arith.mulf %269, %270 : vector<19x32xf32>
    %272 = arith.addf %212, %271 : vector<19x32xf32>
    %c120 = arith.constant 120 : index
    %c0_172 = arith.constant 0 : index
    %273 = vector.load %arg6[%c120, %c0_172] : memref<192x32xf32, #tpu.memory_space<vmem>>, vector<19x32xf32>
    %274 = arith.mulf %269, %273 : vector<19x32xf32>
    %275 = arith.addf %215, %274 : vector<19x32xf32>
    %c167_173 = arith.constant 167 : index
    %c0_174 = arith.constant 0 : index
    %276 = vector.load %arg9[%c167_173, %c0_174] : memref<416x64xf32, #tpu.memory_space<vmem>>, vector<80x64xf32>
    %277 = arith.truncf %276 : vector<80x64xf32> to vector<80x64xbf16>
    %c0_175 = arith.constant 0 : index
    %c0_176 = arith.constant 0 : index
    %278 = vector.load %arg4[%c0_175, %c0_176] : memref<576x32xbf16, #tpu.memory_space<vmem>>, vector<64x32xbf16>
    %cst_177 = arith.constant dense<0.000000e+00> : vector<80x32xf32>
    %279 = tpu.matmul %277, %278, %cst_177 {dimension_numbers = #tpu.dot_dimension_numbers<[1], [0], [0], [1], [0, 0, 1, 1], [], []>} : vector<80x64xbf16>, vector<64x32xbf16>, vector<80x32xf32> -> vector<80x32xf32>
    %c168_178 = arith.constant 168 : index
    %c0_179 = arith.constant 0 : index
    %280 = vector.load %arg9[%c168_178, %c0_179] : memref<416x64xf32, #tpu.memory_space<vmem>>, vector<80x64xf32>
    %281 = arith.truncf %280 : vector<80x64xf32> to vector<80x64xbf16>
    %c64_180 = arith.constant 64 : index
    %c0_181 = arith.constant 0 : index
    %282 = vector.load %arg4[%c64_180, %c0_181] : memref<576x32xbf16, #tpu.memory_space<vmem>>, vector<64x32xbf16>
    %cst_182 = arith.constant dense<0.000000e+00> : vector<80x32xf32>
    %283 = tpu.matmul %281, %282, %cst_182 {dimension_numbers = #tpu.dot_dimension_numbers<[1], [0], [0], [1], [0, 0, 1, 1], [], []>} : vector<80x64xbf16>, vector<64x32xbf16>, vector<80x32xf32> -> vector<80x32xf32>
    %284 = arith.addf %279, %283 : vector<80x32xf32>
    %c169_183 = arith.constant 169 : index
    %c0_184 = arith.constant 0 : index
    %285 = vector.load %arg9[%c169_183, %c0_184] : memref<416x64xf32, #tpu.memory_space<vmem>>, vector<80x64xf32>
    %286 = arith.truncf %285 : vector<80x64xf32> to vector<80x64xbf16>
    %c128_185 = arith.constant 128 : index
    %c0_186 = arith.constant 0 : index
    %287 = vector.load %arg4[%c128_185, %c0_186] : memref<576x32xbf16, #tpu.memory_space<vmem>>, vector<64x32xbf16>
    %cst_187 = arith.constant dense<0.000000e+00> : vector<80x32xf32>
    %288 = tpu.matmul %286, %287, %cst_187 {dimension_numbers = #tpu.dot_dimension_numbers<[1], [0], [0], [1], [0, 0, 1, 1], [], []>} : vector<80x64xbf16>, vector<64x32xbf16>, vector<80x32xf32> -> vector<80x32xf32>
    %289 = arith.addf %284, %288 : vector<80x32xf32>
    %c207 = arith.constant 207 : index
    %c0_188 = arith.constant 0 : index
    %290 = vector.load %arg9[%c207, %c0_188] : memref<416x64xf32, #tpu.memory_space<vmem>>, vector<80x64xf32>
    %291 = arith.truncf %290 : vector<80x64xf32> to vector<80x64xbf16>
    %c192_189 = arith.constant 192 : index
    %c0_190 = arith.constant 0 : index
    %292 = vector.load %arg4[%c192_189, %c0_190] : memref<576x32xbf16, #tpu.memory_space<vmem>>, vector<64x32xbf16>
    %cst_191 = arith.constant dense<0.000000e+00> : vector<80x32xf32>
    %293 = tpu.matmul %291, %292, %cst_191 {dimension_numbers = #tpu.dot_dimension_numbers<[1], [0], [0], [1], [0, 0, 1, 1], [], []>} : vector<80x64xbf16>, vector<64x32xbf16>, vector<80x32xf32> -> vector<80x32xf32>
    %294 = arith.addf %289, %293 : vector<80x32xf32>
    %c208_192 = arith.constant 208 : index
    %c0_193 = arith.constant 0 : index
    %295 = vector.load %arg9[%c208_192, %c0_193] : memref<416x64xf32, #tpu.memory_space<vmem>>, vector<80x64xf32>
    %296 = arith.truncf %295 : vector<80x64xf32> to vector<80x64xbf16>
    %c256_194 = arith.constant 256 : index
    %c0_195 = arith.constant 0 : index
    %297 = vector.load %arg4[%c256_194, %c0_195] : memref<576x32xbf16, #tpu.memory_space<vmem>>, vector<64x32xbf16>
    %cst_196 = arith.constant dense<0.000000e+00> : vector<80x32xf32>
    %298 = tpu.matmul %296, %297, %cst_196 {dimension_numbers = #tpu.dot_dimension_numbers<[1], [0], [0], [1], [0, 0, 1, 1], [], []>} : vector<80x64xbf16>, vector<64x32xbf16>, vector<80x32xf32> -> vector<80x32xf32>
    %299 = arith.addf %294, %298 : vector<80x32xf32>
    %c209 = arith.constant 209 : index
    %c0_197 = arith.constant 0 : index
    %300 = vector.load %arg9[%c209, %c0_197] : memref<416x64xf32, #tpu.memory_space<vmem>>, vector<80x64xf32>
    %301 = arith.truncf %300 : vector<80x64xf32> to vector<80x64xbf16>
    %c320_198 = arith.constant 320 : index
    %c0_199 = arith.constant 0 : index
    %302 = vector.load %arg4[%c320_198, %c0_199] : memref<576x32xbf16, #tpu.memory_space<vmem>>, vector<64x32xbf16>
    %cst_200 = arith.constant dense<0.000000e+00> : vector<80x32xf32>
    %303 = tpu.matmul %301, %302, %cst_200 {dimension_numbers = #tpu.dot_dimension_numbers<[1], [0], [0], [1], [0, 0, 1, 1], [], []>} : vector<80x64xbf16>, vector<64x32xbf16>, vector<80x32xf32> -> vector<80x32xf32>
    %304 = arith.addf %299, %303 : vector<80x32xf32>
    %c247 = arith.constant 247 : index
    %c0_201 = arith.constant 0 : index
    %305 = vector.load %arg9[%c247, %c0_201] : memref<416x64xf32, #tpu.memory_space<vmem>>, vector<80x64xf32>
    %306 = arith.truncf %305 : vector<80x64xf32> to vector<80x64xbf16>
    %c384_202 = arith.constant 384 : index
    %c0_203 = arith.constant 0 : index
    %307 = vector.load %arg4[%c384_202, %c0_203] : memref<576x32xbf16, #tpu.memory_space<vmem>>, vector<64x32xbf16>
    %cst_204 = arith.constant dense<0.000000e+00> : vector<80x32xf32>
    %308 = tpu.matmul %306, %307, %cst_204 {dimension_numbers = #tpu.dot_dimension_numbers<[1], [0], [0], [1], [0, 0, 1, 1], [], []>} : vector<80x64xbf16>, vector<64x32xbf16>, vector<80x32xf32> -> vector<80x32xf32>
    %309 = arith.addf %304, %308 : vector<80x32xf32>
    %c248_205 = arith.constant 248 : index
    %c0_206 = arith.constant 0 : index
    %310 = vector.load %arg9[%c248_205, %c0_206] : memref<416x64xf32, #tpu.memory_space<vmem>>, vector<80x64xf32>
    %311 = arith.truncf %310 : vector<80x64xf32> to vector<80x64xbf16>
    %c448_207 = arith.constant 448 : index
    %c0_208 = arith.constant 0 : index
    %312 = vector.load %arg4[%c448_207, %c0_208] : memref<576x32xbf16, #tpu.memory_space<vmem>>, vector<64x32xbf16>
    %cst_209 = arith.constant dense<0.000000e+00> : vector<80x32xf32>
    %313 = tpu.matmul %311, %312, %cst_209 {dimension_numbers = #tpu.dot_dimension_numbers<[1], [0], [0], [1], [0, 0, 1, 1], [], []>} : vector<80x64xbf16>, vector<64x32xbf16>, vector<80x32xf32> -> vector<80x32xf32>
    %314 = arith.addf %309, %313 : vector<80x32xf32>
    %c249 = arith.constant 249 : index
    %c0_210 = arith.constant 0 : index
    %315 = vector.load %arg9[%c249, %c0_210] : memref<416x64xf32, #tpu.memory_space<vmem>>, vector<80x64xf32>
    %316 = arith.truncf %315 : vector<80x64xf32> to vector<80x64xbf16>
    %c512_211 = arith.constant 512 : index
    %c0_212 = arith.constant 0 : index
    %317 = vector.load %arg4[%c512_211, %c0_212] : memref<576x32xbf16, #tpu.memory_space<vmem>>, vector<64x32xbf16>
    %cst_213 = arith.constant dense<0.000000e+00> : vector<80x32xf32>
    %318 = tpu.matmul %316, %317, %cst_213 {dimension_numbers = #tpu.dot_dimension_numbers<[1], [0], [0], [1], [0, 0, 1, 1], [], []>} : vector<80x64xbf16>, vector<64x32xbf16>, vector<80x32xf32> -> vector<80x32xf32>
    %319 = arith.addf %314, %318 : vector<80x32xf32>
    %320 = vector.extract_strided_slice %319 {offsets = [0, 0], sizes = [40, 32], strides = [1, 1]} : vector<80x32xf32> to vector<40x32xf32>
    %321 = vector.extract_strided_slice %319 {offsets = [40, 0], sizes = [40, 32], strides = [1, 1]} : vector<80x32xf32> to vector<40x32xf32>
    %322 = arith.maximumf %320, %321 : vector<40x32xf32>
    %c0_214 = arith.constant 0 : index
    %c0_215 = arith.constant 0 : index
    %323 = vector.load %arg10[%c0_214, %c0_215] : memref<40x32xf32, #tpu.memory_space<vmem>>, vector<40x32xf32>
    tpu.vector_store %arg10[%c0_214, %c0_215], %322 {strides = array<i32>} : memref<40x32xf32, #tpu.memory_space<vmem>>, vector<40x32xf32>,
    %c0_216 = arith.constant 0 : index
    %c0_217 = arith.constant 0 : index
    %324 = tpu.strided_load %arg10[%c0_216, %c0_217] {strides = array<i32: 2, 1>} : memref<40x32xf32, #tpu.memory_space<vmem>>, vector<19x32xf32>
    %c1_218 = arith.constant 1 : index
    %c0_219 = arith.constant 0 : index
    %325 = tpu.strided_load %arg10[%c1_218, %c0_219] {strides = array<i32: 2, 1>} : memref<40x32xf32, #tpu.memory_space<vmem>>, vector<19x32xf32>
    %326 = arith.maximumf %324, %325 : vector<19x32xf32>
    %327 = arith.addf %326, %153 : vector<19x32xf32>
    %cst_220 = arith.constant 0.000000e+00 : f32
    %328 = vector.broadcast %cst_220 : f32 to vector<19x32xf32>
    %329 = arith.maximumf %327, %328 : vector<19x32xf32>
    %c48_221 = arith.constant 48 : index
    %c0_222 = arith.constant 0 : index
    %330 = vector.load %arg6[%c48_221, %c0_222] : memref<192x32xf32, #tpu.memory_space<vmem>>, vector<19x32xf32>
    %331 = arith.mulf %329, %330 : vector<19x32xf32>
    %332 = arith.addf %272, %331 : vector<19x32xf32>
    %c144 = arith.constant 144 : index
    %c0_223 = arith.constant 0 : index
    %333 = vector.load %arg6[%c144, %c0_223] : memref<192x32xf32, #tpu.memory_space<vmem>>, vector<19x32xf32>
    %334 = arith.mulf %329, %333 : vector<19x32xf32>
    %335 = arith.addf %275, %334 : vector<19x32xf32>
    %c247_224 = arith.constant 247 : index
    %c0_225 = arith.constant 0 : index
    %336 = vector.load %arg9[%c247_224, %c0_225] : memref<416x64xf32, #tpu.memory_space<vmem>>, vector<80x64xf32>
    %337 = arith.truncf %336 : vector<80x64xf32> to vector<80x64xbf16>
    %c0_226 = arith.constant 0 : index
    %c0_227 = arith.constant 0 : index
    %338 = vector.load %arg4[%c0_226, %c0_227] : memref<576x32xbf16, #tpu.memory_space<vmem>>, vector<64x32xbf16>
    %cst_228 = arith.constant dense<0.000000e+00> : vector<80x32xf32>
    %339 = tpu.matmul %337, %338, %cst_228 {dimension_numbers = #tpu.dot_dimension_numbers<[1], [0], [0], [1], [0, 0, 1, 1], [], []>} : vector<80x64xbf16>, vector<64x32xbf16>, vector<80x32xf32> -> vector<80x32xf32>
    %c248_229 = arith.constant 248 : index
    %c0_230 = arith.constant 0 : index
    %340 = vector.load %arg9[%c248_229, %c0_230] : memref<416x64xf32, #tpu.memory_space<vmem>>, vector<80x64xf32>
    %341 = arith.truncf %340 : vector<80x64xf32> to vector<80x64xbf16>
    %c64_231 = arith.constant 64 : index
    %c0_232 = arith.constant 0 : index
    %342 = vector.load %arg4[%c64_231, %c0_232] : memref<576x32xbf16, #tpu.memory_space<vmem>>, vector<64x32xbf16>
    %cst_233 = arith.constant dense<0.000000e+00> : vector<80x32xf32>
    %343 = tpu.matmul %341, %342, %cst_233 {dimension_numbers = #tpu.dot_dimension_numbers<[1], [0], [0], [1], [0, 0, 1, 1], [], []>} : vector<80x64xbf16>, vector<64x32xbf16>, vector<80x32xf32> -> vector<80x32xf32>
    %344 = arith.addf %339, %343 : vector<80x32xf32>
    %c249_234 = arith.constant 249 : index
    %c0_235 = arith.constant 0 : index
    %345 = vector.load %arg9[%c249_234, %c0_235] : memref<416x64xf32, #tpu.memory_space<vmem>>, vector<80x64xf32>
    %346 = arith.truncf %345 : vector<80x64xf32> to vector<80x64xbf16>
    %c128_236 = arith.constant 128 : index
    %c0_237 = arith.constant 0 : index
    %347 = vector.load %arg4[%c128_236, %c0_237] : memref<576x32xbf16, #tpu.memory_space<vmem>>, vector<64x32xbf16>
    %cst_238 = arith.constant dense<0.000000e+00> : vector<80x32xf32>
    %348 = tpu.matmul %346, %347, %cst_238 {dimension_numbers = #tpu.dot_dimension_numbers<[1], [0], [0], [1], [0, 0, 1, 1], [], []>} : vector<80x64xbf16>, vector<64x32xbf16>, vector<80x32xf32> -> vector<80x32xf32>
    %349 = arith.addf %344, %348 : vector<80x32xf32>
    %c287 = arith.constant 287 : index
    %c0_239 = arith.constant 0 : index
    %350 = vector.load %arg9[%c287, %c0_239] : memref<416x64xf32, #tpu.memory_space<vmem>>, vector<80x64xf32>
    %351 = arith.truncf %350 : vector<80x64xf32> to vector<80x64xbf16>
    %c192_240 = arith.constant 192 : index
    %c0_241 = arith.constant 0 : index
    %352 = vector.load %arg4[%c192_240, %c0_241] : memref<576x32xbf16, #tpu.memory_space<vmem>>, vector<64x32xbf16>
    %cst_242 = arith.constant dense<0.000000e+00> : vector<80x32xf32>
    %353 = tpu.matmul %351, %352, %cst_242 {dimension_numbers = #tpu.dot_dimension_numbers<[1], [0], [0], [1], [0, 0, 1, 1], [], []>} : vector<80x64xbf16>, vector<64x32xbf16>, vector<80x32xf32> -> vector<80x32xf32>
    %354 = arith.addf %349, %353 : vector<80x32xf32>
    %c288_243 = arith.constant 288 : index
    %c0_244 = arith.constant 0 : index
    %355 = vector.load %arg9[%c288_243, %c0_244] : memref<416x64xf32, #tpu.memory_space<vmem>>, vector<80x64xf32>
    %356 = arith.truncf %355 : vector<80x64xf32> to vector<80x64xbf16>
    %c256_245 = arith.constant 256 : index
    %c0_246 = arith.constant 0 : index
    %357 = vector.load %arg4[%c256_245, %c0_246] : memref<576x32xbf16, #tpu.memory_space<vmem>>, vector<64x32xbf16>
    %cst_247 = arith.constant dense<0.000000e+00> : vector<80x32xf32>
    %358 = tpu.matmul %356, %357, %cst_247 {dimension_numbers = #tpu.dot_dimension_numbers<[1], [0], [0], [1], [0, 0, 1, 1], [], []>} : vector<80x64xbf16>, vector<64x32xbf16>, vector<80x32xf32> -> vector<80x32xf32>
    %359 = arith.addf %354, %358 : vector<80x32xf32>
    %c289 = arith.constant 289 : index
    %c0_248 = arith.constant 0 : index
    %360 = vector.load %arg9[%c289, %c0_248] : memref<416x64xf32, #tpu.memory_space<vmem>>, vector<80x64xf32>
    %361 = arith.truncf %360 : vector<80x64xf32> to vector<80x64xbf16>
    %c320_249 = arith.constant 320 : index
    %c0_250 = arith.constant 0 : index
    %362 = vector.load %arg4[%c320_249, %c0_250] : memref<576x32xbf16, #tpu.memory_space<vmem>>, vector<64x32xbf16>
    %cst_251 = arith.constant dense<0.000000e+00> : vector<80x32xf32>
    %363 = tpu.matmul %361, %362, %cst_251 {dimension_numbers = #tpu.dot_dimension_numbers<[1], [0], [0], [1], [0, 0, 1, 1], [], []>} : vector<80x64xbf16>, vector<64x32xbf16>, vector<80x32xf32> -> vector<80x32xf32>
    %364 = arith.addf %359, %363 : vector<80x32xf32>
    %c327 = arith.constant 327 : index
    %c0_252 = arith.constant 0 : index
    %365 = vector.load %arg9[%c327, %c0_252] : memref<416x64xf32, #tpu.memory_space<vmem>>, vector<80x64xf32>
    %366 = arith.truncf %365 : vector<80x64xf32> to vector<80x64xbf16>
    %c384_253 = arith.constant 384 : index
    %c0_254 = arith.constant 0 : index
    %367 = vector.load %arg4[%c384_253, %c0_254] : memref<576x32xbf16, #tpu.memory_space<vmem>>, vector<64x32xbf16>
    %cst_255 = arith.constant dense<0.000000e+00> : vector<80x32xf32>
    %368 = tpu.matmul %366, %367, %cst_255 {dimension_numbers = #tpu.dot_dimension_numbers<[1], [0], [0], [1], [0, 0, 1, 1], [], []>} : vector<80x64xbf16>, vector<64x32xbf16>, vector<80x32xf32> -> vector<80x32xf32>
    %369 = arith.addf %364, %368 : vector<80x32xf32>
    %c328_256 = arith.constant 328 : index
    %c0_257 = arith.constant 0 : index
    %370 = vector.load %arg9[%c328_256, %c0_257] : memref<416x64xf32, #tpu.memory_space<vmem>>, vector<80x64xf32>
    %371 = arith.truncf %370 : vector<80x64xf32> to vector<80x64xbf16>
    %c448_258 = arith.constant 448 : index
    %c0_259 = arith.constant 0 : index
    %372 = vector.load %arg4[%c448_258, %c0_259] : memref<576x32xbf16, #tpu.memory_space<vmem>>, vector<64x32xbf16>
    %cst_260 = arith.constant dense<0.000000e+00> : vector<80x32xf32>
    %373 = tpu.matmul %371, %372, %cst_260 {dimension_numbers = #tpu.dot_dimension_numbers<[1], [0], [0], [1], [0, 0, 1, 1], [], []>} : vector<80x64xbf16>, vector<64x32xbf16>, vector<80x32xf32> -> vector<80x32xf32>
    %374 = arith.addf %369, %373 : vector<80x32xf32>
    %c329 = arith.constant 329 : index
    %c0_261 = arith.constant 0 : index
    %375 = vector.load %arg9[%c329, %c0_261] : memref<416x64xf32, #tpu.memory_space<vmem>>, vector<80x64xf32>
    %376 = arith.truncf %375 : vector<80x64xf32> to vector<80x64xbf16>
    %c512_262 = arith.constant 512 : index
    %c0_263 = arith.constant 0 : index
    %377 = vector.load %arg4[%c512_262, %c0_263] : memref<576x32xbf16, #tpu.memory_space<vmem>>, vector<64x32xbf16>
    %cst_264 = arith.constant dense<0.000000e+00> : vector<80x32xf32>
    %378 = tpu.matmul %376, %377, %cst_264 {dimension_numbers = #tpu.dot_dimension_numbers<[1], [0], [0], [1], [0, 0, 1, 1], [], []>} : vector<80x64xbf16>, vector<64x32xbf16>, vector<80x32xf32> -> vector<80x32xf32>
    %379 = arith.addf %374, %378 : vector<80x32xf32>
    %380 = vector.extract_strided_slice %379 {offsets = [0, 0], sizes = [40, 32], strides = [1, 1]} : vector<80x32xf32> to vector<40x32xf32>
    %381 = vector.extract_strided_slice %379 {offsets = [40, 0], sizes = [40, 32], strides = [1, 1]} : vector<80x32xf32> to vector<40x32xf32>
    %382 = arith.maximumf %380, %381 : vector<40x32xf32>
    %c0_265 = arith.constant 0 : index
    %c0_266 = arith.constant 0 : index
    %383 = vector.load %arg10[%c0_265, %c0_266] : memref<40x32xf32, #tpu.memory_space<vmem>>, vector<40x32xf32>
    tpu.vector_store %arg10[%c0_265, %c0_266], %382 {strides = array<i32>} : memref<40x32xf32, #tpu.memory_space<vmem>>, vector<40x32xf32>,
    %c0_267 = arith.constant 0 : index
    %c0_268 = arith.constant 0 : index
    %384 = tpu.strided_load %arg10[%c0_267, %c0_268] {strides = array<i32: 2, 1>} : memref<40x32xf32, #tpu.memory_space<vmem>>, vector<19x32xf32>
    %c1_269 = arith.constant 1 : index
    %c0_270 = arith.constant 0 : index
    %385 = tpu.strided_load %arg10[%c1_269, %c0_270] {strides = array<i32: 2, 1>} : memref<40x32xf32, #tpu.memory_space<vmem>>, vector<19x32xf32>
    %386 = arith.maximumf %384, %385 : vector<19x32xf32>
    %387 = arith.addf %386, %153 : vector<19x32xf32>
    %cst_271 = arith.constant 0.000000e+00 : f32
    %388 = vector.broadcast %cst_271 : f32 to vector<19x32xf32>
    %389 = arith.maximumf %387, %388 : vector<19x32xf32>
    %c72 = arith.constant 72 : index
    %c0_272 = arith.constant 0 : index
    %390 = vector.load %arg6[%c72, %c0_272] : memref<192x32xf32, #tpu.memory_space<vmem>>, vector<19x32xf32>
    %391 = arith.mulf %389, %390 : vector<19x32xf32>
    %392 = arith.addf %332, %391 : vector<19x32xf32>
    %c168_273 = arith.constant 168 : index
    %c0_274 = arith.constant 0 : index
    %393 = vector.load %arg6[%c168_273, %c0_274] : memref<192x32xf32, #tpu.memory_space<vmem>>, vector<19x32xf32>
    %394 = arith.mulf %389, %393 : vector<19x32xf32>
    %395 = arith.addf %335, %394 : vector<19x32xf32>
    %cst_275 = arith.constant dense<0.000000e+00> : vector<19xf32>
    %396 = vector.multi_reduction <add>, %392, %cst_275 [1] : vector<19x32xf32> to vector<19xf32>
    %397 = vector.shape_cast %396 : vector<19xf32> to vector<19x1xf32>
    %cst_276 = arith.constant dense<0.000000e+00> : vector<1xf32>
    %398 = vector.multi_reduction <add>, %397, %cst_276 [0] : vector<19x1xf32> to vector<1xf32>
    %399 = vector.shape_cast %398 : vector<1xf32> to vector<1x1xf32>
    %cst_277 = arith.constant dense<0.000000e+00> : vector<19xf32>
    %400 = vector.multi_reduction <add>, %395, %cst_277 [1] : vector<19x32xf32> to vector<19xf32>
    %401 = vector.shape_cast %400 : vector<19xf32> to vector<19x1xf32>
    %cst_278 = arith.constant dense<0.000000e+00> : vector<1xf32>
    %402 = vector.multi_reduction <add>, %401, %cst_278 [0] : vector<19x1xf32> to vector<1xf32>
    %403 = vector.shape_cast %402 : vector<1xf32> to vector<1x1xf32>
    %404 = tpu.concatenate %399, %403 in 1 : vector<1x1xf32>, vector<1x1xf32> -> vector<1x2xf32>
    %c0_279 = arith.constant 0 : index
    %c0_280 = arith.constant 0 : index
    %405 = vector.load %arg7[%c0_279, %c0_280] : memref<1x2xf32, #tpu.memory_space<vmem>>, vector<1x2xf32>
    %406 = arith.addf %404, %405 : vector<1x2xf32>
    %407 = math.absf %406 : vector<1x2xf32>
    %cst_281 = arith.constant 0.000000e+00 : f32
    %408 = vector.broadcast %cst_281 : f32 to vector<1x2xf32>
    %409 = arith.subf %408, %407 : vector<1x2xf32>
    %410 = math.exp %409 : vector<1x2xf32>
    %cst_282 = arith.constant 0.000000e+00 : f32
    %411 = vector.broadcast %cst_282 : f32 to vector<1x2xf32>
    %412 = arith.cmpf oge, %406, %411 : vector<1x2xf32>
    %cst_283 = arith.constant 1.000000e+00 : f32
    %413 = vector.broadcast %cst_283 : f32 to vector<1x2xf32>
    %414 = arith.addf %413, %410 : vector<1x2xf32>
    %cst_284 = arith.constant 1.000000e+00 : f32
    %415 = vector.broadcast %cst_284 : f32 to vector<1x2xf32>
    %416 = arith.divf %415, %414 : vector<1x2xf32>
    %cst_285 = arith.constant 1.000000e+00 : f32
    %417 = vector.broadcast %cst_285 : f32 to vector<1x2xf32>
    %418 = arith.addf %417, %410 : vector<1x2xf32>
    %419 = arith.divf %410, %418 : vector<1x2xf32>
    %420 = arith.select %412, %416, %419 : vector<1x2xi1>, vector<1x2xf32>
    %cst_286 = arith.constant 0.000000e+00 : f32
    %421 = vector.broadcast %cst_286 : f32 to vector<1x126xf32>
    %422 = tpu.concatenate %420, %421 in 1 : vector<1x2xf32>, vector<1x126xf32> -> vector<1x128xf32>
    %423 = vector.shape_cast %422 : vector<1x128xf32> to vector<1x1x128xf32>
    %c0_287 = arith.constant 0 : index
    %c0_288 = arith.constant 0 : index
    %c0_289 = arith.constant 0 : index
    %424 = vector.load %arg8[%c0_287, %c0_288, %c0_289] : memref<1x1x128xf32, #tpu.memory_space<vmem>>, vector<1x1x128xf32>
    tpu.vector_store %arg8[%c0_287, %c0_288, %c0_289], %423 {strides = array<i32>} : memref<1x1x128xf32, #tpu.memory_space<vmem>>, vector<1x1x128xf32>,
    return
  }
  func.func @transform_0(%arg0: i32) -> (i32, i32, i32) {
    %c0_i32 = arith.constant 0 : i32
    %c0_i32_0 = arith.constant 0 : i32
    %c0_i32_1 = arith.constant 0 : i32
    return %arg0, %c0_i32, %c0_i32_0 : i32, i32, i32
  }
  func.func @transform_1(%arg0: i32) -> (i32, i32) {
    %c0_i32 = arith.constant 0 : i32
    %c0_i32_0 = arith.constant 0 : i32
    %c0_i32_1 = arith.constant 0 : i32
    return %c0_i32, %c0_i32_0 : i32, i32
  }
  func.func @transform_2(%arg0: i32) -> (i32, i32) {
    %c0_i32 = arith.constant 0 : i32
    %c0_i32_0 = arith.constant 0 : i32
    %c0_i32_1 = arith.constant 0 : i32
    return %c0_i32, %c0_i32_0 : i32, i32
  }
  func.func @transform_3(%arg0: i32) -> (i32, i32) {
    %c0_i32 = arith.constant 0 : i32
    %c0_i32_0 = arith.constant 0 : i32
    %c0_i32_1 = arith.constant 0 : i32
    return %c0_i32, %c0_i32_0 : i32, i32
  }
  func.func @transform_4(%arg0: i32) -> (i32, i32) {
    %c0_i32 = arith.constant 0 : i32
    %c0_i32_0 = arith.constant 0 : i32
    %c0_i32_1 = arith.constant 0 : i32
    return %c0_i32, %c0_i32_0 : i32, i32
  }
  func.func @transform_5(%arg0: i32) -> (i32, i32) {
    %c0_i32 = arith.constant 0 : i32
    %c0_i32_0 = arith.constant 0 : i32
    %c0_i32_1 = arith.constant 0 : i32
    return %c0_i32, %c0_i32_0 : i32, i32
  }
  func.func @transform_6(%arg0: i32) -> (i32, i32) {
    %c0_i32 = arith.constant 0 : i32
    %c0_i32_0 = arith.constant 0 : i32
    %c0_i32_1 = arith.constant 0 : i32
    return %c0_i32, %c0_i32_0 : i32, i32
  }
  func.func @transform_7(%arg0: i32) -> (i32, i32, i32) {
    %c0_i32 = arith.constant 0 : i32
    %c0_i32_0 = arith.constant 0 : i32
    %c0_i32_1 = arith.constant 0 : i32
    return %arg0, %c0_i32, %c0_i32_0 : i32, i32, i32
  }
}

</mosaic_0001>

<bundles_post_ra>
// kernel: cnn_forward.1
= control target key start
LH: loop header
LB: loop body
LE: loop exit
PB: predicated region body
PF: predicated region fallthrough
CT: control target
= control target key end

     0   :  { %12 = vsyncpa [#allocation5], 0  ;;  %s14063_s0 = inlined_call_operand.vmem [shape: bf16[2,1280,72], index: 0, kind: input, shape index: {}]   ;;  %s14064_s1 = inlined_call_operand.vmem [shape: bf16[72,64], index: 1, kind: input, shape index: {}]   ;;  %s14065_s2 = inlined_call_operand.vmem [shape: f32[1,64], index: 2, kind: input, shape index: {}]   ;;  %s14066_s3 = inlined_call_operand.vmem [shape: bf16[576,32], index: 3, kind: input, shape index: {}]   ;;  %s14067_s4 = inlined_call_operand.vmem [shape: f32[1,32], index: 4, kind: input, shape index: {}]   ;;  %s14068_s5 = inlined_call_operand.vmem [shape: f32[192,32], index: 5, kind: input, shape index: {}]   ;;  %s14069_s6 = inlined_call_operand.vmem [shape: f32[1,2], index: 6, kind: input, shape index: {}]   ;;  %s14070_s7 = inlined_call_operand.hbm [shape: f32[2,1,128], index: 7, kind: output, shape index: {}]  }
   0x1   :  { %14 = vsyncpa [#allocation5 + $0x1], 0  ;;  %s11343_s24 = smov 0   ;;  %s11345_s25 = smov 0  }
   0x2   :  { %s11347_s26 = smov 0   ;;  %s11349_s27 = smov 0  }
   0x3 LB: > { %s11364_s28 = sadd.s32 4294967295, %s11298_s27   ;;  %s8013_s29 = sadd.s32 4294967294, %s11298_s27   ;;  %s11298_s27 = sphi %s11349_s27, %s14300_s27   ;;  %s11294_s26 = sphi %s11347_s26, %s14299_s26   ;;  %s11290_s25 = sphi %s11345_s25, %s14298_s25   ;;  %s11286_s24 = sphi %s11343_s24, %s14297_s24  }
   0x4   : > { %s11368_s30 = sadd.s32 1, %s11298_s27   ;;  %s179_s8 = sadd.s32 1, %s11294_s26 }
   0x5   : > { %s176_s9 = ssub.s32 %s11298_s27, %s11368_s30  ;;  %p189_p0 = scmp.ne.s32.totalorder %s11294_s26, %s11290_s25 }
   0x6   : > { %p177_p1 = scmp.eq.s32.totalorder %s176_s9, 0  ;;  %p190_p2 = scmp.eq.s32.totalorder %s11364_s28, 1 }
   0x7   : > { %p195_p3 = scmp.ne.s32.totalorder %s11290_s25, %s11286_s24  ;;  %p196_p4 = scmp.eq.s32.totalorder %s8013_s29, 1 }
   0x8   : > { %s11379_s10 = scalar_select %p177_p1, %s11294_s26, %s179_s8  }
   0x9   : > { %p11381_p5 = por %p190_p2, %p189_p0  ;;  %p11385_p6 = por %p196_p4, %p195_p3 }
   0xa   : > { %p8016_p7 = scmp.ge.s32.totalorder %s11298_s27, 1  ;;  %p240_p8 = scmp.lt.s32.totalorder %s11298_s27, 3 }
   0xc   : > { %p241_p9 = pnand %p8016_p7, %p240_p8 }
   0xe   : > { %244 = sbr.rel (%p241_p9) target bundleno = 1482 (0x5ca), region = 48 }
  0x15   : > { %v10929_v0 = vld [vmem:[%s14064_s1] sm:$0xff]   ;;  %p271_p10 = scmp.lt.s32.totalorder %s11364_s28, 1  ;;  %v10931_v2 = vld [vmem:[%s14064_s1 + $0x8] sm:$0xff]   ;;  %v10933_v4 = vld [vmem:[%s14064_s1 + $0x10] sm:$0xff]   ;;  %vm403_vm0 = vcmask 588800   ;;  %vm434_vm1 = vcmask 1043456  }
  0x16   : > { %v10930_v1 = vld [vmem:[%s14064_s1] sm:$0xff]   ;;  %8991 = vmatprep.subr.bf16.mxu0 %v10929_v0  ;;  %v10932_v3 = vld [vmem:[%s14064_s1 + $0x8] sm:$0xff]   ;;  %v10934_v5 = vld [vmem:[%s14064_s1 + $0x10] sm:$0xff]   ;;  %vm277_vm2 = vcmask 523264   ;;  %vm582_vm3 = vcmask 517120   ;;  %vm11301_vm4 = vmmov 0  }
  0x17   : > { %9021 = vmatprep.subr.bf16.mxu1 %v10930_v1  ;;  %8992 = vmatpush3.bf16.msra.mxu0 %v10929_v0  ;;  %s272_s21 = scalar_select %p271_p10, %s11364_s28, 1  ;;  %v10935_v6 = vld [vmem:[%s14064_s1 + $0x18] sm:$0xff]   ;;  %v10937_v10 = vld [vmem:[%s14064_s1 + $0x20] ss:$0 sps:$4 sm:$0xff]   ;;  %v10948_v19 = vld [vmem:[%s14064_s1 + $0x8] sm:$0xff]   ;;  %vm580_vm5 = vcmask 521216  }
  0x18   : > { %9022 = vmatpush3.bf16.msra.mxu1 %v10930_v1  ;;  %8993 = vmatprep.subr.bf16.mxu0 %v10931_v2  ;;  %v10936_v7 = vld [vmem:[%s14064_s1 + $0x18] sm:$0xff]   ;;  %v10938_v11 = vld [vmem:[%s14064_s1 + $0x20] ss:$0 sps:$4 sm:$0xff]   ;;  %v436_v12 = vsel %vm434_vm1, %v10937_v10, 0  ;;  %v10953_v21 = vld [vmem:[%s14064_s1 + $0x10] sm:$0xff]   ;;  %vm3862_vm6 = vcmask 261120  }
  0x19   : > { %9023 = vmatprep.subr.bf16.mxu1 %v10932_v3  ;;  %s10887_s9 = smul.u32 640, %s272_s21  ;;  %v10943_v13 = vld [vmem:[%s14064_s1] sm:$0xff]   ;;  %v721_v14 = vsel %vm434_vm1, %v10938_v11, 0  ;;  %v10959_v26 = vld [vmem:[%s14064_s1 + $0x18] sm:$0xff]   ;;  %v10960_v27 = vld [vmem:[%s14064_s1 + $0x8] sm:$0xff]   ;;  %vm7896_vm7 = vcmask 256000  }
  0x1a   : > { %v10954_v22 = vld [vmem:[%s14064_s1] sm:$0xff]   ;;  %v10961_v28 = vld [vmem:[%s14064_s1 + $0x10] sm:$0xff]   ;;  %v10967_v34 = vld [vmem:[%s14064_s1 + $0x18] sm:$0xff]   ;;  %vm7901_vm8 = vcmask 1042432   ;;  %vm7928_vm9 = vcmask 7168   ;;  %s269_s13 = sand.u32 1, %s11290_s25  }
  0x1b   : > { %8994 = vmatpush3.bf16.msra.mxu0 %v10931_v2  ;;  %s11414_s15 = scalar_lea.vmem %s14063_s0, %s10887_s9  ;;  %v10966_v33 = vld [vmem:[%s14064_s1 + $0x20] ss:$0 sps:$4 sm:$0xff]   ;;  %v10990_v51 = vld [vmem:[%s14064_s1 + $0x8] sm:$0xff]   ;;  %v10991_v53 = vld [vmem:[%s14064_s1 + $0x10] sm:$0xff]   ;;  %s8544_s14 = sshll.u32 %s11364_s28, 4  ;;  %vm7942_vm10 = vcmask 15360  }
  0x1c   : > { %9024 = vmatpush3.bf16.msra.mxu1 %v10932_v3  ;;  %8995 = vmatprep.subr.bf16.mxu0 %v10933_v4  ;;  %v10939_v8 = vld [vmem:[%s11414_s15] sm:$0xff]   ;;  %v10940_v9 = vld [vmem:[%s11414_s15 + $0x50] sm:$0xff]   ;;  %v10941_v15 = vld [vmem:[%s11414_s15 + $0x8] sm:$0xff]   ;;  %v1004_v35 = vsel %vm434_vm1, %v10966_v33, 0  ;;  %s270_s16 = scalar_lea.vmem [#allocation4], %s269_s13  ;;  %s14021_s20 = scalar_lea.hbm %s14070_s7, %s8544_s14 }
  0x1d   : > { %9025 = vmatprep.subr.bf16.mxu1 %v10934_v5  ;;  %9001 = vmatprep.mubr.msk.bf16.mxu0 %vm403_vm0, %v10939_v8  ;;  %v10942_v16 = vld [vmem:[%s11414_s15 + $0x58] sm:$0xff]   ;;  %v10944_v17 = vld [vmem:[%s11414_s15 + $0x10] sm:$0xff]   ;;  %v10945_v18 = vld [vmem:[%s11414_s15 + $0x60] sm:$0xff]   ;;  %s7958_s17 = sshll.u32 %s270_s16, 4  ;;  %s7946_s21 = scalar_lea.sflag [#allocation5], %s269_s13  ;;  %s14023_s17 = int_to_ptr.vmem [resolvable:$true] %s7958_s17 }
  0x1e   : > { %9031 = vmatprep.mubr.msk.bf16.mxu1 %vm403_vm0, %v10940_v9  ;;  %v10946_v20 = vld [vmem:[%s11414_s15 + $0x18] sm:$0xff]   ;;  %v10947_v23 = vld [vmem:[%s11414_s15 + $0x68] sm:$0xff]   ;;  %v10949_v24 = vld [vmem:[%s11414_s15 + $0x20] sm:$0xff]   ;;  %s11236_s28 = scalar_lea.vmem %s14023_s17, 16  ;;  %s11302_s22 = smov [#allocation4]  }
  0x1f   : > { %8996 = vmatpush3.bf16.msra.mxu0 %v10933_v4  ;;  %v10950_v25 = vld [vmem:[%s11414_s15 + $0x70] sm:$0xff]   ;;  %v10951_v29 = vld [vmem:[%s11414_s15 + $0x28] sm:$0xff]   ;;  %v10952_v30 = vld [vmem:[%s11414_s15 + $0x78] sm:$0xff]   ;;  %p11237_p11 = scmp.ne.s32.totalorder %s14023_s17, %s11236_s28  ;;  %s11240_s23 = sshll.u32 %s11302_s22, 4  ;;  %s11241_s23 = int_to_ptr.vmem [resolvable:$false] %s11240_s23 }
  0x20   : > { %9026 = vmatpush3.bf16.msra.mxu1 %v10934_v5  ;;  %8997 = vmatprep.subr.bf16.mxu0 %v10935_v6  ;;  %v10955_v31 = vld [vmem:[%s11414_s15 + $0x30] sm:$0xff]   ;;  %v10956_v32 = vld [vmem:[%s11414_s15 + $0x80] sm:$0xff]   ;;  %v10957_v37 = vld [vmem:[%s11414_s15 + $0x38] sm:$0xff]   ;;  %p11243_p0 = scmp.lt.s32.totalorder %s14023_s17, %s11241_s23 }
  0x21   : > { %9027 = vmatprep.subr.bf16.mxu1 %v10936_v7  ;;  %v10968_v36 = vld [vmem:[%s14064_s1 + $0x20] ss:$0 sps:$4 sm:$0xff]   ;;  %v10958_v38 = vld [vmem:[%s11414_s15 + $0x88] sm:$0xff]   ;;  %v10963_v41 = vld [vmem:[%s11414_s15 + $0x90] sm:$0xff]   ;;  %p11238_p12 = pnand %p11237_p11, %p11381_p5 }
  0x22   : > { %v10962_v39 = vld [vmem:[%s11414_s15 + $0x40] sm:$0xff]   ;;  %v1287_v40 = vsel %vm434_vm1, %v10968_v36, 0  ;;  %v10964_v42 = vld [vmem:[%s11414_s15 + $0x48] sm:$0xff]   ;;  %v10965_v43 = vld [vmem:[%s11414_s15 + $0x98] sm:$0xff]  }
  0x23   : > { %8998 = vmatpush3.bf16.msra.mxu0 %v10935_v6  ;;  %v10969_v44 = vld [vmem:[%s11414_s15 + $0xa0] sm:$0xff]   ;;  %v10971_v45 = vld [vmem:[%s11414_s15 + $0xf0] sm:$0xff]   ;;  %v10970_v46 = vld [vmem:[%s11414_s15 + $0xa8] sm:$0xff]   ;;  %p11239_p13 = pneg %p11238_p12 }
  0x24   : > { %9028 = vmatpush3.bf16.msra.mxu1 %v10936_v7  ;;  %10879 = vmatprep.subr.msk.bf16.mxu0 %vm434_vm1, %v10937_v10  ;;  %v10972_v47 = vld [vmem:[%s11414_s15 + $0xf8] sm:$0xff]   ;;  %v10973_v48 = vld [vmem:[%s11414_s15 + $0xb0] sm:$0xff]   ;;  %v10989_v49 = vld [vmem:[%s14064_s1] sm:$0xff]  }
  0x25   : > { %10880 = vmatprep.subr.msk.bf16.mxu1 %vm434_vm1, %v10938_v11  ;;  %v10975_v50 = vld [vmem:[%s11414_s15 + $0x100] sm:$0xff]   ;;  %v10974_v52 = vld [vmem:[%s11414_s15 + $0xb8] sm:$0xff]   ;;  %v10976_v54 = vld [vmem:[%s11414_s15 + $0x108] sm:$0xff]  }
  0x26   : > { %v10977_v55 = vld [vmem:[%s11414_s15 + $0xc0] sm:$0xff]   ;;  %v10979_v56 = vld [vmem:[%s11414_s15 + $0x110] sm:$0xff]   ;;  %v10992_v57 = vld [vmem:[%s14064_s1 + $0x18] sm:$0xff]  }
  0x27   : > { %9000 = vmatpush3.bf16.msra.mxu0 %v436_v12  ;;  %v10978_v58 = vld [vmem:[%s11414_s15 + $0xc8] sm:$0xff]   ;;  %v10980_v59 = vld [vmem:[%s11414_s15 + $0x118] sm:$0xff]   ;;  %v10981_v60 = vld [vmem:[%s11414_s15 + $0xd0] sm:$0xff]  }
  0x28   : > { %9030 = vmatpush3.bf16.msra.mxu1 %v721_v14  ;;  %9051 = vmatprep.subr.bf16.mxu0 %v10943_v13  ;;  %v10993_v61 = vld [vmem:[%s14064_s1 + $0x20] ss:$0 sps:$4 sm:$0xff]   ;;  %v11005_v63 = vld [vmem:[%s14064_s1 + $0x8] sm:$0xff]   ;;  %v11006_v3 = vld [vmem:[%s14064_s1 + $0x10] sm:$0xff]  }
  0x29   : > { %9081 = vmatprep.subr.bf16.mxu1 %v10954_v22  ;;  %v11004_v62 = vld [vmem:[%s14064_s1] sm:$0xff]   ;;  %v1570_v1 = vsel %vm434_vm1, %v10993_v61, 0  ;;  %v10982_v4 = vld [vmem:[%s11414_s15 + $0xd8] sm:$0xff]   ;;  %v10984_v5 = vld [vmem:[%s11414_s15 + $0x128] sm:$0xff]  }
  0x2a   : > { %9002 = vmatmul.mubr.msk.bf16.vlgmr.msra.gmra.mrb[0].mxu0 %vm403_vm0, %v10941_v15  ;;  %v10983_v0 = vld [vmem:[%s11414_s15 + $0x120] sm:$0xff]   ;;  %v11008_v6 = vld [vmem:[%s14064_s1 + $0x18] sm:$0xff]   ;;  %v10987_v8 = vld [vmem:[%s11414_s15 + $0x130] sm:$0xff]  }
  0x2b   : > { %9032 = vmatmul.mubr.msk.bf16.vlgmr.msra.gmra.mrb[0].mxu1 %vm403_vm0, %v10942_v16  ;;  %9052 = vmatpush3.bf16.msra.mxu0 %v10943_v13  ;;  %v11007_v2 = vld [vmem:[%s14064_s1] sm:$0xff]   ;;  %v10986_v10 = vld [vmem:[%s11414_s15 + $0xe8] sm:$0xff]   ;;  %v10988_v11 = vld [vmem:[%s11414_s15 + $0x138] sm:$0xff]  }
  0x2c   : > { %9005 = vmatprep.mubr.msk.bf16.mxu0 %vm403_vm0, %v10944_v17  ;;  %9035 = vmatprep.mubr.msk.bf16.mxu1 %vm403_vm0, %v10945_v18  ;;  %v10985_v7 = vld [vmem:[%s11414_s15 + $0xe0] sm:$0xff]   ;;  %v11012_v14 = vld [vmem:[%s11414_s15 + $0x190] sm:$0xff]   ;;  %v10995_v16 = vld [vmem:[%s11414_s15 + $0x148] sm:$0xff]  }
  0x2d   : > { %9053 = vmatprep.subr.bf16.mxu0 %v10948_v19  ;;  %9082 = vmatpush3.bf16.msra.mxu1 %v10954_v22  ;;  %v11010_v9 = vld [vmem:[%s14064_s1 + $0x20] ss:$0 sps:$4 sm:$0xff]   ;;  %v10996_v17 = vld [vmem:[%s11414_s15 + $0x150] sm:$0xff]   ;;  %v11009_v18 = vld [vmem:[%s14064_s1 + $0x8] sm:$0xff]  }
  0x2e   : > { %9083 = vmatprep.subr.bf16.mxu1 %v10960_v27  ;;  %v1853_v12 = vsel %vm434_vm1, %v11010_v9, 0  ;;  %v10994_v13 = vld [vmem:[%s11414_s15 + $0x140] sm:$0xff]   ;;  %v10997_v22 = vld [vmem:[%s11414_s15 + $0x158] sm:$0xff]  }
  0x2f   : > { %9054 = vmatpush3.bf16.msra.mxu0 %v10948_v19  ;;  %v11024_v15 = vld [vmem:[%s14064_s1] sm:$0xff]   ;;  %v11013_v19 = vld [vmem:[%s11414_s15 + $0x198] sm:$0xff]  }
  0x30   : > { %9055 = vmatprep.subr.bf16.mxu0 %v10953_v21 }
  0x31   : > { %9084 = vmatpush3.bf16.msra.mxu1 %v10960_v27  ;;  %v11017_v27 = vld [vmem:[%s11414_s15 + $0x1a8] sm:$0xff]  }
  0x32   : > { %9006 = vmatmul.mubr.msk.bf16.gmra.mrb[4].mxu0 %vm403_vm0, %v10946_v20  ;;  %9085 = vmatprep.subr.bf16.mxu1 %v10961_v28  ;;  %v11016_v20 = vld [vmem:[%s11414_s15 + $0x1a0] sm:$0xff]  }
  0x33   : > { %9036 = vmatmul.mubr.msk.bf16.gmra.mrb[4].mxu1 %vm403_vm0, %v10947_v23  ;;  %9009 = vmatprep.mubr.msk.bf16.mxu0 %vm403_vm0, %v10949_v24  ;;  %v11011_v23 = vld [vmem:[%s14064_s1 + $0x10] sm:$0xff]   ;;  %v10998_v24 = vld [vmem:[%s11414_s15 + $0x160] sm:$0xff]  }
  0x34   : > { %9039 = vmatprep.mubr.msk.bf16.mxu1 %vm403_vm0, %v10950_v25  ;;  %9056 = vmatpush3.bf16.msra.mxu0 %v10953_v21  ;;  %v11028_v21 = vld [vmem:[%s14064_s1 + $0x8] sm:$0xff]   ;;  %v11030_v25 = vld [vmem:[%s14064_s1 + $0x10] sm:$0xff]  }
  0x35   : > { %9057 = vmatprep.subr.bf16.mxu0 %v10959_v26  ;;  %9086 = vmatpush3.bf16.msra.mxu1 %v10961_v28  ;;  %v11015_v28 = vld [vmem:[%s14064_s1 + $0x20] ss:$0 sps:$4 sm:$0xff]  }
  0x36   : > { %9087 = vmatprep.subr.bf16.mxu1 %v10967_v34 }
  0x38   : > { %9058 = vmatpush3.bf16.msra.mxu0 %v10959_v26  ;;  %v11014_v26 = vld [vmem:[%s14064_s1 + $0x18] sm:$0xff]  }
  0x39   : > { %10881 = vmatprep.subr.msk.bf16.mxu0 %vm434_vm1, %v10966_v33  ;;  %9088 = vmatpush3.bf16.msra.mxu1 %v10967_v34  ;;  %v11000_v33 = vld [vmem:[%s11414_s15 + $0x170] sm:$0xff]   ;;  %v11021_v34 = vld [vmem:[%s11414_s15 + $0x1b8] sm:$0xff]  }
  0x3a   : > { %9010 = vmatmul.mubr.msk.bf16.gmra.mrb[8].mxu0 %vm403_vm0, %v10951_v29  ;;  %10882 = vmatprep.subr.msk.bf16.mxu1 %vm434_vm1, %v10968_v36  ;;  %v11020_v29 = vld [vmem:[%s11414_s15 + $0x1b0] sm:$0xff]   ;;  %v11025_v36 = vld [vmem:[%s11414_s15 + $0x1c0] sm:$0xff]  }
  0x3b   : > { %9040 = vmatmul.mubr.msk.bf16.gmra.mrb[8].mxu1 %vm403_vm0, %v10952_v30  ;;  %9013 = vmatprep.mubr.msk.bf16.mxu0 %vm403_vm0, %v10955_v31  ;;  %v11034_v30 = vld [vmem:[%s14064_s1 + $0x18] sm:$0xff]   ;;  %v11036_v31 = vld [vmem:[%s14064_s1 + $0x20] ss:$0 sps:$4 sm:$0xff]  }
  0x3c   : > { %9043 = vmatprep.mubr.msk.bf16.mxu1 %vm403_vm0, %v10956_v32  ;;  %9060 = vmatpush3.bf16.msra.mxu0 %v1004_v35  ;;  %v10999_v32 = vld [vmem:[%s11414_s15 + $0x168] sm:$0xff]   ;;  %v2136_v35 = vsel %vm434_vm1, %v11015_v28, 0 }
  0x3d   : > { %9090 = vmatpush3.bf16.msra.mxu1 %v1287_v40  ;;  %9111 = vmatprep.subr.bf16.mxu0 %v10989_v49  ;;  %v11002_v40 = vld [vmem:[%s11414_s15 + $0x180] sm:$0xff]  }
  0x3e   : > { %9141 = vmatprep.subr.bf16.mxu1 %v11004_v62 }
  0x42   : > { %9014 = vmatmul.mubr.msk.bf16.gmra.mrb[12].mxu0 %vm403_vm0, %v10957_v37  ;;  %v2419_v37 = vsel %vm434_vm1, %v11036_v31, 0 }
  0x43   : > { %9044 = vmatmul.mubr.msk.bf16.gmra.mrb[12].mxu1 %vm403_vm0, %v10958_v38  ;;  %9017 = vmatprep.mubr.msk.bf16.mxu0 %vm403_vm0, %v10962_v39  ;;  %v14071_v38 = vmov 0.0   ;;  %v11001_v39 = vld [vmem:[%s11414_s15 + $0x178] sm:$0xff]  }
  0x44   : > { %9047 = vmatprep.mubr.msk.bf16.mxu1 %vm403_vm0, %v10963_v41  ;;  %v11026_v41 = vld [vmem:[%s11414_s15 + $0x1c8] sm:$0xff]   ;;  %278 = vst.msk [vmem:[#allocation2] sm:$0xff] %vm277_vm2, %v14071_v38  ;;  %279 = vst.msk [vmem:[#allocation2 + $0x8] sm:$0xff] %vm277_vm2, %v14071_v38 }
  0x45   : > { %280 = vst.msk [vmem:[#allocation2 + $0x10] sm:$0xff] %vm277_vm2, %v14071_v38  ;;  %281 = vst.msk [vmem:[#allocation2 + $0x18] sm:$0xff] %vm277_vm2, %v14071_v38 }
  0x46   : > { %282 = vst.msk [vmem:[#allocation2 + $0x20] sm:$0xff] %vm277_vm2, %v14071_v38  ;;  %283 = vst.msk [vmem:[#allocation2 + $0x28] sm:$0xff] %vm277_vm2, %v14071_v38 }
  0x47   : > { %284 = vst.msk [vmem:[#allocation2 + $0x170] sm:$0xff] %vm277_vm2, %v14071_v38  ;;  %285 = vst.msk [vmem:[#allocation2 + $0x178] sm:$0xff] %vm277_vm2, %v14071_v38 }
  0x48   : > { %286 = vst.msk [vmem:[#allocation2 + $0x180] sm:$0xff] %vm277_vm2, %v14071_v38  ;;  %287 = vst.msk [vmem:[#allocation2 + $0x188] sm:$0xff] %vm277_vm2, %v14071_v38 }
  0x49   : > { %288 = vst.msk [vmem:[#allocation2 + $0x190] sm:$0xff] %vm277_vm2, %v14071_v38  ;;  %289 = vst.msk [vmem:[#allocation2 + $0x198] sm:$0xff] %vm277_vm2, %v14071_v38 }
  0x4a   : > { %9018 = vmatmul.mubr.msk.bf16.gmra.mrb[16].mxu0 %vm403_vm0, %v10964_v42  ;;  %v11031_v42 = vld [vmem:[%s11414_s15 + $0x1d0] sm:$0xff]   ;;  %583 = vst.msk [vmem:[#allocation2 + $0x56] sm:$0x3] %vm582_vm3, %v14071_v38  ;;  %866 = vst.msk [vmem:[#allocation2 + $0x7e] sm:$0x3] %vm582_vm3, %v14071_v38 }
  0x4b   : > { %9048 = vmatmul.mubr.msk.bf16.gmra.mrb[16].mxu1 %vm403_vm0, %v10965_v43  ;;  %9061 = vmatprep.mubr.msk.bf16.mxu0 %vm403_vm0, %v10969_v44  ;;  %v11003_v43 = vld [vmem:[%s11414_s15 + $0x188] sm:$0xff]   ;;  %v11018_v44 = vld [vmem:[%s11414_s15 + $0x1e0] sm:$0xff]   ;;  %1149 = vst.msk [vmem:[#allocation2 + $0xa6] sm:$0x3] %vm582_vm3, %v14071_v38  ;;  %1432 = vst.msk [vmem:[#allocation2 + $0xce] sm:$0x3] %vm582_vm3, %v14071_v38 }
  0x4c   : > { %9091 = vmatprep.mubr.msk.bf16.mxu1 %vm403_vm0, %v10971_v45  ;;  %v11032_v45 = vld [vmem:[%s11414_s15 + $0x1d8] sm:$0xff]   ;;  %1715 = vst.msk [vmem:[#allocation2 + $0xf6] sm:$0x3] %vm582_vm3, %v14071_v38  ;;  %1998 = vst.msk [vmem:[#allocation2 + $0x11e] sm:$0x3] %vm582_vm3, %v14071_v38 }
  0x4d   : > { %2281 = vst.msk [vmem:[#allocation2 + $0x146] sm:$0x3] %vm582_vm3, %v14071_v38  ;;  %2564 = vst.msk [vmem:[#allocation2 + $0x16e] sm:$0x3] %vm582_vm3, %v14071_v38 }
  0x52   : > { %9062 = vmatmul.mubr.msk.bf16.vlgmr.msra.gmra.mrb[20].mxu0 %vm403_vm0, %v10970_v46  ;;  %v11037_v46 = vld [vmem:[%s11414_s15 + $0x230] sm:$0xff]  }
  0x53   : > { %9092 = vmatmul.mubr.msk.bf16.vlgmr.msra.gmra.mrb[20].mxu1 %vm403_vm0, %v10972_v47  ;;  %9065 = vmatprep.mubr.msk.bf16.mxu0 %vm403_vm0, %v10973_v48  ;;  %v11019_v47 = vld [vmem:[%s11414_s15 + $0x1e8] sm:$0xff]   ;;  %v11022_v48 = vld [vmem:[%s11414_s15 + $0x1f0] sm:$0xff]  }
  0x54   : > { %9095 = vmatprep.mubr.msk.bf16.mxu1 %vm403_vm0, %v10975_v50  ;;  %9112 = vmatpush3.bf16.msra.mxu0 %v10989_v49  ;;  %v11045_v49 = vld [vmem:[%s14066_s3 + $0x20] sm:$0xff]   ;;  %v11038_v50 = vld [vmem:[%s11414_s15 + $0x238] sm:$0xff]  }
  0x55   : > { %9113 = vmatprep.subr.bf16.mxu0 %v10990_v51  ;;  %9142 = vmatpush3.bf16.msra.mxu1 %v11004_v62  ;;  %v11029_v62 = vld [vmem:[%s11414_s15 + $0x208] sm:$0xff]  }
  0x56   : > { %9143 = vmatprep.subr.bf16.mxu1 %v11005_v63 }
  0x58   : > { %9114 = vmatpush3.bf16.msra.mxu0 %v10990_v51  ;;  %v11041_v51 = vld [vmem:[%s11414_s15 + $0x240] sm:$0xff]  }
  0x59   : > { %9115 = vmatprep.subr.bf16.mxu0 %v10991_v53  ;;  %9144 = vmatpush3.bf16.msra.mxu1 %v11005_v63  ;;  %v11033_v63 = vld [vmem:[%s11414_s15 + $0x210] sm:$0xff]  }
  0x5a   : > { %9066 = vmatmul.mubr.msk.bf16.gmra.mrb[24].mxu0 %vm403_vm0, %v10974_v52  ;;  %9145 = vmatprep.subr.bf16.mxu1 %v11006_v3  ;;  %v11046_v52 = vld [vmem:[%s14066_s3 + $0x28] sm:$0xff]  }
  0x5b   : > { %9096 = vmatmul.mubr.msk.bf16.gmra.mrb[24].mxu1 %vm403_vm0, %v10976_v54  ;;  %9069 = vmatprep.mubr.msk.bf16.mxu0 %vm403_vm0, %v10977_v55  ;;  %v11023_v54 = vld [vmem:[%s11414_s15 + $0x1f8] sm:$0xff]   ;;  %v11027_v55 = vld [vmem:[%s11414_s15 + $0x200] sm:$0xff]  }
  0x5c   : > { %9099 = vmatprep.mubr.msk.bf16.mxu1 %vm403_vm0, %v10979_v56  ;;  %9116 = vmatpush3.bf16.msra.mxu0 %v10991_v53  ;;  %v11053_v53 = vld [vmem:[%s14066_s3 + $0x20] sm:$0xff]   ;;  %v11049_v56 = vld [vmem:[%s14066_s3 + $0x30] sm:$0xff]  }
  0x5d   : > { %9117 = vmatprep.subr.bf16.mxu0 %v10992_v57  ;;  %9146 = vmatpush3.bf16.msra.mxu1 %v11006_v3  ;;  %v11035_v3 = vld [vmem:[%s11414_s15 + $0x218] sm:$0xff]  }
  0x5e   : > { %9147 = vmatprep.subr.bf16.mxu1 %v11008_v6 }
  0x60   : > { %9118 = vmatpush3.bf16.msra.mxu0 %v10992_v57  ;;  %v11054_v57 = vld [vmem:[%s14066_s3 + $0x28] sm:$0xff]  }
  0x61   : > { %10883 = vmatprep.subr.msk.bf16.mxu0 %vm434_vm1, %v10993_v61  ;;  %9148 = vmatpush3.bf16.msra.mxu1 %v11008_v6  ;;  %v11055_v61 = vld [vmem:[%s14066_s3 + $0x30] sm:$0xff]  }
  0x62   : > { %9070 = vmatmul.mubr.msk.bf16.gmra.mrb[28].mxu0 %vm403_vm0, %v10978_v58  ;;  %10884 = vmatprep.subr.msk.bf16.mxu1 %vm434_vm1, %v11010_v9  ;;  %v11042_v58 = vld [vmem:[%s11414_s15 + $0x248] sm:$0xff]   ;;  %v11051_v6 = vld [vmem:[%s11414_s15 + $0x270] sm:$0xff]  }
  0x63   : > { %9100 = vmatmul.mubr.msk.bf16.gmra.mrb[28].mxu1 %vm403_vm0, %v10980_v59  ;;  %9073 = vmatprep.mubr.msk.bf16.mxu0 %vm403_vm0, %v10981_v60  ;;  %v11043_v59 = vld [vmem:[%s11414_s15 + $0x250] sm:$0xff]   ;;  %v11050_v60 = vld [vmem:[%s14066_s3 + $0x38] sm:$0xff]   ;;  %v2595_v9 = vld [vmem:[#allocation2 + $0x8] sm:$0xff] }
  0x64   : > { %9103 = vmatprep.mubr.msk.bf16.mxu1 %vm403_vm0, %v10983_v0  ;;  %9120 = vmatpush3.bf16.msra.mxu0 %v1570_v1  ;;  %v11056_v0 = vld [vmem:[%s14066_s3 + $0x38] sm:$0xff]  }
  0x65   : > { %9171 = vmatprep.subr.bf16.mxu0 %v11007_v2  ;;  %9150 = vmatpush3.bf16.msra.mxu1 %v1853_v12  ;;  %v11044_v1 = vld [vmem:[%s11414_s15 + $0x258] sm:$0xff]  }
  0x66   : > { %9201 = vmatprep.subr.bf16.mxu1 %v11024_v15 }
  0x6a   : > { %9074 = vmatmul.mubr.msk.bf16.gmra.mrb[32].mxu0 %vm403_vm0, %v10982_v4  ;;  %v11039_v4 = vld [vmem:[%s11414_s15 + $0x220] sm:$0xff]  }
  0x6b   : > { %9104 = vmatmul.mubr.msk.bf16.gmra.mrb[32].mxu1 %vm403_vm0, %v10984_v5  ;;  %9077 = vmatprep.mubr.msk.bf16.mxu0 %vm403_vm0, %v10985_v7  ;;  %v11048_v5 = vld [vmem:[%s11414_s15 + $0x268] sm:$0xff]  }
  0x6c   : > { %9107 = vmatprep.mubr.msk.bf16.mxu1 %vm403_vm0, %v10987_v8  ;;  %v11040_v7 = vld [vmem:[%s11414_s15 + $0x228] sm:$0xff]   ;;  %v11052_v8 = vld [vmem:[%s11414_s15 + $0x278] sm:$0xff]  }
  0x72   : > { %9078 = vmatmul.mubr.msk.bf16.gmra.mrb[36].mxu0 %vm403_vm0, %v10986_v10  ;;  %v2596_v10 = vld [vmem:[#allocation2 + $0x10] sm:$0xff] }
  0x73   : > { %9108 = vmatmul.mubr.msk.bf16.gmra.mrb[36].mxu1 %vm403_vm0, %v10988_v11  ;;  %9121 = vmatprep.mubr.msk.bf16.mxu0 %vm403_vm0, %v10994_v13  ;;  %v11057_v11 = vld [vmem:[%s14066_s3] sm:$0xff]   ;;  %v2605_v12 = vpack.c.bf16 %v2596_v10, %v2595_v9  ;;  %v2597_v13 = vld [vmem:[#allocation2 + $0x18] sm:$0xff] }
  0x74   : > { %9151 = vmatprep.mubr.msk.bf16.mxu1 %vm403_vm0, %v11012_v14  ;;  %v2598_v14 = vld [vmem:[#allocation2 + $0x20] sm:$0xff] }
  0x7a   : > { %9122 = vmatmul.mubr.msk.bf16.vlgmr.msra.gmra.mrb[40].mxu0 %vm403_vm0, %v10995_v16  ;;  %v11059_v16 = vld [vmem:[%s14066_s3 + $0x10] sm:$0xff]  }
  0x7b   : > { %9125 = vmatprep.mubr.msk.bf16.mxu0 %vm403_vm0, %v10996_v17  ;;  %9172 = vmatpush3.bf16.msra.mxu0 %v11007_v2  ;;  %v11047_v2 = vld [vmem:[%s11414_s15 + $0x260] sm:$0xff]   ;;  %v2606_v17 = vpack.c.bf16 %v2598_v14, %v2597_v13  ;;  %s11242_s15 = scalar_lea.vmem %s11241_s23, 32 }
  0x7c   : > { %9173 = vmatprep.subr.bf16.mxu0 %v11009_v18  ;;  %9152 = vmatmul.mubr.msk.bf16.vlgmr.msra.gmra.mrb[40].mxu1 %vm403_vm0, %v11013_v19  ;;  %p11244_p1 = scmp.lt.s32.totalorder %s11242_s15, %s11236_s28 }
  0x7d   : > { %9155 = vmatprep.mubr.msk.bf16.mxu1 %vm403_vm0, %v11016_v20  ;;  %9202 = vmatpush3.bf16.msra.mxu1 %v11024_v15  ;;  %v11058_v15 = vld [vmem:[%s14066_s3 + $0x8] sm:$0xff]  }
  0x7e   : > { %9203 = vmatprep.subr.bf16.mxu1 %v11028_v21  ;;  %p11245_p2 = por %p11244_p1, %p11243_p0 }
  0x7f   : > { %9174 = vmatpush3.bf16.msra.mxu0 %v11009_v18  ;;  %v11060_v18 = vld [vmem:[%s14066_s3 + $0x18] sm:$0xff]  }
  0x80   : > { %9175 = vmatprep.subr.bf16.mxu0 %v11011_v23  ;;  %p11246_p3 = pnand %p11245_p2, %p11239_p13 }
  0x81   : > { %9204 = vmatpush3.bf16.msra.mxu1 %v11028_v21 }
  0x82   : > { %9126 = vmatmul.mubr.msk.bf16.gmra.mrb[44].mxu0 %vm403_vm0, %v10997_v22  ;;  %9205 = vmatprep.subr.bf16.mxu1 %v11030_v25 }
  0x83   : > { %9129 = vmatprep.mubr.msk.bf16.mxu0 %vm403_vm0, %v10998_v24  ;;  %9176 = vmatpush3.bf16.msra.mxu0 %v11011_v23 }
  0x84   : > { %9177 = vmatprep.subr.bf16.mxu0 %v11014_v26  ;;  %9156 = vmatmul.mubr.msk.bf16.gmra.mrb[44].mxu1 %vm403_vm0, %v11017_v27 }
  0x85   : > { %9159 = vmatprep.mubr.msk.bf16.mxu1 %vm403_vm0, %v11020_v29  ;;  %9206 = vmatpush3.bf16.msra.mxu1 %v11030_v25 }
  0x86   : > { %9207 = vmatprep.subr.bf16.mxu1 %v11034_v30 }
  0x87   : > { %9178 = vmatpush3.bf16.msra.mxu0 %v11014_v26 }
  0x88   : > { %10885 = vmatprep.subr.msk.bf16.mxu0 %vm434_vm1, %v11015_v28 }
  0x89   : > { %9208 = vmatpush3.bf16.msra.mxu1 %v11034_v30 }
  0x8a   : > { %9130 = vmatmul.mubr.msk.bf16.gmra.mrb[48].mxu0 %vm403_vm0, %v10999_v32  ;;  %10886 = vmatprep.subr.msk.bf16.mxu1 %vm434_vm1, %v11036_v31 }
  0x8b   : > { %9133 = vmatprep.mubr.msk.bf16.mxu0 %vm403_vm0, %v11000_v33  ;;  %9180 = vmatpush3.bf16.msra.mxu0 %v2136_v35 }
  0x8c   : > { %9160 = vmatmul.mubr.msk.bf16.gmra.mrb[48].mxu1 %vm403_vm0, %v11021_v34  ;;  %9231 = vmatprep.subr.bf16.mxu0 %v14071_v38 }
  0x8d   : > { %9163 = vmatprep.mubr.msk.bf16.mxu1 %vm403_vm0, %v11025_v36  ;;  %9210 = vmatpush3.bf16.msra.mxu1 %v2419_v37 }
  0x8e   : > { %9483 = vmatprep.subr.bf16.mxu1 %v14071_v38 }
  0x92   : > { %9134 = vmatmul.mubr.msk.bf16.gmra.mrb[52].mxu0 %vm403_vm0, %v11001_v39 }
  0x93   : > { %9137 = vmatprep.mubr.msk.bf16.mxu0 %vm403_vm0, %v11002_v40 }
  0x94   : > { %9164 = vmatmul.mubr.msk.bf16.gmra.mrb[52].mxu1 %vm403_vm0, %v11026_v41 }
  0x95   : > { %9167 = vmatprep.mubr.msk.bf16.mxu1 %vm403_vm0, %v11031_v42 }
  0x9a   : > { %9138 = vmatmul.mubr.msk.bf16.gmra.mrb[56].mxu0 %vm403_vm0, %v11003_v43 }
  0x9b   : > { %9181 = vmatprep.mubr.msk.bf16.mxu0 %vm403_vm0, %v11018_v44 }
  0x9c   : > { %9168 = vmatmul.mubr.msk.bf16.gmra.mrb[56].mxu1 %vm403_vm0, %v11032_v45 }
  0x9d   : > { %9211 = vmatprep.mubr.msk.bf16.mxu1 %vm403_vm0, %v11037_v46 }
  0xa2   : > { %9182 = vmatmul.mubr.msk.bf16.vlgmr.msra.gmra.mrb[60].mxu0 %vm403_vm0, %v11019_v47 }
  0xa3   : > { %9185 = vmatprep.mubr.msk.bf16.mxu0 %vm403_vm0, %v11022_v48  ;;  %9232 = vmatpush3.bf16.msra.mxu0 %v11045_v49 }
  0xa4   : > { %9212 = vmatmul.mubr.msk.bf16.vlgmr.msra.gmra.mrb[60].mxu1 %vm403_vm0, %v11038_v50  ;;  %9233 = vmatprep.subr.bf16.mxu0 %v14071_v38 }
  0xa5   : > { %9215 = vmatprep.mubr.msk.bf16.mxu1 %vm403_vm0, %v11041_v51  ;;  %9484 = vmatpush3.bf16.msra.mxu1 %v11053_v53 }
  0xa6   : > { %9485 = vmatprep.subr.bf16.mxu1 %v14071_v38 }
  0xa7   : > { %9234 = vmatpush3.bf16.msra.mxu0 %v11046_v52 }
  0xa8   : > { %9235 = vmatprep.subr.bf16.mxu0 %v14071_v38 }
  0xa9   : > { %9486 = vmatpush3.bf16.msra.mxu1 %v11054_v57 }
  0xaa   : > { %9186 = vmatmul.mubr.msk.bf16.gmra.mrb[64].mxu0 %vm403_vm0, %v11023_v54  ;;  %9487 = vmatprep.subr.bf16.mxu1 %v14071_v38 }
  0xab   : > { %9189 = vmatprep.mubr.msk.bf16.mxu0 %vm403_vm0, %v11027_v55  ;;  %9236 = vmatpush3.bf16.msra.mxu0 %v11049_v56 }
  0xac   : > { %9216 = vmatmul.mubr.msk.bf16.gmra.mrb[64].mxu1 %vm403_vm0, %v11042_v58  ;;  %9237 = vmatprep.subr.bf16.mxu0 %v14071_v38 }
  0xad   : > { %9219 = vmatprep.mubr.msk.bf16.mxu1 %vm403_vm0, %v11043_v59  ;;  %9488 = vmatpush3.bf16.msra.mxu1 %v11055_v61 }
  0xae   : > { %9489 = vmatprep.subr.bf16.mxu1 %v14071_v38 }
  0xaf   : > { %9238 = vmatpush3.bf16.msra.mxu0 %v11050_v60 }
  0xb0   : > { %9259 = vmatprep.subr.bf16.mxu0 %v14071_v38 }
  0xb1   : > { %9490 = vmatpush3.bf16.msra.mxu1 %v11056_v0 }
  0xb2   : > { %9190 = vmatmul.mubr.msk.bf16.gmra.mrb[68].mxu0 %vm403_vm0, %v11029_v62  ;;  %9511 = vmatprep.subr.bf16.mxu1 %v14071_v38  ;;  %v11816_v62 = vld [vmem:[%s14065_s2] ss:$0 sm:$0xff] }
  0xb3   : > { %9193 = vmatprep.mubr.msk.bf16.mxu0 %vm403_vm0, %v11033_v63 }
  0xb4   : > { %9220 = vmatmul.mubr.msk.bf16.gmra.mrb[68].mxu1 %vm403_vm0, %v11044_v1 }
  0xb5   : > { %9223 = vmatprep.mubr.msk.bf16.mxu1 %vm403_vm0, %v11047_v2 }
  0xba   : > { %9194 = vmatmul.mubr.msk.bf16.gmra.mrb[72].mxu0 %vm403_vm0, %v11035_v3 }
  0xbb   : > { %9197 = vmatprep.mubr.msk.bf16.mxu0 %vm403_vm0, %v11039_v4 }
  0xbc   : > { %9224 = vmatmul.mubr.msk.bf16.gmra.mrb[72].mxu1 %vm403_vm0, %v11048_v5 }
  0xbd   : > { %9227 = vmatprep.mubr.msk.bf16.mxu1 %vm403_vm0, %v11051_v6 }
  0xc2   : > { %9198 = vmatmul.mubr.msk.bf16.gmra.mrb[76].mxu0 %vm403_vm0, %v11040_v7 }
  0xc3   : > { %9239 = vmatprep.mubr.msk.bf16.mxu0 %vm11301_vm4, %v14071_v38 }
  0xc4   : > { %9228 = vmatmul.mubr.msk.bf16.gmra.mrb[76].mxu1 %vm403_vm0, %v11052_v8 }
  0xc5   : > { %9491 = vmatprep.mubr.msk.bf16.mxu1 %vm11301_vm4, %v14071_v38 }
  0xca   : > { %9240 = vmatmul.mubr.msk.bf16.vlgmr.msra.gmra.mrb[80].mxu0 %vm277_vm2, %v2605_v12 }
  0xcb   : > { %9243 = vmatprep.mubr.msk.bf16.mxu0 %vm11301_vm4, %v14071_v38  ;;  %9260 = vmatpush3.bf16.msra.mxu0 %v11057_v11 }
  0xcc   : > { %9261 = vmatprep.subr.bf16.mxu0 %v14071_v38 }
  0xcf   : > { %9262 = vmatpush3.bf16.msra.mxu0 %v11058_v15 }
  0xd0   : > { %9263 = vmatprep.subr.bf16.mxu0 %v14071_v38 }
  0xd2   : > { %9244 = vmatmul.mubr.msk.bf16.gmra.mrb[84].mxu0 %vm277_vm2, %v2606_v17 }
  0xd3   : > { %9247 = vmatprep.mubr.msk.bf16.mxu0 %vm11301_vm4, %v14071_v38  ;;  %9264 = vmatpush3.bf16.msra.mxu0 %v11059_v16 }
  0xd4   : > { %9265 = vmatprep.subr.bf16.mxu0 %v14071_v38 }
  0xd7   : > { %9266 = vmatpush3.bf16.msra.mxu0 %v11060_v18 }
  0xd8   : > { %9287 = vmatprep.subr.bf16.mxu0 %v14071_v38 }
  0xfd   : > { %v11786_v19 = vpop.f32.mrb[0].mxu0 }
  0xfe   : > { %v472_v20 = vpop.f32.mrb[1].mxu0  ;;  %v11788_v21 = vpop.f32.mrb[0].mxu1 }
  0xff   : > { %v9004_v22 = vpop.f32.mrb[2].mxu0  ;;  %v757_v23 = vpop.f32.mrb[1].mxu1 }
 0x100   : > { %v11790_v24 = vpop.f32.mrb[3].mxu0  ;;  %v9034_v25 = vpop.f32.mrb[2].mxu1 }
 0x101   : > { %v11792_v26 = vpop.f32.mrb[3].mxu1 }
 0x105   : > { %v9007_v27 = vpop.f32.mrb[4].mxu0 }
 0x106   : > { %v552_v28 = vmax.f32 %v11790_v24, %v9007_v27  ;;  %v11795_v29 = vpop.f32.mrb[5].mxu0  ;;  %v11797_v30 = vpop.f32.mrb[4].mxu1 }
 0x107   : > { %v11799_v31 = vpop.f32.mrb[6].mxu0  ;;  %v837_v32 = vmax.f32 %v11792_v26, %v11797_v30  ;;  %v11803_v33 = vpop.f32.mrb[5].mxu1 }
 0x108   : > { %v553_v34 = vmax.f32 %v11786_v19, %v11799_v31  ;;  %v491_v35 = vpop.f32.mrb[7].mxu0  ;;  %v11807_v36 = vpop.f32.mrb[6].mxu1 }
 0x109   : > { %v551_v37 = vmax.f32 %v472_v20, %v491_v35  ;;  %v838_v39 = vmax.f32 %v11788_v21, %v11807_v36  ;;  %v776_v40 = vpop.f32.mrb[7].mxu1 }
 0x10a   : > { %v836_v41 = vmax.f32 %v757_v23, %v776_v40 }
 0x10d   : > { %v9011_v42 = vpop.f32.mrb[8].mxu0 }
 0x10e   : > { %v504_v43 = vpop.f32.mrb[9].mxu0  ;;  %v9041_v44 = vpop.f32.mrb[8].mxu1 }
 0x10f   : > { %v554_v45 = vmax.f32 %v9004_v22, %v504_v43  ;;  %v9012_v46 = vpop.f32.mrb[10].mxu0  ;;  %v789_v47 = vpop.f32.mrb[9].mxu1 }
 0x110   : > { %v507_v48 = vpop.f32.mrb[11].mxu0  ;;  %v839_v49 = vmax.f32 %v9034_v25, %v789_v47  ;;  %v9042_v50 = vpop.f32.mrb[10].mxu1 }
 0x111   : > { %v555_v51 = vmax.f32 %v11795_v29, %v507_v48  ;;  %v792_v52 = vpop.f32.mrb[11].mxu1 }
 0x112   : > { %v840_v53 = vmax.f32 %v11803_v33, %v792_v52 }
 0x115   : > { %v9015_v54 = vpop.f32.mrb[12].mxu0 }
 0x116   : > { %v9045_v55 = vpop.f32.mrb[12].mxu1  ;;  %v520_v56 = vpop.f32.mrb[13].mxu0 }
 0x117   : > { %v805_v57 = vpop.f32.mrb[13].mxu1  ;;  %v9016_v58 = vpop.f32.mrb[14].mxu0 }
 0x118   : > { %v556_v59 = vmax.f32 %v9011_v42, %v9016_v58  ;;  %v9046_v60 = vpop.f32.mrb[14].mxu1  ;;  %v523_v61 = vpop.f32.mrb[15].mxu0 }
 0x119   : > { %v841_v63 = vmax.f32 %v9041_v44, %v9046_v60  ;;  %v808_v0 = vpop.f32.mrb[15].mxu1 }
 0x11a   : > { %v561_v1 = vmax.f32 %v551_v37, %v556_v59 }
 0x11b   : > { %v846_v2 = vmax.f32 %v836_v41, %v841_v63 }
 0x11c   : > { %v566_v3 = vadd.f32 %v11816_v62, %v561_v1 }
 0x11d   : > { %v851_v4 = vadd.f32 %v11816_v62, %v846_v2  ;;  %v9019_v5 = vpop.f32.mrb[16].mxu0 }
 0x11e   : > { %v571_v6 = vmax.f32 %v566_v3, 0.0  ;;  %v559_v7 = vmax.f32 %v523_v61, %v9019_v5  ;;  %v9049_v8 = vpop.f32.mrb[16].mxu1  ;;  %v536_v9 = vpop.f32.mrb[17].mxu0 }
 0x11f   : > { %v856_v10 = vmax.f32 %v851_v4, 0.0  ;;  %v844_v11 = vmax.f32 %v808_v0, %v9049_v8  ;;  %v557_v12 = vmax.f32 %v9012_v46, %v536_v9  ;;  %v821_v13 = vpop.f32.mrb[17].mxu1  ;;  %v9020_v14 = vpop.f32.mrb[18].mxu0 }
 0x120   : > { %576 = vst.msk [vmem:[#allocation2 + $0x30] sm:$0xff] %vm277_vm2, %v571_v6  ;;  %v564_v15 = vmax.f32 %v554_v45, %v559_v7  ;;  %v842_v16 = vmax.f32 %v9042_v50, %v821_v13  ;;  %v560_v17 = vmax.f32 %v9015_v54, %v9020_v14  ;;  %v9050_v18 = vpop.f32.mrb[18].mxu1  ;;  %v539_v20 = vpop.f32.mrb[19].mxu0 }
 0x121   : > { %861 = vst.msk [vmem:[#allocation2 + $0x58] sm:$0xff] %vm277_vm2, %v856_v10  ;;  %v849_v22 = vmax.f32 %v839_v49, %v844_v11  ;;  %v562_v23 = vmax.f32 %v552_v28, %v557_v12  ;;  %v845_v24 = vmax.f32 %v9045_v55, %v9050_v18  ;;  %v558_v25 = vmax.f32 %v520_v56, %v539_v20  ;;  %v824_v26 = vpop.f32.mrb[19].mxu1  ;;  %v2599_v49 = vld [vmem:[#allocation2 + $0x28] sm:$0xff]  ;;  %v11061_v12 = vld [vmem:[%s14066_s3] sm:$0xff]  }
 0x122   : > { %v569_v27 = vadd.f32 %v11816_v62, %v564_v15  ;;  %v847_v29 = vmax.f32 %v837_v32, %v842_v16  ;;  %v565_v30 = vmax.f32 %v555_v51, %v560_v17  ;;  %v843_v33 = vmax.f32 %v805_v57, %v824_v26  ;;  %v11062_v20 = vld [vmem:[%s14066_s3 + $0x8] sm:$0xff]  }
 0x123   : > { %v854_v35 = vadd.f32 %v11816_v62, %v849_v22  ;;  %v567_v37 = vadd.f32 %v11816_v62, %v562_v23  ;;  %v850_v40 = vmax.f32 %v840_v53, %v845_v24  ;;  %v563_v41 = vmax.f32 %v553_v34, %v558_v25 }
 0x124   : > { %v574_v42 = vmax.f32 %v569_v27, 0.0  ;;  %v852_v28 = vadd.f32 %v11816_v62, %v847_v29  ;;  %v570_v43 = vadd.f32 %v11816_v62, %v565_v30  ;;  %v848_v32 = vmax.f32 %v838_v39, %v843_v33 }
 0x125   : > { %v859_v44 = vmax.f32 %v854_v35, 0.0  ;;  %v572_v45 = vmax.f32 %v567_v37, 0.0  ;;  %v855_v46 = vadd.f32 %v11816_v62, %v850_v40  ;;  %v568_v47 = vadd.f32 %v11816_v62, %v563_v41  ;;  %v11835_v48 = vpop.f32.mrb[20].mxu0 }
 0x126   : > { %579 = vst.msk [vmem:[#allocation2 + $0x48] sm:$0xff] %vm277_vm2, %v574_v42  ;;  %v857_v19 = vmax.f32 %v852_v28, 0.0  ;;  %v575_v31 = vmax.f32 %v570_v43, 0.0  ;;  %v853_v34 = vadd.f32 %v11816_v62, %v848_v32  ;;  %v11839_v50 = vpop.f32.mrb[21].mxu0  ;;  %v11841_v51 = vpop.f32.mrb[20].mxu1 }
 0x127   : > { %864 = vst.msk [vmem:[#allocation2 + $0x70] sm:$0xff] %vm277_vm2, %v859_v44  ;;  %577 = vst.msk [vmem:[#allocation2 + $0x38] sm:$0xff] %vm277_vm2, %v572_v45  ;;  %v860_v21 = vmax.f32 %v855_v46, 0.0  ;;  %v573_v36 = vmax.f32 %v568_v47, 0.0  ;;  %v11845_v39 = vpop.f32.mrb[22].mxu0  ;;  %v11847_v52 = vld [vmem:[#allocation2 + $0x30] sm:$0xff] }
 0x128   : > { %14143 = vst [vmem:[#allocation7_spill] sm:$0xff] %v11847_v52  ;;  %v11849_v53 = vpop.f32.mrb[21].mxu1  ;;  %862 = vst.msk [vmem:[#allocation2 + $0x60] sm:$0xff] %vm277_vm2, %v857_v19  ;;  %v858_v54 = vmax.f32 %v853_v34, 0.0  ;;  %v11853_v55 = vpop.f32.mrb[23].mxu0  ;;  %v2607_v56 = vpack.c.bf16 %v11847_v52, %v2599_v49  ;;  %v3929_v2 = vld [vmem:[#allocation2 + $0x58] sm:$0xff] }
 0x129   : > { %581 = vst.msk [vmem:[#allocation2 + $0x50] sm:$0x3f] %vm580_vm5, %v575_v31  ;;  %v11856_v57 = vpop.f32.mrb[22].mxu1  ;;  %865 = vst.msk [vmem:[#allocation2 + $0x78] sm:$0x3f] %vm580_vm5, %v860_v21  ;;  %v11941_v32 = vld [vmem:[#allocation2 + $0x58] sm:$0xff] }
 0x12a   : > { %578 = vst.msk [vmem:[#allocation2 + $0x40] sm:$0xff] %vm277_vm2, %v573_v36  ;;  %v11860_v58 = vpop.f32.mrb[23].mxu1  ;;  %863 = vst.msk [vmem:[#allocation2 + $0x68] sm:$0xff] %vm277_vm2, %v858_v54  ;;  %9248 = vmatmul.mubr.msk.bf16.gmra.mrb[88].mxu0 %vm277_vm2, %v2607_v56 }
 0x12b   : > { %9251 = vmatprep.mubr.msk.bf16.mxu0 %vm11301_vm4, %v14071_v38  ;;  %14147 = vst [vmem:[#allocation11_spill] sm:$0xff] %v11941_v32 }
 0x12d   : > { %v11866_v59 = vpop.f32.mrb[24].mxu0  ;;  %v11904_v17 = vld [vmem:[#allocation2 + $0x48] sm:$0xff] }
 0x12e   : > { %v1120_v60 = vmax.f32 %v11853_v55, %v11866_v59  ;;  %v11870_v61 = vpop.f32.mrb[25].mxu0  ;;  %v11872_v63 = vld [vmem:[#allocation2 + $0x38] sm:$0xff]  ;;  %v11874_v0 = vpop.f32.mrb[24].mxu1  ;;  %14146 = vst [vmem:[#allocation10_spill] sm:$0xff] %v11904_v17  ;;  %v3932_v49 = vld [vmem:[#allocation2 + $0x70] sm:$0xff] }
 0x12f   : > { %14144 = vst [vmem:[#allocation8_spill] sm:$0xff] %v11872_v63  ;;  %v11876_v1 = vpop.f32.mrb[26].mxu0  ;;  %v3930_v3 = vld [vmem:[#allocation2 + $0x60] sm:$0xff]  ;;  %v11880_v5 = vpop.f32.mrb[25].mxu1  ;;  %v11914_v22 = vld [vmem:[#allocation2 + $0x31] sm:$0xff] }
 0x130   : > { %v11886_v8 = vpop.f32.mrb[27].mxu0  ;;  %v3939_v9 = vpack.c.bf16 %v3930_v3, %v3929_v2  ;;  %v11890_v11 = vpop.f32.mrb[26].mxu1  ;;  %v11922_v25 = vld [vmem:[#allocation2 + $0x49] sm:$0xff]  ;;  %v11924_v26 = vld [vmem:[#allocation2 + $0x51] sm:$0xff]  ;;  %v11926_v27 = vld [vmem:[#allocation2 + $0x59] sm:$0xff] }
 0x131   : > { %v11888_v10 = vld [vmem:[#allocation2 + $0x40] sm:$0xff]  ;;  %v1119_v13 = vmax.f32 %v11839_v50, %v11886_v8  ;;  %v11901_v16 = vpop.f32.mrb[27].mxu1  ;;  %v3931_v30 = vld [vmem:[#allocation2 + $0x68] sm:$0xff]  ;;  %v2604_v28 = vld [vmem:[#allocation2 + $0x50] sm:$0xff] }
 0x132   : > { %14145 = vst [vmem:[#allocation9_spill] sm:$0xff] %v11888_v10  ;;  %v2608_v14 = vpack.c.bf16 %v11888_v10, %v11872_v63  ;;  %9492 = vmatmul.mubr.msk.bf16.vlgmr.msra.gmra.mrb[80].mxu1 %vm277_vm2, %v3939_v9  ;;  %v1402_v18 = vmax.f32 %v11849_v53, %v11901_v16  ;;  %v11916_v23 = vld [vmem:[#allocation2 + $0x39] sm:$0xff]  ;;  %v11918_v24 = vld [vmem:[#allocation2 + $0x41] sm:$0xff]  ;;  %v11931_v35 = vld [vmem:[#allocation2 + $0x69] sm:$0xff]  ;;  %v3940_v36 = vpack.c.bf16 %v3932_v49, %v3931_v30 }
 0x133   : > { %9495 = vmatprep.mubr.msk.bf16.mxu1 %vm11301_vm4, %v14071_v38  ;;  %9512 = vmatpush3.bf16.msra.mxu1 %v11061_v12  ;;  %v11929_v33 = vld [vmem:[#allocation2 + $0x61] sm:$0xff]  ;;  %v11063_v2 = vld [vmem:[%s14066_s3 + $0x10] sm:$0xff]  }
 0x134   : > { %9252 = vmatmul.mubr.msk.bf16.gmra.mrb[92].mxu0 %vm277_vm2, %v2608_v14  ;;  %9513 = vmatprep.subr.bf16.mxu1 %v14071_v38  ;;  %v11953_v31 = vld [vmem:[#allocation2 + $0x60] sm:$0xff]  ;;  %v11955_v34 = vld [vmem:[#allocation2 + $0x68] sm:$0xff]  ;;  %v11966_v3 = vld [vmem:[#allocation2 + $0x70] sm:$0xff]  ;;  %v2609_v14 = vpack.c.bf16 %v2604_v28, %v11904_v17 }
 0x135   : > { %9255 = vmatprep.mubr.msk.bf16.mxu0 %vm11301_vm4, %v14071_v38  ;;  %v9071_v29 = vpop.f32.mrb[28].mxu0  ;;  %14148 = vst [vmem:[#allocation12_spill] sm:$0xff] %v11953_v31  ;;  %14149 = vst [vmem:[#allocation13_spill] sm:$0xff] %v11955_v34  ;;  %v2572_v28 = vld [vmem:[#allocation2 + $0x7] sm:$0xff]  ;;  %v2573_v9 = vld [vmem:[#allocation2 + $0xf] sm:$0xff] }
 0x136   : > { %v11939_v42 = vpop.f32.mrb[29].mxu0  ;;  %v9101_v43 = vpop.f32.mrb[28].mxu1  ;;  %14150 = vst [vmem:[#allocation14_spill] sm:$0xff] %v11966_v3  ;;  %v2582_v40 = vpack.c.bf16 %v2573_v9, %v2572_v28  ;;  %v2574_v9 = vld [vmem:[#allocation2 + $0x17] sm:$0xff]  ;;  %v11070_v63 = vld [vmem:[%s14066_s3 + $0x48] sm:$0xff]  }
 0x137   : > { %v1122_v46 = vmax.f32 %v11845_v39, %v11939_v42  ;;  %v11949_v47 = vpop.f32.mrb[30].mxu0  ;;  %v11951_v19 = vpop.f32.mrb[29].mxu1  ;;  %9514 = vmatpush3.bf16.msra.mxu1 %v11062_v20  ;;  %v11066_v20 = vld [vmem:[%s14066_s3 + $0x18] sm:$0xff]  }
 0x138   : > { %v11957_v21 = vpop.f32.mrb[31].mxu0  ;;  %v1405_v54 = vmax.f32 %v11856_v57, %v11951_v19  ;;  %v11961_v56 = vpop.f32.mrb[30].mxu1  ;;  %9515 = vmatprep.subr.bf16.mxu1 %v14071_v38 }
 0x139   : > { %v11973_v30 = vpop.f32.mrb[31].mxu1 }
 0x13a   : > { %9496 = vmatmul.mubr.msk.bf16.gmra.mrb[84].mxu1 %vm277_vm2, %v3940_v36 }
 0x13b   : > { %9499 = vmatprep.mubr.msk.bf16.mxu1 %vm11301_vm4, %v14071_v38  ;;  %9516 = vmatpush3.bf16.msra.mxu1 %v11063_v2  ;;  %v11064_v2 = vld [vmem:[%s14066_s3 + $0x40] sm:$0xff]  }
 0x13c   : > { %9256 = vmatmul.mubr.msk.bf16.gmra.mrb[96].mxu0 %vm277_vm2, %v2609_v14  ;;  %9517 = vmatprep.subr.bf16.mxu1 %v14071_v38 }
 0x13d   : > { %9267 = vmatprep.mubr.msk.bf16.mxu0 %vm11301_vm4, %v14071_v38  ;;  %v9075_v45 = vpop.f32.mrb[32].mxu0 }
 0x13e   : > { %v1088_v36 = vpop.f32.mrb[33].mxu0  ;;  %v9105_v44 = vpop.f32.mrb[32].mxu1 }
 0x13f   : > { %v9076_v41 = vpop.f32.mrb[34].mxu0  ;;  %v11990_v14 = vpop.f32.mrb[33].mxu1  ;;  %9518 = vmatpush3.bf16.msra.mxu1 %v11066_v20 }
 0x140   : > { %v1124_v37 = vmax.f32 %v9071_v29, %v9076_v41  ;;  %v1091_v6 = vpop.f32.mrb[35].mxu0  ;;  %v9106_v15 = vpop.f32.mrb[34].mxu1  ;;  %9539 = vmatprep.subr.bf16.mxu1 %v14071_v38 }
 0x141   : > { %v1407_v49 = vmax.f32 %v9101_v43, %v9106_v15  ;;  %v1374_v7 = vpop.f32.mrb[35].mxu1  ;;  %v2575_v15 = vld [vmem:[#allocation2 + $0x1f] sm:$0xff]  ;;  %v11065_v43 = vld [vmem:[%s14066_s3 + $0x48] sm:$0xff]  }
 0x142   : > { %v1129_v4 = vmax.f32 %v1119_v13, %v1124_v37  ;;  %v2583_v28 = vpack.c.bf16 %v2575_v15, %v2574_v9  ;;  %v14151_v9 = vmax.f32 %v11870_v61, %v11957_v21  ;;  %v14154_v61 = vmax.f32 %v11880_v5, %v11973_v30 }
 0x143   : > { %v1412_v29 = vmax.f32 %v1402_v18, %v1407_v49 }
 0x144   : > { %9268 = vmatmul.mubr.msk.bf16.vlgmr.msra.gmra.mrb[80].mxu0 %vm277_vm2, %v2582_v40  ;;  %v1134_v41 = vadd.f32 %v11816_v62, %v1129_v4 }
 0x145   : > { %9271 = vmatprep.mubr.msk.bf16.mxu0 %vm11301_vm4, %v14071_v38  ;;  %9288 = vmatpush3.bf16.msra.mxu0 %v11064_v2  ;;  %v1417_v50 = vadd.f32 %v11816_v62, %v1412_v29  ;;  %v9079_v8 = vpop.f32.mrb[36].mxu0 }
 0x146   : > { %9289 = vmatprep.subr.bf16.mxu0 %v14071_v38  ;;  %v1139_v13 = vmax.f32 %v1134_v41, 0.0  ;;  %v1127_v53 = vmax.f32 %v1091_v6, %v9079_v8  ;;  %v1104_v16 = vpop.f32.mrb[37].mxu0  ;;  %v9109_v18 = vpop.f32.mrb[36].mxu1  ;;  %v11067_v6 = vld [vmem:[%s14066_s3 + $0x50] sm:$0xff]  }
 0x147   : > { %v1422_v4 = vmax.f32 %v1417_v50, 0.0  ;;  %v1125_v37 = vmax.f32 %v11949_v47, %v1104_v16  ;;  %v1410_v40 = vmax.f32 %v1374_v7, %v9109_v18  ;;  %v9080_v20 = vpop.f32.mrb[38].mxu0  ;;  %v1387_v49 = vpop.f32.mrb[37].mxu1  ;;  %v2576_v16 = vld [vmem:[#allocation2 + $0x27] sm:$0xff]  ;;  %v12063_v18 = vld [vmem:[#allocation2 + $0x2f] sm:$0xff] }
 0x148   : > { %1144 = vst.msk [vmem:[#allocation2 + $0x80] sm:$0xff] %vm277_vm2, %v1139_v13  ;;  %v1132_v2 = vmax.f32 %v1122_v46, %v1127_v53  ;;  %v1128_v29 = vmax.f32 %v9075_v45, %v9080_v20  ;;  %v1408_v12 = vmax.f32 %v11961_v56, %v1387_v49  ;;  %v1107_v41 = vpop.f32.mrb[39].mxu0  ;;  %v9110_v47 = vpop.f32.mrb[38].mxu1  ;;  %v12061_v53 = vld [vmem:[#allocation2 + $0x78] sm:$0xff] }
 0x149   : > { %9290 = vmatpush3.bf16.msra.mxu0 %v11065_v43  ;;  %1427 = vst.msk [vmem:[#allocation2 + $0xa8] sm:$0xff] %vm277_vm2, %v1422_v4  ;;  %v1130_v7 = vmax.f32 %v1120_v60, %v1125_v37  ;;  %v1415_v39 = vmax.f32 %v1405_v54, %v1410_v40  ;;  %v1126_v42 = vmax.f32 %v1088_v36, %v1107_v41  ;;  %v1390_v46 = vpop.f32.mrb[39].mxu1  ;;  %14156 = vst [vmem:[#allocation15_spill] sm:$0xff] %v12061_v53  ;;  %v12074_v49 = vld [vmem:[#allocation2 + $0x71] sm:$0xff] }
 0x14a   : > { %9291 = vmatprep.subr.bf16.mxu0 %v14071_v38  ;;  %v1411_v45 = vmax.f32 %v9105_v44, %v9110_v47  ;;  %v1137_v56 = vadd.f32 %v11816_v62, %v1132_v2  ;;  %v1133_v15 = vmax.f32 %v14151_v9, %v1128_v29  ;;  %v14152_v43 = vmax.f32 %v11860_v58, %v11874_v0 }
 0x14b   : > { %v1409_v59 = vmax.f32 %v11990_v14, %v1390_v46  ;;  %v1135_v57 = vadd.f32 %v11816_v62, %v1130_v7  ;;  %v1420_v60 = vadd.f32 %v11816_v62, %v1415_v39  ;;  %v14153_v44 = vmax.f32 %v11835_v48, %v11876_v1  ;;  %v11068_v48 = vld [vmem:[%s14066_s3 + $0x58] sm:$0xff]  }
 0x14c   : > { %v1413_v55 = vmax.f32 %v14152_v43, %v1408_v12  ;;  %9272 = vmatmul.mubr.msk.bf16.gmra.mrb[84].mxu0 %vm277_vm2, %v2583_v28  ;;  %v1416_v21 = vmax.f32 %v14154_v61, %v1411_v45  ;;  %v1142_v54 = vmax.f32 %v1137_v56, 0.0  ;;  %v1138_v58 = vadd.f32 %v11816_v62, %v1133_v15  ;;  %v12107_v56 = vld [vmem:[#allocation2 + $0x3f] sm:$0xff] }
 0x14d   : > { %v1131_v19 = vmax.f32 %v14153_v44, %v1126_v42  ;;  %9275 = vmatprep.mubr.msk.bf16.mxu0 %vm11301_vm4, %v14071_v38  ;;  %9292 = vmatpush3.bf16.msra.mxu0 %v11067_v6  ;;  %v14155_v1 = vmax.f32 %v11841_v51, %v11890_v11  ;;  %v1140_v36 = vmax.f32 %v1135_v57, 0.0  ;;  %v1425_v5 = vmax.f32 %v1420_v60, 0.0  ;;  %v12057_v14 = vpop.f32.mrb[40].mxu0  ;;  %v12121_v60 = vld [vmem:[#allocation2 + $0x37] sm:$0xff] }
 0x14e   : > { %v1418_v0 = vadd.f32 %v11816_v62, %v1413_v55  ;;  %9293 = vmatprep.subr.bf16.mxu0 %v14071_v38  ;;  %v1421_v50 = vadd.f32 %v11816_v62, %v1416_v21  ;;  %1147 = vst.msk [vmem:[#allocation2 + $0x98] sm:$0xff] %vm277_vm2, %v1142_v54  ;;  %v1143_v8 = vmax.f32 %v1138_v58, 0.0  ;;  %v12065_v51 = vpop.f32.mrb[41].mxu0  ;;  %v2584_v7 = vpack.c.bf16 %v12063_v18, %v2576_v16  ;;  %v12184_v54 = vld [vmem:[#allocation2 + $0x4f] sm:$0xff] }
 0x14f   : > { %v1414_v12 = vmax.f32 %v14155_v1, %v1409_v59  ;;  %v1136_v30 = vadd.f32 %v11816_v62, %v1131_v19  ;;  %1145 = vst.msk [vmem:[#allocation2 + $0x88] sm:$0xff] %vm277_vm2, %v1140_v36  ;;  %1430 = vst.msk [vmem:[#allocation2 + $0xc0] sm:$0xff] %vm277_vm2, %v1425_v5  ;;  %v12070_v37 = vld [vmem:[#allocation2 + $0x80] sm:$0xff]  ;;  %v12072_v40 = vpop.f32.mrb[42].mxu0  ;;  %v12084_v6 = vpop.f32.mrb[40].mxu1 }
 0x150   : > { %v1423_v13 = vmax.f32 %v1418_v0, 0.0  ;;  %14157 = vst [vmem:[#allocation16_spill] sm:$0xff] %v12070_v37  ;;  %v1426_v20 = vmax.f32 %v1421_v50, 0.0  ;;  %v12076_v28 = vld [vmem:[#allocation2 + $0x79] sm:$0xff]  ;;  %1148 = vst.msk [vmem:[#allocation2 + $0xa0] sm:$0x3f] %vm580_vm5, %v1143_v8  ;;  %v3941_v2 = vpack.c.bf16 %v12070_v37, %v12061_v53  ;;  %v2585_v0 = vpack.c.bf16 %v12107_v56, %v12121_v60 }
 0x151   : > { %v1419_v11 = vadd.f32 %v11816_v62, %v1414_v12  ;;  %v1141_v4 = vmax.f32 %v1136_v30, 0.0  ;;  %9294 = vmatpush3.bf16.msra.mxu0 %v11068_v48  ;;  %v12082_v29 = vpop.f32.mrb[43].mxu0  ;;  %v12092_v39 = vpop.f32.mrb[41].mxu1  ;;  %v12182_v50 = vld [vmem:[#allocation2 + $0x47] sm:$0xff] }
 0x152   : > { %1428 = vst.msk [vmem:[#allocation2 + $0xb0] sm:$0xff] %vm277_vm2, %v1423_v13  ;;  %9315 = vmatprep.subr.bf16.mxu0 %v14071_v38  ;;  %9500 = vmatmul.mubr.msk.bf16.gmra.mrb[88].mxu1 %vm277_vm2, %v3941_v2  ;;  %v12096_v42 = vpop.f32.mrb[42].mxu1 }
 0x153   : > { %v1424_v41 = vmax.f32 %v1419_v11, 0.0  ;;  %1146 = vst.msk [vmem:[#allocation2 + $0x90] sm:$0xff] %vm277_vm2, %v1141_v4  ;;  %9503 = vmatprep.mubr.msk.bf16.mxu1 %vm11301_vm4, %v14071_v38  ;;  %v12101_v45 = vpop.f32.mrb[43].mxu1 }
 0x154   : > { %1431 = vst.msk [vmem:[#allocation2 + $0xc8] sm:$0x3f] %vm580_vm5, %v1426_v20  ;;  %9276 = vmatmul.mubr.msk.bf16.gmra.mrb[88].mxu0 %vm277_vm2, %v2584_v7  ;;  %v12160_v20 = vld [vmem:[#allocation2 + $0xa7] sm:$0xff] }
 0x155   : > { %1429 = vst.msk [vmem:[#allocation2 + $0xb8] sm:$0xff] %vm277_vm2, %v1424_v41  ;;  %9279 = vmatprep.mubr.msk.bf16.mxu0 %vm11301_vm4, %v14071_v38  ;;  %v12105_v46 = vpop.f32.mrb[44].mxu0  ;;  %14165 = vst [vmem:[#allocation24_spill] sm:$0xff] %v12160_v20  ;;  %v12200_v32 = vld [vmem:[#allocation2 + $0x98] sm:$0xff] }
 0x156   : > { %v12109_v9 = vld [vmem:[#allocation2 + $0x88] sm:$0xff]  ;;  %v12113_v43 = vpop.f32.mrb[45].mxu0  ;;  %v12178_v2 = vld [vmem:[#allocation2 + $0xc0] sm:$0xff]  ;;  %14172 = vst [vmem:[#allocation31_spill] sm:$0xff] %v12200_v32 }
 0x157   : > { %14158 = vst [vmem:[#allocation17_spill] sm:$0xff] %v12109_v9  ;;  %v12115_v55 = vpop.f32.mrb[46].mxu0  ;;  %v12117_v59 = vpop.f32.mrb[44].mxu1  ;;  %v12127_v21 = vld [vmem:[#allocation2 + $0x81] sm:$0xff]  ;;  %v12142_v5 = vld [vmem:[#allocation2 + $0x99] sm:$0xff]  ;;  %14169 = vst [vmem:[#allocation28_spill] sm:$0xff] %v12178_v2 }
 0x158   : > { %v12125_v61 = vpop.f32.mrb[47].mxu0  ;;  %v12131_v58 = vpop.f32.mrb[45].mxu1  ;;  %14161 = vst [vmem:[#allocation20_spill] sm:$0xff] %v12142_v5  ;;  %v3938_v19 = vld [vmem:[#allocation2 + $0xa0] sm:$0xff] }
 0x159   : > { %v12144_v30 = vpop.f32.mrb[46].mxu1  ;;  %v12150_v13 = vld [vmem:[#allocation2 + $0xaf] sm:$0xff]  ;;  %v3943_v4 = vpack.c.bf16 %v3938_v19, %v12200_v32 }
 0x15a   : > { %v3936_v44 = vld [vmem:[#allocation2 + $0x90] sm:$0xff]  ;;  %v12148_v8 = vpop.f32.mrb[47].mxu1  ;;  %14162 = vst [vmem:[#allocation21_spill] sm:$0xff] %v12150_v13 }
 0x15b   : > { %v3942_v48 = vpack.c.bf16 %v3936_v44, %v12109_v9  ;;  %v12138_v12 = vld [vmem:[#allocation2 + $0x89] sm:$0xff]  ;;  %v12140_v36 = vld [vmem:[#allocation2 + $0x91] sm:$0xff] }
 0x15c   : > { %14159 = vst [vmem:[#allocation18_spill] sm:$0xff] %v12138_v12  ;;  %14160 = vst [vmem:[#allocation19_spill] sm:$0xff] %v12140_v36  ;;  %v12152_v16 = vld [vmem:[#allocation2 + $0xb7] sm:$0xff]  ;;  %v12154_v11 = vld [vmem:[#allocation2 + $0xbf] sm:$0xff]  ;;  %9280 = vmatmul.mubr.msk.bf16.gmra.mrb[92].mxu0 %vm277_vm2, %v2585_v0 }
 0x15d   : > { %14163 = vst [vmem:[#allocation22_spill] sm:$0xff] %v12152_v16  ;;  %14164 = vst [vmem:[#allocation23_spill] sm:$0xff] %v12154_v11  ;;  %9504 = vmatmul.mubr.msk.bf16.gmra.mrb[92].mxu1 %vm277_vm2, %v3942_v48  ;;  %9283 = vmatprep.mubr.msk.bf16.mxu0 %vm11301_vm4, %v14071_v38  ;;  %v12168_v41 = vld [vmem:[#allocation2 + $0xb0] sm:$0xff]  ;;  %v9131_v0 = vpop.f32.mrb[48].mxu0  ;;  %v12174_v48 = vld [vmem:[#allocation2 + $0xa8] sm:$0xff] }
 0x15e   : > { %9507 = vmatprep.mubr.msk.bf16.mxu1 %vm11301_vm4, %v14071_v38  ;;  %14166 = vst [vmem:[#allocation25_spill] sm:$0xff] %v12168_v41  ;;  %14167 = vst [vmem:[#allocation26_spill] sm:$0xff] %v12174_v48  ;;  %v12176_v47 = vld [vmem:[#allocation2 + $0xb8] sm:$0xff]  ;;  %v12186_v15 = vpop.f32.mrb[49].mxu0  ;;  %v12190_v44 = vpack.c.bf16 %v12168_v41, %v12174_v48  ;;  %v4616_v38 = vld [vmem:[#allocation2 + $0xa9] sm:$0xff] }
 0x15f   : > { %14168 = vst [vmem:[#allocation27_spill] sm:$0xff] %v12176_v47  ;;  %v12194_v7 = vpack.c.bf16 %v12178_v2, %v12176_v47  ;;  %v12198_v1 = vpop.f32.mrb[50].mxu0  ;;  %v9161_v57 = vpop.f32.mrb[48].mxu1  ;;  %v4617_v34 = vld [vmem:[#allocation2 + $0xb1] sm:$0xff]  ;;  %v4618_v3 = vld [vmem:[#allocation2 + $0xb9] sm:$0xff]  ;;  %v2842_v19 = vld [vmem:[#allocation2 + $0x9] sm:$0xff] }
 0x160   : > { %14170 = vst [vmem:[#allocation29_spill] sm:$0xff] %v12190_v44  ;;  %v12202_v31 = vpop.f32.mrb[51].mxu0  ;;  %v12204_v37 = vpop.f32.mrb[49].mxu1  ;;  %v4619_v44 = vld [vmem:[#allocation2 + $0xc1] sm:$0xff]  ;;  %v12206_v41 = vpack.c.bf16 %v4617_v34, %v4616_v38  ;;  %v14175_v34 = vmov 0.0   ;;  %v2843_v47 = vld [vmem:[#allocation2 + $0x11] sm:$0xff] }
 0x161   : > { %14171 = vst [vmem:[#allocation30_spill] sm:$0xff] %v12194_v7  ;;  %v2586_v7 = vpack.c.bf16 %v12184_v54, %v12182_v50  ;;  %v12215_v48 = vpop.f32.mrb[50].mxu1  ;;  %v12219_v11 = vpack.c.bf16 %v4619_v44, %v4618_v3  ;;  %v2852_v44 = vpack.c.bf16 %v2843_v47, %v2842_v19  ;;  %v11069_v38 = vld [vmem:[%s14066_s3 + $0x40] sm:$0xff]   ;;  %v14177_v19 = vmax.f32 %v12065_v51, %v12125_v61 }
 0x162   : > { %14173 = vst [vmem:[#allocation32_spill] sm:$0xff] %v12206_v41  ;;  %v12217_v9 = vpop.f32.mrb[51].mxu1  ;;  %v12229_v41 = vld [vmem:[#allocation2 + $0x5f] sm:$0xff]  ;;  %v12264_v61 = vld [vmem:[#allocation2 + $0x67] sm:$0xff] }
 0x163   : > { %14174 = vst [vmem:[#allocation33_spill] sm:$0xff] %v12219_v11  ;;  %14176 = vst [vmem:[#allocation34_spill] sm:$0xff] %v12229_v41  ;;  %v11072_v47 = vld [vmem:[%s14066_s3 + $0x60] sm:$0xff]  }
 0x164   : > { %9284 = vmatmul.mubr.msk.bf16.gmra.mrb[96].mxu0 %vm277_vm2, %v2586_v7 }
 0x165   : > { %9508 = vmatmul.mubr.msk.bf16.gmra.mrb[96].mxu1 %vm277_vm2, %v3943_v4  ;;  %9295 = vmatprep.mubr.msk.bf16.mxu0 %vm11301_vm4, %v14175_v34  ;;  %v9135_v2 = vpop.f32.mrb[52].mxu0  ;;  %v12235_v4 = vld [vmem:[#allocation2 + $0x57] sm:$0xff] }
 0x166   : > { %9519 = vmatprep.mubr.msk.bf16.mxu1 %vm11301_vm4, %v14175_v34  ;;  %v12231_v3 = vpop.f32.mrb[53].mxu0  ;;  %v3916_v13 = vpack.c.bf16 %v12229_v41, %v12235_v4 }
 0x167   : > { %v9136_v7 = vpop.f32.mrb[54].mxu0  ;;  %v12233_v11 = vpop.f32.mrb[52].mxu1 }
 0x168   : > { %v1690_v32 = vmax.f32 %v9131_v0, %v9136_v7  ;;  %v1657_v53 = vpop.f32.mrb[55].mxu0  ;;  %v12240_v16 = vpop.f32.mrb[53].mxu1  ;;  %v2844_v0 = vld [vmem:[#allocation2 + $0x19] sm:$0xff]  ;;  %v2845_v7 = vld [vmem:[#allocation2 + $0x21] sm:$0xff] }
 0x169   : > { %v9166_v20 = vpop.f32.mrb[54].mxu1 }
 0x16a   : > { %v1695_v10 = vmax.f32 %v14177_v19, %v1690_v32  ;;  %v1973_v17 = vmax.f32 %v9161_v57, %v9166_v20  ;;  %v1940_v52 = vpop.f32.mrb[55].mxu1  ;;  %v14178_v32 = vmax.f32 %v12092_v39, %v12148_v8  ;;  %v2853_v39 = vpack.c.bf16 %v2845_v7, %v2844_v0 }
 0x16c   : > { %9296 = vmatmul.mubr.msk.bf16.vlgmr.msra.gmra.mrb[80].mxu0 %vm277_vm2, %v2852_v44  ;;  %v1700_v5 = vadd.f32 %v11816_v62, %v1695_v10  ;;  %v1978_v51 = vmax.f32 %v14178_v32, %v1973_v17  ;;  %v11073_v10 = vld [vmem:[%s14066_s3 + $0x68] sm:$0xff]  }
 0x16d   : > { %9520 = vmatmul.mubr.msk.bf16.vlgmr.msra.gmra.mrb[80].mxu1 %vm277_vm2, %v3916_v13  ;;  %9299 = vmatprep.mubr.msk.bf16.mxu0 %vm11301_vm4, %v14175_v34  ;;  %v9139_v57 = vpop.f32.mrb[56].mxu0  ;;  %v12266_v13 = vld [vmem:[#allocation2 + $0x6f] sm:$0xff] }
 0x16e   : > { %9540 = vmatpush3.bf16.msra.mxu1 %v11069_v38  ;;  %9523 = vmatprep.mubr.msk.bf16.mxu1 %vm11301_vm4, %v14175_v34  ;;  %v1705_v20 = vmax.f32 %v1700_v5, 0.0  ;;  %v1693_v38 = vmax.f32 %v1657_v53, %v9139_v57  ;;  %v1670_v44 = vpop.f32.mrb[57].mxu0  ;;  %v1983_v17 = vadd.f32 %v11816_v62, %v1978_v51  ;;  %v14179_v5 = vmax.f32 %v12072_v40, %v12186_v15 }
 0x16f   : > { %9541 = vmatprep.subr.bf16.mxu1 %v14175_v34  ;;  %9316 = vmatpush3.bf16.msra.mxu0 %v11072_v47  ;;  %v1691_v8 = vmax.f32 %v12198_v1, %v1670_v44  ;;  %v9140_v19 = vpop.f32.mrb[58].mxu0  ;;  %v9169_v32 = vpop.f32.mrb[56].mxu1  ;;  %v3917_v0 = vpack.c.bf16 %v12266_v13, %v12264_v61  ;;  %v14180_v1 = vmax.f32 %v12082_v29, %v12105_v46 }
 0x170   : > { %9317 = vmatprep.subr.bf16.mxu0 %v14175_v34  ;;  %1710 = vst.msk [vmem:[#allocation2 + $0xd0] sm:$0xff] %vm277_vm2, %v1705_v20  ;;  %v1698_v47 = vmax.f32 %v14179_v5, %v1693_v38  ;;  %v1694_v36 = vmax.f32 %v9135_v2, %v9140_v19  ;;  %v1673_v12 = vpop.f32.mrb[59].mxu0  ;;  %v1988_v53 = vmax.f32 %v1983_v17, 0.0  ;;  %v1976_v57 = vmax.f32 %v1940_v52, %v9169_v32  ;;  %v1953_v41 = vpop.f32.mrb[57].mxu1  ;;  %v11075_v52 = vld [vmem:[%s14066_s3 + $0x70] sm:$0xff]  }
 0x171   : > { %v1696_v7 = vmax.f32 %v14180_v1, %v1691_v8  ;;  %v1692_v40 = vmax.f32 %v12231_v3, %v1673_v12  ;;  %v1974_v15 = vmax.f32 %v12215_v48, %v1953_v41  ;;  %v9170_v2 = vpop.f32.mrb[58].mxu1  ;;  %v14181_v20 = vmax.f32 %v12113_v43, %v12202_v31  ;;  %v12328_v8 = vld [vmem:[#allocation2 + $0x7f] sm:$0xff]  ;;  %v2846_v1 = vld [vmem:[#allocation2 + $0x29] sm:$0xff] }
 0x172   : > { %9542 = vmatpush3.bf16.msra.mxu1 %v11070_v63  ;;  %v11071_v63 = vld [vmem:[%s14066_s3 + $0x50] sm:$0xff]   ;;  %v1703_v51 = vadd.f32 %v11816_v62, %v1698_v47  ;;  %1993 = vst.msk [vmem:[#allocation2 + $0xf8] sm:$0xff] %vm277_vm2, %v1988_v53  ;;  %v14182_v29 = vmax.f32 %v12096_v42, %v12204_v37  ;;  %v1977_v12 = vmax.f32 %v12233_v11, %v9170_v2  ;;  %v1956_v41 = vpop.f32.mrb[59].mxu1 }
 0x173   : > { %9543 = vmatprep.subr.bf16.mxu1 %v14175_v34  ;;  %9318 = vmatpush3.bf16.msra.mxu0 %v11073_v10  ;;  %v1699_v38 = vmax.f32 %v14181_v20, %v1694_v36  ;;  %v1701_v48 = vadd.f32 %v11816_v62, %v1696_v7  ;;  %v14183_v3 = vmax.f32 %v12057_v14, %v12115_v55  ;;  %v12347_v7 = vld [vmem:[#allocation2 + $0x77] sm:$0xff] }
 0x174   : > { %v1981_v46 = vmax.f32 %v14182_v29, %v1976_v57  ;;  %9300 = vmatmul.mubr.msk.bf16.gmra.mrb[84].mxu0 %vm277_vm2, %v2853_v39  ;;  %v14184_v43 = vmax.f32 %v12101_v45, %v12117_v59  ;;  %v1708_v37 = vmax.f32 %v1703_v51, 0.0  ;;  %v14185_v10 = vmax.f32 %v12131_v58, %v12217_v9  ;;  %v11074_v45 = vld [vmem:[%s14066_s3 + $0x58] sm:$0xff]   ;;  %9319 = vmatprep.subr.bf16.mxu0 %v14175_v34 }
 0x175   : > { %9524 = vmatmul.mubr.msk.bf16.gmra.mrb[84].mxu1 %vm277_vm2, %v3917_v0  ;;  %v1697_v31 = vmax.f32 %v14183_v3, %v1692_v40  ;;  %9303 = vmatprep.mubr.msk.bf16.mxu0 %vm11301_vm4, %v14175_v34  ;;  %v1704_v42 = vadd.f32 %v11816_v62, %v1699_v38  ;;  %v1706_v55 = vmax.f32 %v1701_v48, 0.0  ;;  %v12324_v44 = vpop.f32.mrb[60].mxu0  ;;  %v1975_v39 = vmax.f32 %v12240_v16, %v1956_v41  ;;  %v11076_v9 = vld [vmem:[%s14066_s3 + $0x78] sm:$0xff]  }
 0x176   : > { %v1979_v36 = vmax.f32 %v14184_v43, %v1974_v15  ;;  %9527 = vmatprep.mubr.msk.bf16.mxu1 %vm11301_vm4, %v14175_v34  ;;  %v1986_v11 = vadd.f32 %v11816_v62, %v1981_v46  ;;  %v1982_v14 = vmax.f32 %v14185_v10, %v1977_v12  ;;  %9544 = vmatpush3.bf16.msra.mxu1 %v11071_v63  ;;  %v12335_v19 = vpop.f32.mrb[61].mxu0  ;;  %v12391_v43 = vld [vmem:[#allocation2 + $0x87] sm:$0xff] }
 0x177   : > { %v1702_v59 = vadd.f32 %v11816_v62, %v1697_v31  ;;  %9545 = vmatprep.subr.bf16.mxu1 %v14175_v34  ;;  %9320 = vmatpush3.bf16.msra.mxu0 %v11075_v52  ;;  %1713 = vst.msk [vmem:[#allocation2 + $0xe8] sm:$0xff] %vm277_vm2, %v1708_v37  ;;  %v1709_v58 = vmax.f32 %v1704_v42, 0.0  ;;  %1711 = vst.msk [vmem:[#allocation2 + $0xd8] sm:$0xff] %vm277_vm2, %v1706_v55  ;;  %v12340_v47 = vpop.f32.mrb[62].mxu0  ;;  %v14186_v57 = vmax.f32 %v12084_v6, %v12144_v30  ;;  %v12345_v63 = vpop.f32.mrb[60].mxu1  ;;  %v12379_v46 = vld [vmem:[#allocation2 + $0xcf] sm:$0xff] }
 0x178   : > { %v1984_v17 = vadd.f32 %v11816_v62, %v1979_v36  ;;  %v1991_v32 = vmax.f32 %v1986_v11, 0.0  ;;  %v1987_v5 = vadd.f32 %v11816_v62, %v1982_v14  ;;  %9321 = vmatprep.subr.bf16.mxu0 %v14175_v34  ;;  %v12350_v40 = vpop.f32.mrb[63].mxu0  ;;  %v12353_v2 = vpop.f32.mrb[61].mxu1  ;;  %v2854_v52 = vpack.c.bf16 %v11914_v22, %v2846_v1  ;;  %14187 = vst [vmem:[#allocation35_spill] sm:$0xff] %v12379_v46  ;;  %v12387_v3 = vld [vmem:[#allocation2 + $0xd0] sm:$0xff] }
 0x179   : > { %v1707_v16 = vmax.f32 %v1702_v59, 0.0  ;;  %v1980_v0 = vmax.f32 %v14186_v57, %v1975_v39  ;;  %1714 = vst.msk [vmem:[#allocation2 + $0xf0] sm:$0x3f] %vm580_vm5, %v1709_v58  ;;  %v3918_v6 = vpack.c.bf16 %v12328_v8, %v12347_v7  ;;  %v12361_v51 = vpop.f32.mrb[62].mxu1  ;;  %14189 = vst [vmem:[#allocation37_spill] sm:$0xff] %v12387_v3  ;;  %v2855_v58 = vpack.c.bf16 %v11918_v24, %v11916_v23  ;;  %v12427_v57 = vld [vmem:[#allocation2 + $0xf8] sm:$0xff] }
 0x17a   : > { %v1989_v53 = vmax.f32 %v1984_v17, 0.0  ;;  %1996 = vst.msk [vmem:[#allocation2 + $0x110] sm:$0xff] %vm277_vm2, %v1991_v32  ;;  %v1992_v15 = vmax.f32 %v1987_v5, 0.0  ;;  %9546 = vmatpush3.bf16.msra.mxu1 %v11074_v45  ;;  %v12365_v20 = vpop.f32.mrb[63].mxu1  ;;  %14196 = vst [vmem:[#allocation44_spill] sm:$0xff] %v12427_v57 }
 0x17b   : > { %1712 = vst.msk [vmem:[#allocation2 + $0xe0] sm:$0xff] %vm277_vm2, %v1707_v16  ;;  %v1985_v30 = vadd.f32 %v11816_v62, %v1980_v0  ;;  %9322 = vmatpush3.bf16.msra.mxu0 %v11076_v9  ;;  %9567 = vmatprep.subr.bf16.mxu1 %v14175_v34  ;;  %v12373_v62 = vld [vmem:[#allocation2 + $0x8f] sm:$0xff] }
 0x17c   : > { %1994 = vst.msk [vmem:[#allocation2 + $0x100] sm:$0xff] %vm277_vm2, %v1989_v53  ;;  %9304 = vmatmul.mubr.msk.bf16.gmra.mrb[88].mxu0 %vm277_vm2, %v2854_v52  ;;  %9343 = vmatprep.subr.bf16.mxu0 %v14175_v34  ;;  %v3919_v32 = vpack.c.bf16 %v12373_v62, %v12391_v43 }
 0x17d   : > { %1997 = vst.msk [vmem:[#allocation2 + $0x118] sm:$0x3f] %vm580_vm5, %v1992_v15  ;;  %9528 = vmatmul.mubr.msk.bf16.gmra.mrb[88].mxu1 %vm277_vm2, %v3918_v6  ;;  %v1990_v38 = vmax.f32 %v1985_v30, 0.0  ;;  %9307 = vmatprep.mubr.msk.bf16.mxu0 %vm11301_vm4, %v14175_v34  ;;  %v12376_v29 = vpop.f32.mrb[64].mxu0 }
 0x17e   : > { %9531 = vmatprep.mubr.msk.bf16.mxu1 %vm11301_vm4, %v14175_v34  ;;  %v12383_v41 = vpop.f32.mrb[65].mxu0  ;;  %v12385_v48 = vld [vmem:[#allocation2 + $0xd7] sm:$0xff]  ;;  %v12397_v42 = vld [vmem:[#allocation2 + $0xe8] sm:$0xff] }
 0x17f   : > { %1995 = vst.msk [vmem:[#allocation2 + $0x108] sm:$0xff] %vm277_vm2, %v1990_v38  ;;  %14188 = vst [vmem:[#allocation36_spill] sm:$0xff] %v12385_v48  ;;  %v12389_v31 = vld [vmem:[#allocation2 + $0xd8] sm:$0xff]  ;;  %v12393_v36 = vpop.f32.mrb[66].mxu0  ;;  %v12395_v37 = vpop.f32.mrb[64].mxu1 }
 0x180   : > { %14190 = vst [vmem:[#allocation38_spill] sm:$0xff] %v12389_v31  ;;  %14191 = vst [vmem:[#allocation39_spill] sm:$0xff] %v12397_v42  ;;  %v12405_v45 = vpop.f32.mrb[67].mxu0  ;;  %v12409_v59 = vpop.f32.mrb[65].mxu1  ;;  %v12425_v53 = vld [vmem:[#allocation2 + $0xf0] sm:$0xff] }
 0x181   : > { %v12423_v16 = vpop.f32.mrb[66].mxu1  ;;  %14195 = vst [vmem:[#allocation43_spill] sm:$0xff] %v12425_v53  ;;  %v12435_v52 = vld [vmem:[#allocation2 + $0x110] sm:$0xff] }
 0x182   : > { %v12411_v17 = vld [vmem:[#allocation2 + $0xdf] sm:$0xff]  ;;  %v12413_v39 = vld [vmem:[#allocation2 + $0xe7] sm:$0xff]  ;;  %v12431_v1 = vpop.f32.mrb[67].mxu1  ;;  %14198 = vst [vmem:[#allocation46_spill] sm:$0xff] %v12435_v52  ;;  %v12465_v14 = vld [vmem:[#allocation2 + $0xd1] sm:$0xff] }
 0x183   : > { %14192 = vst [vmem:[#allocation40_spill] sm:$0xff] %v12411_v17  ;;  %14193 = vst [vmem:[#allocation41_spill] sm:$0xff] %v12413_v39  ;;  %v12415_v9 = vld [vmem:[#allocation2 + $0xe0] sm:$0xff]  ;;  %v2534_v38 = vmax.f32 %v12353_v2, %v12431_v1  ;;  %v12449_v0 = vld [vmem:[#allocation2 + $0xe9] sm:$0xff]  ;;  %v2856_v1 = vpack.c.bf16 %v11924_v26, %v11922_v25  ;;  %v14209_v39 = vmax.f32 %v12335_v19, %v12405_v45 }
 0x184   : > { %14194 = vst [vmem:[#allocation42_spill] sm:$0xff] %v12415_v9  ;;  %v12433_v15 = vld [vmem:[#allocation2 + $0x100] sm:$0xff]  ;;  %v12437_v6 = vld [vmem:[#allocation2 + $0x118] sm:$0xff]  ;;  %9308 = vmatmul.mubr.msk.bf16.gmra.mrb[92].mxu0 %vm277_vm2, %v2855_v58  ;;  %14202 = vst [vmem:[#allocation50_spill] sm:$0xff] %v12449_v0 }
 0x185   : > { %14197 = vst [vmem:[#allocation45_spill] sm:$0xff] %v12433_v15  ;;  %14199 = vst [vmem:[#allocation47_spill] sm:$0xff] %v12437_v6  ;;  %9532 = vmatmul.mubr.msk.bf16.gmra.mrb[92].mxu1 %vm277_vm2, %v3919_v32  ;;  %v12445_v10 = vld [vmem:[#allocation2 + $0xd9] sm:$0xff]  ;;  %v12447_v11 = vld [vmem:[#allocation2 + $0xe1] sm:$0xff]  ;;  %9311 = vmatprep.mubr.msk.bf16.mxu0 %vm11301_vm4, %v14175_v34  ;;  %v9191_v30 = vpop.f32.mrb[68].mxu0 }
 0x186   : > { %14200 = vst [vmem:[#allocation48_spill] sm:$0xff] %v12445_v10  ;;  %14201 = vst [vmem:[#allocation49_spill] sm:$0xff] %v12447_v11  ;;  %9535 = vmatprep.mubr.msk.bf16.mxu1 %vm11301_vm4, %v14175_v34  ;;  %v12457_v58 = vld [vmem:[#allocation2 + $0x9f] sm:$0xff]  ;;  %v12459_v32 = vld [vmem:[#allocation2 + $0x108] sm:$0xff]  ;;  %v12475_v9 = vpop.f32.mrb[69].mxu0  ;;  %v4186_v10 = vpack.c.bf16 %v11929_v33, %v11926_v27 }
 0x187   : > { %14203 = vst [vmem:[#allocation51_spill] sm:$0xff] %v12459_v32  ;;  %14204 = vst [vmem:[#allocation52_spill] sm:$0xff] %v12465_v14  ;;  %v12467_v55 = vld [vmem:[#allocation2 + $0xf9] sm:$0xff]  ;;  %v12469_v12 = vld [vmem:[#allocation2 + $0x101] sm:$0xff]  ;;  %v2254_v6 = vmax.f32 %v12340_v47, %v12475_v9  ;;  %v12487_v57 = vpop.f32.mrb[70].mxu0  ;;  %v9221_v5 = vpop.f32.mrb[68].mxu1  ;;  %v2997_v32 = vpack.c.bf16 %v12121_v60, %v12063_v18 }
 0x188   : > { %14205 = vst [vmem:[#allocation53_spill] sm:$0xff] %v12467_v55  ;;  %14206 = vst [vmem:[#allocation54_spill] sm:$0xff] %v12469_v12  ;;  %v12473_v42 = vld [vmem:[#allocation2 + $0x97] sm:$0xff]  ;;  %v12479_v2 = vld [vmem:[#allocation2 + $0x109] sm:$0xff]  ;;  %v12493_v53 = vpop.f32.mrb[71].mxu0  ;;  %v12495_v3 = vpop.f32.mrb[69].mxu1 }
 0x189   : > { %v12477_v31 = vld [vmem:[#allocation2 + $0xf1] sm:$0xff]  ;;  %14208 = vst [vmem:[#allocation56_spill] sm:$0xff] %v12479_v2  ;;  %v3920_v52 = vpack.c.bf16 %v12457_v58, %v12473_v42  ;;  %v12505_v15 = vpop.f32.mrb[70].mxu1  ;;  %v11080_v14 = vld [vmem:[%s14066_s3 + $0x80] sm:$0xff]   ;;  %v11078_v18 = vld [vmem:[%s14066_s3 + $0x68] sm:$0xff]  }
 0x18a   : > { %14207 = vst [vmem:[#allocation55_spill] sm:$0xff] %v12477_v31  ;;  %v12507_v55 = vpop.f32.mrb[71].mxu1  ;;  %v12546_v60 = vld [vmem:[%s14065_s2] ss:$0 sm:$0xff]  ;;  %v11081_v45 = vld [vmem:[%s14066_s3 + $0x88] sm:$0xff]  }
 0x18c   : > { %9312 = vmatmul.mubr.msk.bf16.gmra.mrb[96].mxu0 %vm277_vm2, %v2856_v1  ;;  %v11077_v1 = vld [vmem:[%s14066_s3 + $0x60] sm:$0xff]  }
 0x18d   : > { %9536 = vmatmul.mubr.msk.bf16.gmra.mrb[96].mxu1 %vm277_vm2, %v3920_v52  ;;  %9323 = vmatprep.mubr.msk.bf16.mxu0 %vm11301_vm4, %v14175_v34  ;;  %v9195_v47 = vpop.f32.mrb[72].mxu0 }
 0x18e   : > { %9547 = vmatprep.mubr.msk.bf16.mxu1 %vm11301_vm4, %v14175_v34  ;;  %v12517_v12 = vpop.f32.mrb[73].mxu0 }
 0x18f   : > { %v9196_v9 = vpop.f32.mrb[74].mxu0  ;;  %v12519_v2 = vpop.f32.mrb[72].mxu1 }
 0x190   : > { %v2256_v52 = vmax.f32 %v9191_v30, %v9196_v9  ;;  %v2223_v11 = vpop.f32.mrb[75].mxu0  ;;  %v12524_v0 = vpop.f32.mrb[73].mxu1 }
 0x191   : > { %v9226_v31 = vpop.f32.mrb[74].mxu1 }
 0x192   : > { %v2261_v17 = vmax.f32 %v14209_v39, %v2256_v52  ;;  %v2539_v48 = vmax.f32 %v9221_v5, %v9226_v31  ;;  %v2506_v30 = vpop.f32.mrb[75].mxu1 }
 0x194   : > { %9324 = vmatmul.mubr.msk.bf16.vlgmr.msra.gmra.mrb[80].mxu0 %vm277_vm2, %v2997_v32  ;;  %v2266_v19 = vadd.f32 %v12546_v60, %v2261_v17  ;;  %v2544_v31 = vmax.f32 %v2534_v38, %v2539_v48  ;;  %v2998_v17 = vpack.c.bf16 %v12182_v50, %v12107_v56  ;;  %v11079_v56 = vld [vmem:[%s14066_s3 + $0x70] sm:$0xff]   ;;  %v14210_v50 = vmax.f32 %v12350_v40, %v12376_v29 }
 0x195   : > { %9548 = vmatmul.mubr.msk.bf16.vlgmr.msra.gmra.mrb[80].mxu1 %vm277_vm2, %v4186_v10  ;;  %9327 = vmatprep.mubr.msk.bf16.mxu0 %vm11301_vm4, %v14175_v34  ;;  %v9199_v10 = vpop.f32.mrb[76].mxu0  ;;  %v14212_v40 = vmax.f32 %v12361_v51, %v12495_v3 }
 0x196   : > { %9568 = vmatpush3.bf16.msra.mxu1 %v11077_v1  ;;  %9551 = vmatprep.mubr.msk.bf16.mxu1 %vm11301_vm4, %v14175_v34  ;;  %v2271_v39 = vmax.f32 %v2266_v19, 0.0  ;;  %v2259_v5 = vmax.f32 %v2223_v11, %v9199_v10  ;;  %v2236_v32 = vpop.f32.mrb[77].mxu0  ;;  %v2549_v9 = vadd.f32 %v12546_v60, %v2544_v31  ;;  %v4187_v31 = vpack.c.bf16 %v12074_v49, %v11931_v35 }
 0x197   : > { %9569 = vmatprep.subr.bf16.mxu1 %v14175_v34  ;;  %9344 = vmatpush3.bf16.msra.mxu0 %v11080_v14  ;;  %v2257_v48 = vmax.f32 %v12487_v57, %v2236_v32  ;;  %v9200_v38 = vpop.f32.mrb[78].mxu0  ;;  %v9229_v1 = vpop.f32.mrb[76].mxu1 }
 0x198   : > { %9345 = vmatprep.subr.bf16.mxu0 %v14175_v34  ;;  %2276 = vst.msk [vmem:[#allocation2 + $0x120] sm:$0xff] %vm277_vm2, %v2271_v39  ;;  %v2264_v14 = vmax.f32 %v2254_v6, %v2259_v5  ;;  %v2260_v52 = vmax.f32 %v9195_v47, %v9200_v38  ;;  %v2239_v46 = vpop.f32.mrb[79].mxu0  ;;  %v2554_v19 = vmax.f32 %v2549_v9, 0.0  ;;  %v2542_v11 = vmax.f32 %v2506_v30, %v9229_v1  ;;  %v2519_v10 = vpop.f32.mrb[77].mxu1  ;;  %v11083_v30 = vld [vmem:[%s14066_s3 + $0x90] sm:$0xff]  }
 0x199   : > { %v2262_v57 = vmax.f32 %v14210_v50, %v2257_v48  ;;  %v2258_v6 = vmax.f32 %v12517_v12, %v2239_v46  ;;  %v2540_v47 = vmax.f32 %v12505_v15, %v2519_v10  ;;  %v14211_v5 = vmax.f32 %v12383_v41, %v12493_v53  ;;  %v12609_v1 = vld [vmem:[#allocation2 + $0x111] sm:$0xff] }
 0x19a   : > { %9570 = vmatpush3.bf16.msra.mxu1 %v11078_v18  ;;  %v9230_v18 = vpop.f32.mrb[78].mxu1  ;;  %v2269_v39 = vadd.f32 %v12546_v60, %v2264_v14  ;;  %2559 = vst.msk [vmem:[#allocation2 + $0x148] sm:$0xff] %vm277_vm2, %v2554_v19  ;;  %v2547_v29 = vmax.f32 %v14212_v40, %v2542_v11  ;;  %v14214_v53 = vmax.f32 %v12365_v20, %v12395_v37  ;;  %v11082_v20 = vld [vmem:[%s14066_s3 + $0x78] sm:$0xff]   ;;  %v14218_v40 = vld [vmem:[#allocation18_spill] sm:$0xff] }
 0x19b   : > { %9571 = vmatprep.subr.bf16.mxu1 %v14175_v34  ;;  %9346 = vmatpush3.bf16.msra.mxu0 %v11081_v45  ;;  %v2265_v32 = vmax.f32 %v14211_v5, %v2260_v52  ;;  %v2543_v46 = vmax.f32 %v12519_v2, %v9230_v18  ;;  %v2522_v12 = vpop.f32.mrb[79].mxu1  ;;  %v2267_v15 = vadd.f32 %v12546_v60, %v2262_v57  ;;  %v14217_v5 = vld [vmem:[#allocation34_spill] sm:$0xff] }
 0x19c   : > { %9328 = vmatmul.mubr.msk.bf16.gmra.mrb[84].mxu0 %vm277_vm2, %v2998_v17  ;;  %v14213_v45 = vmax.f32 %v12324_v44, %v12393_v36  ;;  %v2545_v9 = vmax.f32 %v14214_v53, %v2540_v47  ;;  %v2274_v51 = vmax.f32 %v2269_v39, 0.0  ;;  %v2552_v2 = vadd.f32 %v12546_v60, %v2547_v29  ;;  %9347 = vmatprep.subr.bf16.mxu0 %v14175_v34  ;;  %v14219_v29 = vld [vmem:[#allocation19_spill] sm:$0xff] }
 0x19d   : > { %9552 = vmatmul.mubr.msk.bf16.gmra.mrb[84].mxu1 %vm277_vm2, %v4187_v31  ;;  %9331 = vmatprep.mubr.msk.bf16.mxu0 %vm11301_vm4, %v14175_v34  ;;  %v2270_v3 = vadd.f32 %v12546_v60, %v2265_v32  ;;  %v14215_v17 = vmax.f32 %v12409_v59, %v12507_v55  ;;  %v2272_v36 = vmax.f32 %v2267_v15, 0.0  ;;  %v2541_v38 = vmax.f32 %v12524_v0, %v2522_v12  ;;  %v11084_v55 = vld [vmem:[%s14066_s3 + $0x98] sm:$0xff]  }
 0x19e   : > { %v2263_v41 = vmax.f32 %v14213_v45, %v2258_v6  ;;  %9555 = vmatprep.mubr.msk.bf16.mxu1 %vm11301_vm4, %v14175_v34  ;;  %9572 = vmatpush3.bf16.msra.mxu1 %v11079_v56  ;;  %v2550_v48 = vadd.f32 %v12546_v60, %v2545_v9  ;;  %2279 = vst.msk [vmem:[#allocation2 + $0x138] sm:$0xff] %vm277_vm2, %v2274_v51  ;;  %v2557_v14 = vmax.f32 %v2552_v2, 0.0 }
 0x19f   : > { %v2548_v44 = vmax.f32 %v14215_v17, %v2543_v46  ;;  %9573 = vmatprep.subr.bf16.mxu1 %v14175_v34  ;;  %9348 = vmatpush3.bf16.msra.mxu0 %v11083_v30  ;;  %v2275_v59 = vmax.f32 %v2270_v3, 0.0  ;;  %2277 = vst.msk [vmem:[#allocation2 + $0x128] sm:$0xff] %vm277_vm2, %v2272_v36  ;;  %v14216_v11 = vmax.f32 %v12345_v63, %v12423_v16  ;;  %v12622_v31 = vld [vmem:[#allocation2 + $0x119] sm:$0xff] }
 0x1a0   : > { %v2268_v37 = vadd.f32 %v12546_v60, %v2263_v41  ;;  %9349 = vmatprep.subr.bf16.mxu0 %v14175_v34  ;;  %v2555_v19 = vmax.f32 %v2550_v48, 0.0  ;;  %2562 = vst.msk [vmem:[#allocation2 + $0x160] sm:$0xff] %vm277_vm2, %v2557_v14  ;;  %v5953_v50 = vpack.c.bf16 %v12622_v31, %v12609_v1  ;;  %v2999_v57 = vpack.c.bf16 %v12235_v4, %v12184_v54  ;;  %v12645_v4 = vld [vmem:[#allocation2 + $0x120] sm:$0xff] }
 0x1a1   : > { %v2553_v52 = vadd.f32 %v12546_v60, %v2548_v44  ;;  %v2546_v10 = vmax.f32 %v14216_v11, %v2541_v38  ;;  %2280 = vst.msk [vmem:[#allocation2 + $0x140] sm:$0x3f] %vm580_vm5, %v2275_v59  ;;  %v4188_v6 = vpack.c.bf16 %v12127_v21, %v12076_v28  ;;  %v12657_v39 = vld [vmem:[#allocation2 + $0x148] sm:$0xff]  ;;  %v3000_v32 = vpack.c.bf16 %v12264_v61, %v14217_v5  ;;  %v11215_v11 = vld [vmem:[#allocation2 + $0xf9] sm:$0xff] }
 0x1a2   : > { %v2273_v0 = vmax.f32 %v2268_v37, 0.0  ;;  %9574 = vmatpush3.bf16.msra.mxu1 %v11082_v20  ;;  %2560 = vst.msk [vmem:[#allocation2 + $0x150] sm:$0xff] %vm277_vm2, %v2555_v19  ;;  %v4189_v46 = vpack.c.bf16 %v14219_v29, %v14218_v40  ;;  %v12669_v41 = vld [vmem:[#allocation2 + $0x147] sm:$0xff] }
 0x1a3   : > { %v2558_v56 = vmax.f32 %v2553_v52, 0.0  ;;  %v2551_v63 = vadd.f32 %v12546_v60, %v2546_v10  ;;  %9350 = vmatpush3.bf16.msra.mxu0 %v11084_v55  ;;  %9595 = vmatprep.subr.bf16.mxu1 %v14175_v34  ;;  %v12705_v59 = vld [vmem:[#allocation2 + $0xa1] sm:$0xff]  ;;  %v3001_v10 = vpack.c.bf16 %v12347_v7, %v12266_v13  ;;  %v4331_v13 = vpack.c.bf16 %v12391_v43, %v12328_v8 }
 0x1a4   : > { %2278 = vst.msk [vmem:[#allocation2 + $0x130] sm:$0xff] %vm277_vm2, %v2273_v0  ;;  %9332 = vmatmul.mubr.msk.bf16.gmra.mrb[88].mxu0 %vm277_vm2, %v2999_v57  ;;  %9371 = vmatprep.subr.bf16.mxu0 %v14175_v34  ;;  %v11088_v7 = vld [vmem:[%s14066_s3 + $0xa0] sm:$0xff]   ;;  %v11089_v8 = vld [vmem:[%s14066_s3 + $0xa8] sm:$0xff]   ;;  %v4332_v43 = vpack.c.bf16 %v12473_v42, %v12373_v62  ;;  %v11090_v62 = vld [vmem:[%s14066_s3 + $0x98] sm:$0xff]  }
 0x1a5   : > { %2563 = vst.msk [vmem:[#allocation2 + $0x168] sm:$0x3f] %vm580_vm5, %v2558_v56  ;;  %9556 = vmatmul.mubr.msk.bf16.gmra.mrb[88].mxu1 %vm277_vm2, %v4188_v6  ;;  %v2556_v54 = vmax.f32 %v2551_v63, 0.0  ;;  %9335 = vmatprep.mubr.msk.bf16.mxu0 %vm11301_vm4, %v14175_v34  ;;  %v12649_v60 = vld [vmem:[#allocation2 + $0x138] sm:$0xff]  ;;  %v11085_v6 = vld [vmem:[%s14066_s3 + $0x80] sm:$0xff]   ;;  %v3136_v42 = vld [vmem:[#allocation2 + $0x50] sm:$0xff] }
 0x1a6   : > { %9559 = vmatprep.mubr.msk.bf16.mxu1 %vm11301_vm4, %v14175_v34  ;;  %v12647_v16 = vld [vmem:[#allocation2 + $0x128] sm:$0xff]  ;;  %v14220_v56 = vld [vmem:[#allocation20_spill] sm:$0xff] }
 0x1a7   : > { %2561 = vst.msk [vmem:[#allocation2 + $0x158] sm:$0xff] %vm277_vm2, %v2556_v54  ;;  %v7132_v47 = vpack.c.bf16 %v12647_v16, %v12645_v4  ;;  %v12663_v12 = vld [vmem:[#allocation2 + $0x121] sm:$0xff]  ;;  %v4190_v57 = vpack.c.bf16 %v12705_v59, %v14220_v56  ;;  %v14221_v63 = vld [vmem:[#allocation8_spill] sm:$0xff]  ;;  %v14222_v54 = vld [vmem:[#allocation7_spill] sm:$0xff] }
 0x1a8   : > { %v12655_v30 = vld [vmem:[#allocation2 + $0x139] sm:$0xff]  ;;  %v14223_v5 = vpack.c.bf16 %v14221_v63, %v14222_v54  ;;  %v11216_v19 = vld [vmem:[#allocation2 + $0x101] sm:$0xff] }
 0x1a9   : > { %v12671_v53 = vld [vmem:[#allocation2 + $0x14f] sm:$0xff]  ;;  %v12681_v3 = vld [vmem:[#allocation2 + $0x160] sm:$0xff]  ;;  %v11198_v63 = vld [vmem:[#allocation2 + $0x58] sm:$0xff]  ;;  %v6842_v0 = vpack.c.bf16 %v11216_v19, %v11215_v11 }
 0x1aa   : > { %v12675_v51 = vld [vmem:[#allocation2 + $0x150] sm:$0xff]  ;;  %v7422_v17 = vpack.c.bf16 %v12671_v53, %v12669_v41  ;;  %v3144_v54 = vpack.c.bf16 %v11198_v63, %v3136_v42  ;;  %v11150_v55 = vld [vmem:[%s14066_s3 + $0x68] sm:$0xff]  }
 0x1ab   : > { %v12653_v18 = vld [vmem:[#allocation2 + $0x130] sm:$0xff]  ;;  %v11185_v41 = vld [vmem:[%s14066_s3 + $0x108] sm:$0xff]  }
 0x1ac   : > { %v12665_v15 = vld [vmem:[#allocation2 + $0x129] sm:$0xff]  ;;  %v12667_v45 = vld [vmem:[#allocation2 + $0x131] sm:$0xff]  ;;  %v7133_v9 = vpack.c.bf16 %v12649_v60, %v12653_v18  ;;  %9336 = vmatmul.mubr.msk.bf16.gmra.mrb[92].mxu0 %vm277_vm2, %v3000_v32  ;;  %v12709_v52 = vld [vmem:[#allocation2 + $0x161] sm:$0xff] }
 0x1ad   : > { %v7277_v61 = vpack.c.bf16 %v12665_v15, %v12663_v12  ;;  %9560 = vmatmul.mubr.msk.bf16.gmra.mrb[92].mxu1 %vm277_vm2, %v4189_v46  ;;  %v7278_v2 = vpack.c.bf16 %v12655_v30, %v12667_v45  ;;  %9339 = vmatprep.mubr.msk.bf16.mxu0 %vm11301_vm4, %v14175_v34  ;;  %v12699_v48 = vld [vmem:[#allocation2 + $0x149] sm:$0xff]  ;;  %v11218_v19 = vld [vmem:[#allocation2 + $0x111] sm:$0xff] }
 0x1ae   : > { %9563 = vmatprep.mubr.msk.bf16.mxu1 %vm11301_vm4, %v14175_v34  ;;  %v12691_v44 = vld [vmem:[#allocation2 + $0x157] sm:$0xff]  ;;  %v12693_v20 = vld [vmem:[#allocation2 + $0x15f] sm:$0xff]  ;;  %v11086_v32 = vld [vmem:[%s14066_s3 + $0x88] sm:$0xff]  }
 0x1af   : > { %v12695_v36 = vld [vmem:[#allocation2 + $0x158] sm:$0xff]  ;;  %v11087_v46 = vld [vmem:[%s14066_s3 + $0x90] sm:$0xff]   ;;  %v11177_v12 = vld [vmem:[%s14066_s3 + $0xe8] sm:$0xff]  }
 0x1b0   : > { %v12701_v38 = vld [vmem:[#allocation2 + $0x151] sm:$0xff]  ;;  %v12707_v14 = vld [vmem:[#allocation2 + $0x159] sm:$0xff]  ;;  %v11232_v45 = vld [vmem:[#allocation2 + $0x149] sm:$0xff] }
 0x1b1   : > { %v11180_v30 = vld [vmem:[%s14066_s3 + $0xf8] sm:$0xff]  }
 0x1b4   : > { %9340 = vmatmul.mubr.msk.bf16.gmra.mrb[96].mxu0 %vm277_vm2, %v3001_v10  ;;  %v11091_v10 = vld [vmem:[%s14066_s3 + $0xb0] sm:$0xff]  }
 0x1b5   : > { %9564 = vmatmul.mubr.msk.bf16.gmra.mrb[96].mxu1 %vm277_vm2, %v4190_v57  ;;  %9351 = vmatprep.mubr.msk.bf16.mxu0 %vm11301_vm4, %v14175_v34  ;;  %v14224_v57 = vld [vmem:[#allocation10_spill] sm:$0xff] }
 0x1b6   : > { %9575 = vmatprep.mubr.msk.bf16.mxu1 %vm11301_vm4, %v14175_v34 }
 0x1bc   : > { %9352 = vmatmul.mubr.msk.bf16.vlgmr.msra.gmra.mrb[80].mxu0 %vm277_vm2, %v14223_v5  ;;  %v14227_v5 = vld [vmem:[#allocation24_spill] sm:$0xff] }
 0x1bd   : > { %9576 = vmatmul.mubr.msk.bf16.vlgmr.msra.gmra.mrb[80].mxu1 %vm277_vm2, %v4331_v13  ;;  %9355 = vmatprep.mubr.msk.bf16.mxu0 %vm11301_vm4, %v14175_v34 }
 0x1be   : > { %9596 = vmatpush3.bf16.msra.mxu1 %v11085_v6  ;;  %9579 = vmatprep.mubr.msk.bf16.mxu1 %vm11301_vm4, %v14175_v34  ;;  %v14225_v6 = vld [vmem:[#allocation9_spill] sm:$0xff] }
 0x1bf   : > { %9597 = vmatprep.subr.bf16.mxu1 %v14175_v34  ;;  %9372 = vmatpush3.bf16.msra.mxu0 %v11088_v7  ;;  %v14226_v13 = vpack.c.bf16 %v14224_v57, %v14225_v6  ;;  %v11092_v7 = vld [vmem:[%s14066_s3 + $0xb8] sm:$0xff]   ;;  %v12797_v6 = vld [vmem:[#allocation2 + $0xc7] sm:$0xff] }
 0x1c0   : > { %9373 = vmatprep.subr.bf16.mxu0 %v14175_v34 }
 0x1c2   : > { %9598 = vmatpush3.bf16.msra.mxu1 %v11086_v32  ;;  %v4333_v32 = vpack.c.bf16 %v14227_v5, %v12457_v58  ;;  %v14228_v58 = vld [vmem:[#allocation21_spill] sm:$0xff] }
 0x1c3   : > { %9599 = vmatprep.subr.bf16.mxu1 %v14175_v34  ;;  %9374 = vmatpush3.bf16.msra.mxu0 %v11089_v8  ;;  %v11199_v8 = vld [vmem:[#allocation2 + $0x60] sm:$0xff] }
 0x1c4   : > { %9356 = vmatmul.mubr.msk.bf16.gmra.mrb[84].mxu0 %vm277_vm2, %v14226_v13  ;;  %9375 = vmatprep.subr.bf16.mxu0 %v14175_v34  ;;  %v11201_v13 = vld [vmem:[#allocation2 + $0x70] sm:$0xff] }
 0x1c5   : > { %9580 = vmatmul.mubr.msk.bf16.gmra.mrb[84].mxu1 %vm277_vm2, %v4332_v43  ;;  %9359 = vmatprep.mubr.msk.bf16.mxu0 %vm11301_vm4, %v14175_v34  ;;  %v11200_v43 = vld [vmem:[#allocation2 + $0x68] sm:$0xff] }
 0x1c6   : > { %9583 = vmatprep.mubr.msk.bf16.mxu1 %vm11301_vm4, %v14175_v34  ;;  %9600 = vmatpush3.bf16.msra.mxu1 %v11087_v46  ;;  %v3145_v46 = vpack.c.bf16 %v11200_v43, %v11199_v8  ;;  %v14232_v8 = vpack.c.bf16 %v11916_v23, %v11914_v22  ;;  %v14233_v43 = vld [vmem:[#allocation17_spill] sm:$0xff]  ;;  %v12830_v22 = vld [vmem:[#allocation2 + $0x90] sm:$0xff]  ;;  %v11097_v23 = vld [vmem:[%s14066_s3 + $0xc8] sm:$0xff]  }
 0x1c7   : > { %9601 = vmatprep.subr.bf16.mxu1 %v14175_v34  ;;  %9376 = vmatpush3.bf16.msra.mxu0 %v11091_v10  ;;  %v14229_v10 = vld [vmem:[#allocation22_spill] sm:$0xff] }
 0x1c8   : > { %9377 = vmatprep.subr.bf16.mxu0 %v14175_v34  ;;  %v4334_v57 = vpack.c.bf16 %v14229_v10, %v14228_v58 }
 0x1ca   : > { %9602 = vmatpush3.bf16.msra.mxu1 %v11090_v62  ;;  %v14230_v62 = vld [vmem:[#allocation15_spill] sm:$0xff] }
 0x1cb   : > { %9378 = vmatpush3.bf16.msra.mxu0 %v11092_v7  ;;  %9623 = vmatprep.subr.bf16.mxu1 %v14175_v34  ;;  %v3146_v42 = vpack.c.bf16 %v14230_v62, %v11201_v13  ;;  %v14231_v7 = vld [vmem:[#allocation23_spill] sm:$0xff] }
 0x1cc   : > { %9360 = vmatmul.mubr.msk.bf16.gmra.mrb[88].mxu0 %vm277_vm2, %v3144_v54  ;;  %9399 = vmatprep.subr.bf16.mxu0 %v14175_v34  ;;  %v4335_v63 = vpack.c.bf16 %v12797_v6, %v14231_v7  ;;  %v11093_v54 = vld [vmem:[%s14066_s3 + $0xa0] sm:$0xff]   ;;  %v11094_v13 = vld [vmem:[%s14066_s3 + $0xa8] sm:$0xff]  }
 0x1cd   : > { %9584 = vmatmul.mubr.msk.bf16.gmra.mrb[88].mxu1 %vm277_vm2, %v4333_v32  ;;  %9363 = vmatprep.mubr.msk.bf16.mxu0 %vm11301_vm4, %v14175_v34  ;;  %v11096_v32 = vld [vmem:[%s14066_s3 + $0xc0] sm:$0xff]   ;;  %v14236_v62 = vld [vmem:[#allocation31_spill] sm:$0xff] }
 0x1ce   : > { %9587 = vmatprep.mubr.msk.bf16.mxu1 %vm11301_vm4, %v14175_v34 }
 0x1d4   : > { %9364 = vmatmul.mubr.msk.bf16.gmra.mrb[92].mxu0 %vm277_vm2, %v3145_v46  ;;  %v14234_v46 = vld [vmem:[#allocation16_spill] sm:$0xff] }
 0x1d5   : > { %9588 = vmatmul.mubr.msk.bf16.gmra.mrb[92].mxu1 %vm277_vm2, %v4334_v57  ;;  %9367 = vmatprep.mubr.msk.bf16.mxu0 %vm11301_vm4, %v14175_v34  ;;  %v14235_v57 = vpack.c.bf16 %v14233_v43, %v14234_v46  ;;  %v12858_v43 = vld [vmem:[#allocation2 + $0xa0] sm:$0xff] }
 0x1d6   : > { %9591 = vmatprep.mubr.msk.bf16.mxu1 %vm11301_vm4, %v14175_v34 }
 0x1dc   : > { %9368 = vmatmul.mubr.msk.bf16.gmra.mrb[96].mxu0 %vm277_vm2, %v3146_v42  ;;  %v4477_v42 = vpack.c.bf16 %v14236_v62, %v12830_v22 }
 0x1dd   : > { %9592 = vmatmul.mubr.msk.bf16.gmra.mrb[96].mxu1 %vm277_vm2, %v4335_v63  ;;  %9379 = vmatprep.mubr.msk.bf16.mxu0 %vm11301_vm4, %v14175_v34  ;;  %v11095_v63 = vld [vmem:[%s14066_s3 + $0xb0] sm:$0xff]  }
 0x1de   : > { %9603 = vmatprep.mubr.msk.bf16.mxu1 %vm11301_vm4, %v14175_v34 }
 0x1e4   : > { %9380 = vmatmul.mubr.msk.bf16.vlgmr.msra.gmra.mrb[80].mxu0 %vm277_vm2, %v14232_v8  ;;  %v11098_v8 = vld [vmem:[%s14066_s3 + $0xb8] sm:$0xff]  }
 0x1e5   : > { %9604 = vmatmul.mubr.msk.bf16.vlgmr.msra.gmra.mrb[80].mxu1 %vm277_vm2, %v14235_v57  ;;  %9383 = vmatprep.mubr.msk.bf16.mxu0 %vm11301_vm4, %v14175_v34  ;;  %v14239_v57 = vpack.c.bf16 %v11926_v27, %v11924_v26  ;;  %v12889_v26 = vld [vmem:[#allocation2 + $0xc8] sm:$0xff]  ;;  %v14243_v27 = vld [vmem:[#allocation28_spill] sm:$0xff] }
 0x1e6   : > { %9624 = vmatpush3.bf16.msra.mxu1 %v11093_v54  ;;  %9607 = vmatprep.mubr.msk.bf16.mxu1 %vm11301_vm4, %v14175_v34  ;;  %v11099_v54 = vld [vmem:[%s14066_s3 + $0xd0] sm:$0xff]  }
 0x1e7   : > { %9625 = vmatprep.subr.bf16.mxu1 %v14175_v34  ;;  %9400 = vmatpush3.bf16.msra.mxu0 %v11096_v32  ;;  %v14237_v32 = vpack.c.bf16 %v11922_v25, %v11918_v24  ;;  %v11100_v24 = vld [vmem:[%s14066_s3 + $0xd8] sm:$0xff]   ;;  %v14238_v25 = vld [vmem:[#allocation26_spill] sm:$0xff] }
 0x1e8   : > { %9401 = vmatprep.subr.bf16.mxu0 %v14175_v34  ;;  %v4478_v46 = vpack.c.bf16 %v14238_v25, %v12858_v43  ;;  %v3424_v25 = vld [vmem:[#allocation2 + $0x67] sm:$0xff] }
 0x1ea   : > { %9626 = vmatpush3.bf16.msra.mxu1 %v11094_v13  ;;  %v14240_v13 = vld [vmem:[#allocation25_spill] sm:$0xff] }
 0x1eb   : > { %9627 = vmatprep.subr.bf16.mxu1 %v14175_v34  ;;  %9402 = vmatpush3.bf16.msra.mxu0 %v11097_v23  ;;  %v14241_v23 = vld [vmem:[#allocation27_spill] sm:$0xff] }
 0x1ec   : > { %9384 = vmatmul.mubr.msk.bf16.gmra.mrb[84].mxu0 %vm277_vm2, %v14237_v32  ;;  %9403 = vmatprep.subr.bf16.mxu0 %v14175_v34  ;;  %v4479_v62 = vpack.c.bf16 %v14241_v23, %v14240_v13  ;;  %v11101_v32 = vld [vmem:[%s14066_s3 + $0xc0] sm:$0xff]   ;;  %v11107_v13 = vld [vmem:[%s14066_s3 + $0xf0] sm:$0xff]   ;;  %v14246_v23 = vpack.c.bf16 %v14220_v56, %v14219_v29  ;;  %v11108_v29 = vld [vmem:[%s14066_s3 + $0xf8] sm:$0xff]  }
 0x1ed   : > { %9608 = vmatmul.mubr.msk.bf16.gmra.mrb[84].mxu1 %vm277_vm2, %v4477_v42  ;;  %9387 = vmatprep.mubr.msk.bf16.mxu0 %vm11301_vm4, %v14175_v34  ;;  %v14242_v42 = vpack.c.bf16 %v11931_v35, %v11929_v33  ;;  %v3423_v33 = vld [vmem:[#allocation2 + $0x5f] sm:$0xff]  ;;  %v3422_v35 = vld [vmem:[#allocation2 + $0x57] sm:$0xff] }
 0x1ee   : > { %9611 = vmatprep.mubr.msk.bf16.mxu1 %vm11301_vm4, %v14175_v34  ;;  %9628 = vmatpush3.bf16.msra.mxu1 %v11095_v63  ;;  %v4480_v63 = vpack.c.bf16 %v12889_v26, %v14243_v27  ;;  %v3426_v56 = vld [vmem:[#allocation2 + $0x77] sm:$0xff] }
 0x1ef   : > { %9629 = vmatprep.subr.bf16.mxu1 %v14175_v34  ;;  %9404 = vmatpush3.bf16.msra.mxu0 %v11099_v54  ;;  %v14244_v54 = vpack.c.bf16 %v12076_v28, %v12074_v49  ;;  %v11104_v49 = vld [vmem:[%s14066_s3 + $0xe0] sm:$0xff]   ;;  %v14245_v28 = vpack.c.bf16 %v14218_v40, %v12127_v21  ;;  %v11105_v21 = vld [vmem:[%s14066_s3 + $0xe8] sm:$0xff]  }
 0x1f0   : > { %9405 = vmatprep.subr.bf16.mxu0 %v14175_v34 }
 0x1f2   : > { %9630 = vmatpush3.bf16.msra.mxu1 %v11098_v8  ;;  %v3432_v8 = vpack.c.bf16 %v3423_v33, %v3422_v35  ;;  %v3429_v33 = vld [vmem:[#allocation2 + $0x8f] sm:$0xff]  ;;  %v3428_v35 = vld [vmem:[#allocation2 + $0x87] sm:$0xff] }
 0x1f3   : > { %9406 = vmatpush3.bf16.msra.mxu0 %v11100_v24  ;;  %9651 = vmatprep.subr.bf16.mxu1 %v14175_v34  ;;  %v11102_v24 = vld [vmem:[%s14066_s3 + $0xc8] sm:$0xff]  }
 0x1f4   : > { %9388 = vmatmul.mubr.msk.bf16.gmra.mrb[88].mxu0 %vm277_vm2, %v14239_v57  ;;  %9427 = vmatprep.subr.bf16.mxu0 %v14175_v34  ;;  %v11103_v57 = vld [vmem:[%s14066_s3 + $0xd0] sm:$0xff]  }
 0x1f5   : > { %9612 = vmatmul.mubr.msk.bf16.gmra.mrb[88].mxu1 %vm277_vm2, %v4478_v46  ;;  %9391 = vmatprep.mubr.msk.bf16.mxu0 %vm11301_vm4, %v14175_v34  ;;  %v3425_v46 = vld [vmem:[#allocation2 + $0x6f] sm:$0xff] }
 0x1f6   : > { %9615 = vmatprep.mubr.msk.bf16.mxu1 %vm11301_vm4, %v14175_v34  ;;  %v3433_v40 = vpack.c.bf16 %v3425_v46, %v3424_v25  ;;  %v12965_v25 = vld [vmem:[#allocation2 + $0xc9] sm:$0xff] }
 0x1fc   : > { %9392 = vmatmul.mubr.msk.bf16.gmra.mrb[92].mxu0 %vm277_vm2, %v14242_v42  ;;  %v3427_v42 = vld [vmem:[#allocation2 + $0x7f] sm:$0xff] }
 0x1fd   : > { %9616 = vmatmul.mubr.msk.bf16.gmra.mrb[92].mxu1 %vm277_vm2, %v4479_v62  ;;  %9395 = vmatprep.mubr.msk.bf16.mxu0 %vm11301_vm4, %v14175_v34  ;;  %v11106_v62 = vld [vmem:[%s14066_s3 + $0xd8] sm:$0xff]   ;;  %v3434_v27 = vpack.c.bf16 %v3427_v42, %v3426_v56  ;;  %v11110_v56 = vld [vmem:[%s14066_s3 + $0xe8] sm:$0xff]  }
 0x1fe   : > { %9619 = vmatprep.mubr.msk.bf16.mxu1 %vm11301_vm4, %v14175_v34 }
 0x204   : > { %9396 = vmatmul.mubr.msk.bf16.gmra.mrb[96].mxu0 %vm277_vm2, %v14244_v54 }
 0x205   : > { %9620 = vmatmul.mubr.msk.bf16.gmra.mrb[96].mxu1 %vm277_vm2, %v4480_v63  ;;  %9407 = vmatprep.mubr.msk.bf16.mxu0 %vm11301_vm4, %v14175_v34  ;;  %v11202_v63 = vld [vmem:[#allocation2 + $0xa9] sm:$0xff] }
 0x206   : > { %9631 = vmatprep.mubr.msk.bf16.mxu1 %vm11301_vm4, %v14175_v34  ;;  %v4623_v54 = vpack.c.bf16 %v11202_v63, %v12705_v59  ;;  %v11203_v59 = vld [vmem:[#allocation2 + $0xb1] sm:$0xff]  ;;  %v14251_v63 = vld [vmem:[#allocation14_spill] sm:$0xff] }
 0x20c   : > { %9408 = vmatmul.mubr.msk.bf16.vlgmr.msra.gmra.mrb[80].mxu0 %vm277_vm2, %v3432_v8  ;;  %v11204_v8 = vld [vmem:[#allocation2 + $0xb9] sm:$0xff] }
 0x20d   : > { %9632 = vmatmul.mubr.msk.bf16.vlgmr.msra.gmra.mrb[80].mxu1 %vm277_vm2, %v14245_v28  ;;  %9411 = vmatprep.mubr.msk.bf16.mxu0 %vm11301_vm4, %v14175_v34  ;;  %v3430_v28 = vld [vmem:[#allocation2 + $0x97] sm:$0xff] }
 0x20e   : > { %9652 = vmatpush3.bf16.msra.mxu1 %v11101_v32  ;;  %9635 = vmatprep.mubr.msk.bf16.mxu1 %vm11301_vm4, %v14175_v34  ;;  %v3435_v32 = vpack.c.bf16 %v3429_v33, %v3428_v35  ;;  %v14254_v35 = vpack.c.bf16 %v14231_v7, %v14229_v10  ;;  %v11116_v10 = vld [vmem:[%s14066_s3 + $0x118] sm:$0xff]  }
 0x20f   : > { %9653 = vmatprep.subr.bf16.mxu1 %v14175_v34  ;;  %9428 = vmatpush3.bf16.msra.mxu0 %v11104_v49  ;;  %v4624_v49 = vpack.c.bf16 %v11204_v8, %v11203_v59  ;;  %v3572_v59 = vld [vmem:[#allocation2 + $0x80] sm:$0xff]  ;;  %v3571_v7 = vld [vmem:[#allocation2 + $0x78] sm:$0xff] }
 0x210   : > { %9429 = vmatprep.subr.bf16.mxu0 %v14175_v34  ;;  %v3579_v8 = vpack.c.bf16 %v3572_v59, %v3571_v7  ;;  %v11123_v59 = vld [vmem:[%s14066_s3 + $0x30] sm:$0xff]   ;;  %v11122_v7 = vld [vmem:[%s14066_s3 + $0x118] sm:$0xff]  }
 0x212   : > { %9654 = vmatpush3.bf16.msra.mxu1 %v11102_v24  ;;  %v3431_v24 = vld [vmem:[#allocation2 + $0x9f] sm:$0xff] }
 0x213   : > { %9655 = vmatprep.subr.bf16.mxu1 %v14175_v34  ;;  %9430 = vmatpush3.bf16.msra.mxu0 %v11105_v21  ;;  %v3436_v46 = vpack.c.bf16 %v3431_v24, %v3430_v28  ;;  %v11205_v21 = vld [vmem:[#allocation2 + $0xc1] sm:$0xff] }
 0x214   : > { %9412 = vmatmul.mubr.msk.bf16.gmra.mrb[84].mxu0 %vm277_vm2, %v3433_v40  ;;  %9431 = vmatprep.subr.bf16.mxu0 %v14175_v34  ;;  %v4625_v40 = vpack.c.bf16 %v12965_v25, %v11205_v21  ;;  %v3573_v24 = vld [vmem:[#allocation2 + $0x88] sm:$0xff]  ;;  %v14257_v21 = vld [vmem:[#allocation40_spill] sm:$0xff] }
 0x215   : > { %9636 = vmatmul.mubr.msk.bf16.gmra.mrb[84].mxu1 %vm277_vm2, %v14246_v23  ;;  %9415 = vmatprep.mubr.msk.bf16.mxu0 %vm11301_vm4, %v14175_v34  ;;  %v14247_v23 = vld [vmem:[#allocation12_spill] sm:$0xff] }
 0x216   : > { %9639 = vmatprep.mubr.msk.bf16.mxu1 %vm11301_vm4, %v14175_v34  ;;  %9656 = vmatpush3.bf16.msra.mxu1 %v11103_v57  ;;  %v11109_v57 = vld [vmem:[%s14066_s3 + $0xe0] sm:$0xff]  }
 0x217   : > { %9657 = vmatprep.subr.bf16.mxu1 %v14175_v34  ;;  %9432 = vmatpush3.bf16.msra.mxu0 %v11107_v13  ;;  %v11112_v13 = vld [vmem:[%s14066_s3 + $0x100] sm:$0xff]  }
 0x218   : > { %9433 = vmatprep.subr.bf16.mxu0 %v14175_v34 }
 0x21a   : > { %9658 = vmatpush3.bf16.msra.mxu1 %v11106_v62  ;;  %v14248_v62 = vld [vmem:[#allocation11_spill] sm:$0xff] }
 0x21b   : > { %9434 = vmatpush3.bf16.msra.mxu0 %v11108_v29  ;;  %9679 = vmatprep.subr.bf16.mxu1 %v14175_v34  ;;  %v14249_v42 = vpack.c.bf16 %v14247_v23, %v14248_v62  ;;  %v14250_v29 = vpack.c.bf16 %v14228_v58, %v14227_v5  ;;  %v11113_v5 = vld [vmem:[%s14066_s3 + $0x108] sm:$0xff]   ;;  %v11111_v58 = vld [vmem:[%s14066_s3 + $0xf0] sm:$0xff]   ;;  %v14258_v23 = vld [vmem:[#allocation41_spill] sm:$0xff] }
 0x21c   : > { %9416 = vmatmul.mubr.msk.bf16.gmra.mrb[88].mxu0 %vm277_vm2, %v3434_v27  ;;  %9455 = vmatprep.subr.bf16.mxu0 %v14175_v34  ;;  %v11115_v27 = vld [vmem:[%s14066_s3 + $0x110] sm:$0xff]  }
 0x21d   : > { %9640 = vmatmul.mubr.msk.bf16.gmra.mrb[88].mxu1 %vm277_vm2, %v4623_v54  ;;  %9419 = vmatprep.mubr.msk.bf16.mxu0 %vm11301_vm4, %v14175_v34  ;;  %v14252_v54 = vld [vmem:[#allocation13_spill] sm:$0xff] }
 0x21e   : > { %9643 = vmatprep.mubr.msk.bf16.mxu1 %vm11301_vm4, %v14175_v34  ;;  %v14253_v33 = vpack.c.bf16 %v14251_v63, %v14252_v54  ;;  %v3714_v63 = vld [vmem:[#allocation2 + $0x69] sm:$0xff]  ;;  %v3715_v54 = vld [vmem:[#allocation2 + $0x71] sm:$0xff] }
 0x224   : > { %9420 = vmatmul.mubr.msk.bf16.gmra.mrb[92].mxu0 %vm277_vm2, %v3435_v32  ;;  %v11114_v32 = vld [vmem:[%s14066_s3 + $0xf8] sm:$0xff]  }
 0x225   : > { %9644 = vmatmul.mubr.msk.bf16.gmra.mrb[92].mxu1 %vm277_vm2, %v4624_v49  ;;  %9423 = vmatprep.mubr.msk.bf16.mxu0 %vm11301_vm4, %v14175_v34  ;;  %v14255_v49 = vld [vmem:[#allocation35_spill] sm:$0xff] }
 0x226   : > { %9647 = vmatprep.mubr.msk.bf16.mxu1 %vm11301_vm4, %v14175_v34  ;;  %v4768_v28 = vpack.c.bf16 %v14255_v49, %v12797_v6  ;;  %v14256_v6 = vld [vmem:[#allocation36_spill] sm:$0xff] }
 0x227   : > { %v14270_v37 = vpack.c.bf16 %v14256_v6, %v14255_v49  ;;  %v11151_v49 = vld [vmem:[%s14066_s3 + $0x70] sm:$0xff]  }
 0x22c   : > { %9424 = vmatmul.mubr.msk.bf16.gmra.mrb[96].mxu0 %vm277_vm2, %v3436_v46  ;;  %v3580_v46 = vpack.c.bf16 %v12830_v22, %v3573_v24  ;;  %v3716_v24 = vld [vmem:[#allocation2 + $0x79] sm:$0xff] }
 0x22d   : > { %9648 = vmatmul.mubr.msk.bf16.gmra.mrb[96].mxu1 %vm277_vm2, %v4625_v40  ;;  %9435 = vmatprep.mubr.msk.bf16.mxu0 %vm11301_vm4, %v14175_v34  ;;  %v13041_v40 = vpack.c.bf16 %v14257_v21, %v14256_v6  ;;  %v11155_v6 = vld [vmem:[%s14066_s3 + $0x90] sm:$0xff]  }
 0x22e   : > { %9659 = vmatprep.mubr.msk.bf16.mxu1 %vm11301_vm4, %v14175_v34 }
 0x234   : > { %9436 = vmatmul.mubr.msk.bf16.vlgmr.msra.gmra.mrb[80].mxu0 %vm277_vm2, %v14249_v42  ;;  %v3713_v42 = vld [vmem:[#allocation2 + $0x61] sm:$0xff] }
 0x235   : > { %9660 = vmatmul.mubr.msk.bf16.vlgmr.msra.gmra.mrb[80].mxu1 %vm277_vm2, %v14250_v29  ;;  %9439 = vmatprep.mubr.msk.bf16.mxu0 %vm11301_vm4, %v14175_v34  ;;  %v3712_v29 = vld [vmem:[#allocation2 + $0x59] sm:$0xff] }
 0x236   : > { %9680 = vmatpush3.bf16.msra.mxu1 %v11109_v57  ;;  %9663 = vmatprep.mubr.msk.bf16.mxu1 %vm11301_vm4, %v14175_v34  ;;  %v13050_v57 = vld [vmem:[#allocation2 + $0xef] sm:$0xff] }
 0x237   : > { %9681 = vmatprep.subr.bf16.mxu1 %v14175_v34  ;;  %9456 = vmatpush3.bf16.msra.mxu0 %v11112_v13  ;;  %v3575_v13 = vld [vmem:[#allocation2 + $0x98] sm:$0xff]  ;;  %v13055_v62 = vpack.c.bf16 %v13050_v57, %v14258_v23 }
 0x238   : > { %9457 = vmatprep.subr.bf16.mxu0 %v14175_v34  ;;  %v3581_v22 = vpack.c.bf16 %v12858_v43, %v3575_v13  ;;  %v11117_v43 = vld [vmem:[%s14066_s3 + $0x100] sm:$0xff]  }
 0x239   : > { %v14261_v13 = vld [vmem:[#allocation37_spill] sm:$0xff] }
 0x23a   : > { %9682 = vmatpush3.bf16.msra.mxu1 %v11110_v56  ;;  %v3722_v56 = vpack.c.bf16 %v3713_v42, %v3712_v29  ;;  %v3718_v42 = vld [vmem:[#allocation2 + $0x89] sm:$0xff]  ;;  %v3719_v29 = vld [vmem:[#allocation2 + $0x91] sm:$0xff] }
 0x23b   : > { %9683 = vmatprep.subr.bf16.mxu1 %v14175_v34  ;;  %9458 = vmatpush3.bf16.msra.mxu0 %v11113_v5  ;;  %v11120_v5 = vld [vmem:[%s14066_s3 + $0x20] sm:$0xff]  }
 0x23c   : > { %9440 = vmatmul.mubr.msk.bf16.gmra.mrb[84].mxu0 %vm277_vm2, %v14253_v33  ;;  %9459 = vmatprep.subr.bf16.mxu0 %v14175_v34  ;;  %v11121_v33 = vld [vmem:[%s14066_s3 + $0x28] sm:$0xff]  }
 0x23d   : > { %9664 = vmatmul.mubr.msk.bf16.gmra.mrb[84].mxu1 %vm277_vm2, %v14254_v35  ;;  %9443 = vmatprep.mubr.msk.bf16.mxu0 %vm11301_vm4, %v14175_v34  ;;  %v3723_v35 = vpack.c.bf16 %v3715_v54, %v3714_v63  ;;  %v3721_v63 = vld [vmem:[#allocation2 + $0xa1] sm:$0xff] }
 0x23e   : > { %9667 = vmatprep.mubr.msk.bf16.mxu1 %vm11301_vm4, %v14175_v34  ;;  %9684 = vmatpush3.bf16.msra.mxu1 %v11111_v58  ;;  %v14259_v58 = vld [vmem:[#allocation29_spill] sm:$0xff] }
 0x23f   : > { %9685 = vmatprep.subr.bf16.mxu1 %v14175_v34  ;;  %9460 = vmatpush3.bf16.msra.mxu0 %v11115_v27  ;;  %v11118_v27 = vld [vmem:[%s14066_s3 + $0x108] sm:$0xff]  }
 0x240   : > { %9461 = vmatprep.subr.bf16.mxu0 %v14175_v34 }
 0x242   : > { %9686 = vmatpush3.bf16.msra.mxu1 %v11114_v32  ;;  %v11119_v32 = vld [vmem:[%s14066_s3 + $0x110] sm:$0xff]  }
 0x243   : > { %9462 = vmatpush3.bf16.msra.mxu0 %v11116_v10  ;;  %9707 = vmatprep.subr.bf16.mxu1 %v14175_v34  ;;  %v14260_v10 = vld [vmem:[#allocation30_spill] sm:$0xff] }
 0x244   : > { %9444 = vmatmul.mubr.msk.bf16.gmra.mrb[88].mxu0 %vm277_vm2, %v3579_v8  ;;  %9735 = vmatprep.subr.bf16.mxu0 %v14175_v34  ;;  %v3717_v8 = vld [vmem:[#allocation2 + $0x81] sm:$0xff] }
 0x245   : > { %9668 = vmatmul.mubr.msk.bf16.gmra.mrb[88].mxu1 %vm277_vm2, %v4768_v28  ;;  %9447 = vmatprep.mubr.msk.bf16.mxu0 %vm11301_vm4, %v14175_v34  ;;  %v11124_v28 = vld [vmem:[%s14066_s3 + $0x38] sm:$0xff]  }
 0x246   : > { %9671 = vmatprep.mubr.msk.bf16.mxu1 %vm11301_vm4, %v14175_v34 }
 0x24c   : > { %9448 = vmatmul.mubr.msk.bf16.gmra.mrb[92].mxu0 %vm277_vm2, %v3580_v46  ;;  %v3724_v46 = vpack.c.bf16 %v3717_v8, %v3716_v24  ;;  %v14266_v8 = vld [vmem:[#allocation32_spill] sm:$0xff]  ;;  %v11129_v24 = vld [vmem:[%s14066_s3 + $0x8] sm:$0xff]  }
 0x24d   : > { %9672 = vmatmul.mubr.msk.bf16.gmra.mrb[92].mxu1 %vm277_vm2, %v13041_v40  ;;  %9451 = vmatprep.mubr.msk.bf16.mxu0 %vm11301_vm4, %v14175_v34 }
 0x24e   : > { %9675 = vmatprep.mubr.msk.bf16.mxu1 %vm11301_vm4, %v14175_v34 }
 0x254   : > { %9452 = vmatmul.mubr.msk.bf16.gmra.mrb[96].mxu0 %vm277_vm2, %v3581_v22  ;;  %v4913_v22 = vpack.c.bf16 %v14261_v13, %v12889_v26  ;;  %v14262_v26 = vld [vmem:[#allocation38_spill] sm:$0xff] }
 0x255   : > { %9676 = vmatmul.mubr.msk.bf16.gmra.mrb[96].mxu1 %vm277_vm2, %v13055_v62  ;;  %9463 = vmatprep.mubr.msk.bf16.mxu0 %vm11301_vm4, %v14175_v34 }
 0x256   : > { %9687 = vmatprep.mubr.msk.bf16.mxu1 %vm11301_vm4, %v14175_v34 }
 0x25c   : > { %9464 = vmatmul.mubr.msk.bf16.vlgmr.msra.gmra.mrb[80].mxu0 %vm277_vm2, %v3722_v56  ;;  %v14263_v56 = vld [vmem:[#allocation42_spill] sm:$0xff] }
 0x25d   : > { %9688 = vmatmul.mubr.msk.bf16.vlgmr.msra.gmra.mrb[80].mxu1 %vm277_vm2, %v14259_v58  ;;  %9467 = vmatprep.mubr.msk.bf16.mxu0 %vm11301_vm4, %v14175_v34 }
 0x25e   : > { %9708 = vmatpush3.bf16.msra.mxu1 %v11117_v43  ;;  %9691 = vmatprep.mubr.msk.bf16.mxu1 %vm11301_vm4, %v14175_v34  ;;  %v3725_v43 = vpack.c.bf16 %v3719_v29, %v3718_v42  ;;  %v14267_v42 = vld [vmem:[#allocation33_spill] sm:$0xff] }
 0x25f   : > { %9709 = vmatprep.subr.bf16.mxu1 %v14175_v34  ;;  %9736 = vmatpush3.bf16.msra.mxu0 %v11120_v5  ;;  %v4914_v5 = vpack.c.bf16 %v14263_v56, %v14262_v26  ;;  %v11130_v29 = vld [vmem:[%s14066_s3 + $0x38] sm:$0xff]  }
 0x260   : > { %9737 = vmatprep.subr.bf16.mxu0 %v14175_v34 }
 0x262   : > { %9710 = vmatpush3.bf16.msra.mxu1 %v11118_v27  ;;  %v3720_v27 = vld [vmem:[#allocation2 + $0x99] sm:$0xff] }
 0x263   : > { %9711 = vmatprep.subr.bf16.mxu1 %v14175_v34  ;;  %9738 = vmatpush3.bf16.msra.mxu0 %v11121_v33  ;;  %v3726_v54 = vpack.c.bf16 %v3721_v63, %v3720_v27  ;;  %v14264_v33 = vld [vmem:[#allocation39_spill] sm:$0xff]  ;;  %v11206_v63 = vld [vmem:[#allocation2 + $0xd9] sm:$0xff] }
 0x264   : > { %9468 = vmatmul.mubr.msk.bf16.gmra.mrb[84].mxu0 %vm277_vm2, %v3723_v35  ;;  %9739 = vmatprep.subr.bf16.mxu0 %v14175_v34  ;;  %v14265_v35 = vld [vmem:[#allocation43_spill] sm:$0xff] }
 0x265   : > { %9692 = vmatmul.mubr.msk.bf16.gmra.mrb[84].mxu1 %vm277_vm2, %v14260_v10  ;;  %9471 = vmatprep.mubr.msk.bf16.mxu0 %vm11301_vm4, %v14175_v34 }
 0x266   : > { %9695 = vmatprep.mubr.msk.bf16.mxu1 %vm11301_vm4, %v14175_v34  ;;  %9712 = vmatpush3.bf16.msra.mxu1 %v11119_v32  ;;  %v4915_v32 = vpack.c.bf16 %v14265_v35, %v14264_v33 }
 0x267   : > { %9713 = vmatprep.subr.bf16.mxu1 %v14175_v34  ;;  %9740 = vmatpush3.bf16.msra.mxu0 %v11123_v59  ;;  %v11125_v59 = vld [vmem:[%s14066_s3 + $0x20] sm:$0xff]  }
 0x268   : > { %9741 = vmatprep.subr.bf16.mxu0 %v14175_v34 }
 0x26a   : > { %9714 = vmatpush3.bf16.msra.mxu1 %v11122_v7  ;;  %v11128_v7 = vld [vmem:[%s14066_s3] sm:$0xff]  }
 0x26b   : > { %9742 = vmatpush3.bf16.msra.mxu0 %v11124_v28  ;;  %9987 = vmatprep.subr.bf16.mxu1 %v14175_v34  ;;  %v11126_v28 = vld [vmem:[%s14066_s3 + $0x28] sm:$0xff]  }
 0x26c   : > { %9472 = vmatmul.mubr.msk.bf16.gmra.mrb[88].mxu0 %vm277_vm2, %v3724_v46  ;;  %9763 = vmatprep.subr.bf16.mxu0 %v14175_v34  ;;  %v11131_v46 = vld [vmem:[%s14066_s3 + $0x10] sm:$0xff]  }
 0x26d   : > { %9696 = vmatmul.mubr.msk.bf16.gmra.mrb[88].mxu1 %vm277_vm2, %v4913_v22  ;;  %9475 = vmatprep.mubr.msk.bf16.mxu0 %vm11301_vm4, %v14175_v34 }
 0x26e   : > { %9699 = vmatprep.mubr.msk.bf16.mxu1 %vm11301_vm4, %v14175_v34 }
 0x274   : > { %9476 = vmatmul.mubr.msk.bf16.gmra.mrb[92].mxu0 %vm277_vm2, %v3725_v43  ;;  %v14268_v43 = vld [vmem:[#allocation52_spill] sm:$0xff] }
 0x275   : > { %9700 = vmatmul.mubr.msk.bf16.gmra.mrb[92].mxu1 %vm277_vm2, %v4914_v5  ;;  %9479 = vmatprep.mubr.msk.bf16.mxu0 %vm11301_vm4, %v14175_v34  ;;  %v13182_v27 = vpack.c.bf16 %v14268_v43, %v12965_v25  ;;  %v11207_v25 = vld [vmem:[#allocation2 + $0xe1] sm:$0xff] }
 0x276   : > { %9703 = vmatprep.mubr.msk.bf16.mxu1 %vm11301_vm4, %v14175_v34 }
 0x27c   : > { %9480 = vmatmul.mubr.msk.bf16.gmra.mrb[96].mxu0 %vm277_vm2, %v3726_v54  ;;  %v13193_v54 = vpack.c.bf16 %v11207_v25, %v11206_v63  ;;  %v11134_v63 = vld [vmem:[%s14066_s3 + $0x8] sm:$0xff]   ;;  %v5236_v25 = vld [vmem:[#allocation2 + $0xb7] sm:$0xff] }
 0x27d   : > { %9704 = vmatmul.mubr.msk.bf16.gmra.mrb[96].mxu1 %vm277_vm2, %v4915_v32  ;;  %9743 = vmatprep.mubr.msk.bf16.mxu0 %vm11301_vm4, %v14175_v34 }
 0x27e   : > { %9715 = vmatprep.mubr.msk.bf16.mxu1 %vm11301_vm4, %v14175_v34 }
 0x284   : > { %9744 = vmatmul.mubr.msk.bf16.vlgmr.msra.gmra.mrb[100].mxu0 %vm277_vm2, %v14259_v58  ;;  %v11127_v58 = vld [vmem:[%s14066_s3 + $0x30] sm:$0xff]  }
 0x285   : > { %9716 = vmatmul.mubr.msk.bf16.vlgmr.msra.gmra.mrb[80].mxu1 %vm277_vm2, %v14266_v8  ;;  %9747 = vmatprep.mubr.msk.bf16.mxu0 %vm11301_vm4, %v14175_v34 }
 0x286   : > { %9988 = vmatpush3.bf16.msra.mxu1 %v11125_v59  ;;  %9719 = vmatprep.mubr.msk.bf16.mxu1 %vm11301_vm4, %v14175_v34  ;;  %v14269_v59 = vld [vmem:[#allocation55_spill] sm:$0xff] }
 0x287   : > { %9989 = vmatprep.subr.bf16.mxu1 %v14175_v34  ;;  %9764 = vmatpush3.bf16.msra.mxu0 %v11128_v7 }
 0x288   : > { %9765 = vmatprep.subr.bf16.mxu0 %v14175_v34 }
 0x28a   : > { %9990 = vmatpush3.bf16.msra.mxu1 %v11126_v28  ;;  %v5235_v28 = vld [vmem:[#allocation2 + $0xaf] sm:$0xff] }
 0x28b   : > { %9991 = vmatprep.subr.bf16.mxu1 %v14175_v34  ;;  %9766 = vmatpush3.bf16.msra.mxu0 %v11129_v24  ;;  %v11133_v24 = vld [vmem:[%s14066_s3] sm:$0xff]  }
 0x28c   : > { %9748 = vmatmul.mubr.msk.bf16.gmra.mrb[104].mxu0 %vm277_vm2, %v14260_v10  ;;  %9767 = vmatprep.subr.bf16.mxu0 %v14175_v34  ;;  %v11132_v10 = vld [vmem:[%s14066_s3 + $0x18] sm:$0xff]  }
 0x28d   : > { %9720 = vmatmul.mubr.msk.bf16.gmra.mrb[84].mxu1 %vm277_vm2, %v14267_v42  ;;  %9751 = vmatprep.mubr.msk.bf16.mxu0 %vm11301_vm4, %v14175_v34 }
 0x28e   : > { %9723 = vmatprep.mubr.msk.bf16.mxu1 %vm11301_vm4, %v14175_v34  ;;  %9992 = vmatpush3.bf16.msra.mxu1 %v11127_v58 }
 0x28f   : > { %9993 = vmatprep.subr.bf16.mxu1 %v14175_v34  ;;  %9768 = vmatpush3.bf16.msra.mxu0 %v11131_v46  ;;  %v11209_v46 = vld [vmem:[#allocation2 + $0xf8] sm:$0xff] }
 0x290   : > { %9769 = vmatprep.subr.bf16.mxu0 %v14175_v34 }
 0x292   : > { %9994 = vmatpush3.bf16.msra.mxu1 %v11130_v29  ;;  %v11210_v29 = vld [vmem:[#allocation2 + $0x100] sm:$0xff] }
 0x293   : > { %9770 = vmatpush3.bf16.msra.mxu0 %v11132_v10  ;;  %10015 = vmatprep.subr.bf16.mxu1 %v14175_v34  ;;  %v6595_v10 = vpack.c.bf16 %v11210_v29, %v11209_v46  ;;  %v11135_v29 = vld [vmem:[%s14066_s3 + $0x10] sm:$0xff]  }
 0x294   : > { %9752 = vmatmul.mubr.msk.bf16.gmra.mrb[108].mxu0 %vm277_vm2, %v4913_v22  ;;  %9791 = vmatprep.subr.bf16.mxu0 %v14175_v34  ;;  %v11208_v22 = vld [vmem:[#allocation2 + $0xe9] sm:$0xff] }
 0x295   : > { %9724 = vmatmul.mubr.msk.bf16.gmra.mrb[88].mxu1 %vm277_vm2, %v13182_v27  ;;  %9755 = vmatprep.mubr.msk.bf16.mxu0 %vm11301_vm4, %v14175_v34  ;;  %v13203_v7 = vpack.c.bf16 %v14269_v59, %v11208_v22  ;;  %v5237_v22 = vld [vmem:[#allocation2 + $0xbf] sm:$0xff] }
 0x296   : > { %9727 = vmatprep.mubr.msk.bf16.mxu1 %vm11301_vm4, %v14175_v34 }
 0x29c   : > { %9756 = vmatmul.mubr.msk.bf16.gmra.mrb[112].mxu0 %vm277_vm2, %v4914_v5  ;;  %v5234_v5 = vld [vmem:[#allocation2 + $0xa7] sm:$0xff] }
 0x29d   : > { %9728 = vmatmul.mubr.msk.bf16.gmra.mrb[92].mxu1 %vm277_vm2, %v13193_v54  ;;  %9759 = vmatprep.mubr.msk.bf16.mxu0 %vm11301_vm4, %v14175_v34  ;;  %v5244_v58 = vpack.c.bf16 %v5235_v28, %v5234_v5  ;;  %v11137_v5 = vld [vmem:[%s14066_s3 + $0x48] sm:$0xff]   ;;  %v5245_v28 = vpack.c.bf16 %v5237_v22, %v5236_v25  ;;  %v11140_v25 = vld [vmem:[%s14066_s3 + $0x58] sm:$0xff]  }
 0x29e   : > { %9731 = vmatprep.mubr.msk.bf16.mxu1 %vm11301_vm4, %v14175_v34  ;;  %v11213_v22 = vld [vmem:[#allocation2 + $0xcf] sm:$0xff] }
 0x2a4   : > { %9760 = vmatmul.mubr.msk.bf16.gmra.mrb[116].mxu0 %vm277_vm2, %v4915_v32  ;;  %v11136_v32 = vld [vmem:[%s14066_s3 + $0x40] sm:$0xff]  }
 0x2a5   : > { %9732 = vmatmul.mubr.msk.bf16.gmra.mrb[96].mxu1 %vm277_vm2, %v13203_v7  ;;  %9771 = vmatprep.mubr.msk.bf16.mxu0 %vm11301_vm4, %v14175_v34 }
 0x2a6   : > { %9995 = vmatprep.mubr.msk.bf16.mxu1 %vm11301_vm4, %v14175_v34 }
 0x2ac   : > { %9772 = vmatmul.mubr.msk.bf16.vlgmr.msra.gmra.mrb[100].mxu0 %vm277_vm2, %v5244_v58  ;;  %v11212_v58 = vld [vmem:[#allocation2 + $0x108] sm:$0xff] }
 0x2ad   : > { %9996 = vmatmul.mubr.msk.bf16.vlgmr.msra.gmra.mrb[100].mxu1 %vm277_vm2, %v6595_v10  ;;  %9775 = vmatprep.mubr.msk.bf16.mxu0 %vm11301_vm4, %v14175_v34  ;;  %v11139_v10 = vld [vmem:[%s14066_s3 + $0x50] sm:$0xff]  }
 0x2ae   : > { %10016 = vmatpush3.bf16.msra.mxu1 %v11133_v24  ;;  %9999 = vmatprep.mubr.msk.bf16.mxu1 %vm11301_vm4, %v14175_v34  ;;  %v11211_v24 = vld [vmem:[#allocation2 + $0x110] sm:$0xff] }
 0x2af   : > { %10017 = vmatprep.subr.bf16.mxu1 %v14175_v34  ;;  %9792 = vmatpush3.bf16.msra.mxu0 %v11136_v32  ;;  %v6596_v46 = vpack.c.bf16 %v11211_v24, %v11212_v58  ;;  %v11138_v32 = vld [vmem:[%s14066_s3 + $0x18] sm:$0xff]   ;;  %v6598_v58 = vpack.c.bf16 %v12653_v18, %v12647_v16 }
 0x2b0   : > { %9793 = vmatprep.subr.bf16.mxu0 %v14175_v34 }
 0x2b2   : > { %10018 = vmatpush3.bf16.msra.mxu1 %v11134_v63  ;;  %v5238_v63 = vld [vmem:[#allocation2 + $0xc7] sm:$0xff] }
 0x2b3   : > { %10019 = vmatprep.subr.bf16.mxu1 %v14175_v34  ;;  %9794 = vmatpush3.bf16.msra.mxu0 %v11137_v5  ;;  %v5246_v5 = vpack.c.bf16 %v11213_v22, %v5238_v63  ;;  %v13309_v22 = vld [vmem:[#allocation2 + $0x107] sm:$0xff] }
 0x2b4   : > { %9776 = vmatmul.mubr.msk.bf16.gmra.mrb[104].mxu0 %vm277_vm2, %v5245_v28  ;;  %9795 = vmatprep.subr.bf16.mxu0 %v14175_v34  ;;  %v11214_v28 = vld [vmem:[#allocation2 + $0x118] sm:$0xff] }
 0x2b5   : > { %10000 = vmatmul.mubr.msk.bf16.gmra.mrb[104].mxu1 %vm277_vm2, %v6596_v46  ;;  %9779 = vmatprep.mubr.msk.bf16.mxu0 %vm11301_vm4, %v14175_v34  ;;  %v6597_v24 = vpack.c.bf16 %v12645_v4, %v11214_v28  ;;  %v13272_v46 = vld [vmem:[#allocation2 + $0x140] sm:$0xff]  ;;  %v11169_v4 = vld [vmem:[%s14066_s3 + $0xc8] sm:$0xff]  }
 0x2b6   : > { %10003 = vmatprep.mubr.msk.bf16.mxu1 %vm11301_vm4, %v14175_v34  ;;  %10020 = vmatpush3.bf16.msra.mxu1 %v11135_v29  ;;  %v6599_v29 = vpack.c.bf16 %v13272_v46, %v12649_v60  ;;  %v11172_v60 = vld [vmem:[%s14066_s3 + $0xd8] sm:$0xff]  }
 0x2b7   : > { %10021 = vmatprep.subr.bf16.mxu1 %v14175_v34  ;;  %9796 = vmatpush3.bf16.msra.mxu0 %v11139_v10  ;;  %v13285_v10 = vld [vmem:[#allocation2 + $0xf7] sm:$0xff] }
 0x2b8   : > { %9797 = vmatprep.subr.bf16.mxu0 %v14175_v34 }
 0x2ba   : > { %10022 = vmatpush3.bf16.msra.mxu1 %v11138_v32  ;;  %v11141_v32 = vld [vmem:[%s14066_s3 + $0x40] sm:$0xff]  }
 0x2bb   : > { %9798 = vmatpush3.bf16.msra.mxu0 %v11140_v25  ;;  %10043 = vmatprep.subr.bf16.mxu1 %v14175_v34  ;;  %v11142_v25 = vld [vmem:[%s14066_s3 + $0x48] sm:$0xff]  }
 0x2bc   : > { %9780 = vmatmul.mubr.msk.bf16.gmra.mrb[108].mxu0 %vm277_vm2, %v5246_v5  ;;  %9819 = vmatprep.subr.bf16.mxu0 %v14175_v34  ;;  %v13311_v5 = vld [vmem:[#allocation2 + $0x10f] sm:$0xff] }
 0x2bd   : > { %10004 = vmatmul.mubr.msk.bf16.gmra.mrb[108].mxu1 %vm277_vm2, %v6597_v24  ;;  %9783 = vmatprep.mubr.msk.bf16.mxu0 %vm11301_vm4, %v14175_v34  ;;  %v13319_v28 = vpack.c.bf16 %v13311_v5, %v13309_v22  ;;  %v11143_v24 = vld [vmem:[%s14066_s3 + $0x50] sm:$0xff]  }
 0x2be   : > { %10007 = vmatprep.mubr.msk.bf16.mxu1 %vm11301_vm4, %v14175_v34 }
 0x2c4   : > { %9784 = vmatmul.mubr.msk.bf16.gmra.mrb[112].mxu0 %vm277_vm2, %v13041_v40  ;;  %v13283_v40 = vld [vmem:[#allocation2 + $0xff] sm:$0xff] }
 0x2c5   : > { %10008 = vmatmul.mubr.msk.bf16.gmra.mrb[112].mxu1 %vm277_vm2, %v6598_v58  ;;  %9787 = vmatprep.mubr.msk.bf16.mxu0 %vm11301_vm4, %v14175_v34  ;;  %v13292_v63 = vpack.c.bf16 %v13283_v40, %v13285_v10  ;;  %v11147_v58 = vld [vmem:[%s14066_s3 + $0x70] sm:$0xff]  }
 0x2c6   : > { %10011 = vmatprep.mubr.msk.bf16.mxu1 %vm11301_vm4, %v14175_v34 }
 0x2cc   : > { %9788 = vmatmul.mubr.msk.bf16.gmra.mrb[116].mxu0 %vm277_vm2, %v13055_v62  ;;  %v11144_v62 = vld [vmem:[%s14066_s3 + $0x60] sm:$0xff]  }
 0x2cd   : > { %10012 = vmatmul.mubr.msk.bf16.gmra.mrb[116].mxu1 %vm277_vm2, %v6599_v29  ;;  %9799 = vmatprep.mubr.msk.bf16.mxu0 %vm11301_vm4, %v14175_v34  ;;  %v11146_v29 = vld [vmem:[%s14066_s3 + $0x58] sm:$0xff]  }
 0x2ce   : > { %10023 = vmatprep.mubr.msk.bf16.mxu1 %vm11301_vm4, %v14175_v34 }
 0x2d4   : > { %9800 = vmatmul.mubr.msk.bf16.vlgmr.msra.gmra.mrb[100].mxu0 %vm277_vm2, %v14266_v8  ;;  %v11145_v8 = vld [vmem:[%s14066_s3 + $0x68] sm:$0xff]  }
 0x2d5   : > { %10024 = vmatmul.mubr.msk.bf16.vlgmr.msra.gmra.mrb[100].mxu1 %vm277_vm2, %v13292_v63  ;;  %9803 = vmatprep.mubr.msk.bf16.mxu0 %vm11301_vm4, %v14175_v34 }
 0x2d6   : > { %10044 = vmatpush3.bf16.msra.mxu1 %v11141_v32  ;;  %10027 = vmatprep.mubr.msk.bf16.mxu1 %vm11301_vm4, %v14175_v34  ;;  %v13340_v32 = vld [vmem:[#allocation2 + $0x117] sm:$0xff] }
 0x2d7   : > { %10045 = vmatprep.subr.bf16.mxu1 %v14175_v34  ;;  %9820 = vmatpush3.bf16.msra.mxu0 %v11144_v62  ;;  %v13342_v62 = vld [vmem:[#allocation2 + $0x11f] sm:$0xff] }
 0x2d8   : > { %9821 = vmatprep.subr.bf16.mxu0 %v14175_v34 }
 0x2da   : > { %10046 = vmatpush3.bf16.msra.mxu1 %v11142_v25  ;;  %v13351_v25 = vpack.c.bf16 %v13342_v62, %v13340_v32 }
 0x2db   : > { %10047 = vmatprep.subr.bf16.mxu1 %v14175_v34  ;;  %9822 = vmatpush3.bf16.msra.mxu0 %v11145_v8  ;;  %v13363_v8 = vld [vmem:[#allocation2 + $0x127] sm:$0xff] }
 0x2dc   : > { %9804 = vmatmul.mubr.msk.bf16.gmra.mrb[104].mxu0 %vm277_vm2, %v14267_v42  ;;  %9823 = vmatprep.subr.bf16.mxu0 %v14175_v34  ;;  %v11148_v42 = vld [vmem:[%s14066_s3 + $0x78] sm:$0xff]  }
 0x2dd   : > { %10028 = vmatmul.mubr.msk.bf16.gmra.mrb[104].mxu1 %vm277_vm2, %v13319_v28  ;;  %9807 = vmatprep.mubr.msk.bf16.mxu0 %vm11301_vm4, %v14175_v34 }
 0x2de   : > { %10031 = vmatprep.mubr.msk.bf16.mxu1 %vm11301_vm4, %v14175_v34  ;;  %10048 = vmatpush3.bf16.msra.mxu1 %v11143_v24  ;;  %v13365_v24 = vld [vmem:[#allocation2 + $0x12f] sm:$0xff] }
 0x2df   : > { %10049 = vmatprep.subr.bf16.mxu1 %v14175_v34  ;;  %9824 = vmatpush3.bf16.msra.mxu0 %v11147_v58  ;;  %v13369_v58 = vpack.c.bf16 %v13365_v24, %v13363_v8 }
 0x2e0   : > { %9825 = vmatprep.subr.bf16.mxu0 %v14175_v34 }
 0x2e2   : > { %10050 = vmatpush3.bf16.msra.mxu1 %v11146_v29  ;;  %v13381_v29 = vld [vmem:[#allocation2 + $0x13f] sm:$0xff] }
 0x2e3   : > { %9826 = vmatpush3.bf16.msra.mxu0 %v11148_v42  ;;  %10071 = vmatprep.subr.bf16.mxu1 %v14175_v34 }
 0x2e4   : > { %9808 = vmatmul.mubr.msk.bf16.gmra.mrb[108].mxu0 %vm277_vm2, %v13182_v27  ;;  %9847 = vmatprep.subr.bf16.mxu0 %v14175_v34  ;;  %v13379_v27 = vld [vmem:[#allocation2 + $0x137] sm:$0xff] }
 0x2e5   : > { %10032 = vmatmul.mubr.msk.bf16.gmra.mrb[108].mxu1 %vm277_vm2, %v13351_v25  ;;  %9811 = vmatprep.mubr.msk.bf16.mxu0 %vm11301_vm4, %v14175_v34  ;;  %v13385_v42 = vpack.c.bf16 %v13381_v29, %v13379_v27 }
 0x2e6   : > { %10035 = vmatprep.mubr.msk.bf16.mxu1 %vm11301_vm4, %v14175_v34 }
 0x2ec   : > { %9812 = vmatmul.mubr.msk.bf16.gmra.mrb[112].mxu0 %vm277_vm2, %v13193_v54  ;;  %v11149_v54 = vld [vmem:[%s14066_s3 + $0x60] sm:$0xff]  }
 0x2ed   : > { %10036 = vmatmul.mubr.msk.bf16.gmra.mrb[112].mxu1 %vm277_vm2, %v13369_v58  ;;  %9815 = vmatprep.mubr.msk.bf16.mxu0 %vm11301_vm4, %v14175_v34 }
 0x2ee   : > { %10039 = vmatprep.mubr.msk.bf16.mxu1 %vm11301_vm4, %v14175_v34 }
 0x2f4   : > { %9816 = vmatmul.mubr.msk.bf16.gmra.mrb[116].mxu0 %vm277_vm2, %v13203_v7  ;;  %v11152_v7 = vld [vmem:[%s14066_s3 + $0x80] sm:$0xff]  }
 0x2f5   : > { %10040 = vmatmul.mubr.msk.bf16.gmra.mrb[116].mxu1 %vm277_vm2, %v13385_v42  ;;  %9827 = vmatprep.mubr.msk.bf16.mxu0 %vm11301_vm4, %v14175_v34 }
 0x2f6   : > { %10051 = vmatprep.mubr.msk.bf16.mxu1 %vm11301_vm4, %v14175_v34 }
 0x2fc   : > { %9828 = vmatmul.mubr.msk.bf16.vlgmr.msra.gmra.mrb[100].mxu0 %vm277_vm2, %v14270_v37  ;;  %v11153_v37 = vld [vmem:[%s14066_s3 + $0x88] sm:$0xff]  }
 0x2fd   : > { %10052 = vmatmul.mubr.msk.bf16.vlgmr.msra.gmra.mrb[100].mxu1 %vm277_vm2, %v6842_v0  ;;  %9831 = vmatprep.mubr.msk.bf16.mxu0 %vm11301_vm4, %v14175_v34  ;;  %v11217_v0 = vld [vmem:[#allocation2 + $0x109] sm:$0xff] }
 0x2fe   : > { %10072 = vmatpush3.bf16.msra.mxu1 %v11149_v54  ;;  %10055 = vmatprep.mubr.msk.bf16.mxu1 %vm11301_vm4, %v14175_v34  ;;  %v6843_v11 = vpack.c.bf16 %v11218_v19, %v11217_v0  ;;  %v14271_v54 = vpack.c.bf16 %v14258_v23, %v14257_v21  ;;  %v11156_v21 = vld [vmem:[%s14066_s3 + $0x98] sm:$0xff]   ;;  %v5661_v23 = vpack.c.bf16 %v13285_v10, %v13050_v57  ;;  %v11221_v10 = vld [vmem:[#allocation2 + $0x129] sm:$0xff] }
 0x2ff   : > { %10073 = vmatprep.subr.bf16.mxu1 %v14175_v34  ;;  %9848 = vmatpush3.bf16.msra.mxu0 %v11152_v7  ;;  %v11219_v7 = vld [vmem:[#allocation2 + $0x119] sm:$0xff]  ;;  %v5662_v57 = vpack.c.bf16 %v13309_v22, %v13283_v40  ;;  %v11222_v19 = vld [vmem:[#allocation2 + $0x131] sm:$0xff]  ;;  %v5663_v40 = vpack.c.bf16 %v13340_v32, %v13311_v5  ;;  %v6987_v5 = vpack.c.bf16 %v13363_v8, %v13342_v62 }
 0x300   : > { %9849 = vmatprep.subr.bf16.mxu0 %v14175_v34  ;;  %v11223_v22 = vld [vmem:[#allocation2 + $0x139] sm:$0xff]  ;;  %v11159_v62 = vld [vmem:[%s14066_s3 + $0x90] sm:$0xff]  }
 0x301   : > { %v11160_v32 = vld [vmem:[%s14066_s3 + $0xa0] sm:$0xff]   ;;  %v11163_v8 = vld [vmem:[%s14066_s3 + $0xb0] sm:$0xff]  }
 0x302   : > { %10074 = vmatpush3.bf16.msra.mxu1 %v11150_v55  ;;  %v11154_v55 = vld [vmem:[%s14066_s3 + $0x78] sm:$0xff]  }
 0x303   : > { %10075 = vmatprep.subr.bf16.mxu1 %v14175_v34  ;;  %9850 = vmatpush3.bf16.msra.mxu0 %v11153_v37  ;;  %v11220_v37 = vld [vmem:[#allocation2 + $0x121] sm:$0xff] }
 0x304   : > { %9832 = vmatmul.mubr.msk.bf16.gmra.mrb[104].mxu0 %vm277_vm2, %v14271_v54  ;;  %9851 = vmatprep.subr.bf16.mxu0 %v14175_v34  ;;  %v6844_v0 = vpack.c.bf16 %v11220_v37, %v11219_v7  ;;  %v11157_v54 = vld [vmem:[%s14066_s3 + $0x80] sm:$0xff]  }
 0x305   : > { %10056 = vmatmul.mubr.msk.bf16.gmra.mrb[104].mxu1 %vm277_vm2, %v6843_v11  ;;  %9835 = vmatprep.mubr.msk.bf16.mxu0 %vm11301_vm4, %v14175_v34  ;;  %v13455_v11 = vpack.c.bf16 %v11222_v19, %v11221_v10  ;;  %v14274_v10 = vld [vmem:[#allocation44_spill] sm:$0xff] }
 0x306   : > { %10059 = vmatprep.mubr.msk.bf16.mxu1 %vm11301_vm4, %v14175_v34  ;;  %10076 = vmatpush3.bf16.msra.mxu1 %v11151_v49  ;;  %v13464_v49 = vld [vmem:[#allocation2 + $0x141] sm:$0xff]  ;;  %v14275_v19 = vpack.c.bf16 %v14274_v10, %v14265_v35  ;;  %v14276_v35 = vld [vmem:[#allocation51_spill] sm:$0xff] }
 0x307   : > { %10077 = vmatprep.subr.bf16.mxu1 %v14175_v34  ;;  %9852 = vmatpush3.bf16.msra.mxu0 %v11155_v6  ;;  %v13469_v6 = vpack.c.bf16 %v13464_v49, %v11223_v22 }
 0x308   : > { %9853 = vmatprep.subr.bf16.mxu0 %v14175_v34 }
 0x30a   : > { %10078 = vmatpush3.bf16.msra.mxu1 %v11154_v55  ;;  %v14272_v55 = vpack.c.bf16 %v14262_v26, %v14261_v13  ;;  %v11161_v13 = vld [vmem:[%s14066_s3 + $0xa8] sm:$0xff]   ;;  %v6988_v26 = vpack.c.bf16 %v13379_v27, %v13365_v24  ;;  %v11162_v24 = vld [vmem:[%s14066_s3 + $0x98] sm:$0xff]  }
 0x30b   : > { %9854 = vmatpush3.bf16.msra.mxu0 %v11156_v21  ;;  %10099 = vmatprep.subr.bf16.mxu1 %v14175_v34  ;;  %v11158_v21 = vld [vmem:[%s14066_s3 + $0x88] sm:$0xff]  }
 0x30c   : > { %9836 = vmatmul.mubr.msk.bf16.gmra.mrb[108].mxu0 %vm277_vm2, %v5661_v23  ;;  %9875 = vmatprep.subr.bf16.mxu0 %v14175_v34  ;;  %v14273_v23 = vpack.c.bf16 %v14264_v33, %v14263_v56  ;;  %v11164_v56 = vld [vmem:[%s14066_s3 + $0xb8] sm:$0xff]  }
 0x30d   : > { %10060 = vmatmul.mubr.msk.bf16.gmra.mrb[108].mxu1 %vm277_vm2, %v6844_v0  ;;  %9839 = vmatprep.mubr.msk.bf16.mxu0 %vm11301_vm4, %v14175_v34  ;;  %v11224_v0 = vld [vmem:[#allocation2 + $0x147] sm:$0xff] }
 0x30e   : > { %10063 = vmatprep.mubr.msk.bf16.mxu1 %vm11301_vm4, %v14175_v34 }
 0x314   : > { %9840 = vmatmul.mubr.msk.bf16.gmra.mrb[112].mxu0 %vm277_vm2, %v5662_v57  ;;  %v6989_v57 = vpack.c.bf16 %v11224_v0, %v13381_v29  ;;  %v14279_v0 = vld [vmem:[#allocation47_spill] sm:$0xff] }
 0x315   : > { %10064 = vmatmul.mubr.msk.bf16.gmra.mrb[112].mxu1 %vm277_vm2, %v13455_v11  ;;  %9843 = vmatprep.mubr.msk.bf16.mxu0 %vm11301_vm4, %v14175_v34 }
 0x316   : > { %10067 = vmatprep.mubr.msk.bf16.mxu1 %vm11301_vm4, %v14175_v34 }
 0x31c   : > { %9844 = vmatmul.mubr.msk.bf16.gmra.mrb[116].mxu0 %vm277_vm2, %v5663_v40 }
 0x31d   : > { %10068 = vmatmul.mubr.msk.bf16.gmra.mrb[116].mxu1 %vm277_vm2, %v13469_v6  ;;  %9855 = vmatprep.mubr.msk.bf16.mxu0 %vm11301_vm4, %v14175_v34 }
 0x31e   : > { %10079 = vmatprep.mubr.msk.bf16.mxu1 %vm11301_vm4, %v14175_v34 }
 0x324   : > { %9856 = vmatmul.mubr.msk.bf16.vlgmr.msra.gmra.mrb[100].mxu0 %vm277_vm2, %v14272_v55 }
 0x325   : > { %10080 = vmatmul.mubr.msk.bf16.vlgmr.msra.gmra.mrb[100].mxu1 %vm277_vm2, %v6987_v5  ;;  %9859 = vmatprep.mubr.msk.bf16.mxu0 %vm11301_vm4, %v14175_v34  ;;  %v11225_v5 = vld [vmem:[#allocation2 + $0x14f] sm:$0xff] }
 0x326   : > { %10100 = vmatpush3.bf16.msra.mxu1 %v11157_v54  ;;  %10083 = vmatprep.mubr.msk.bf16.mxu1 %vm11301_vm4, %v14175_v34 }
 0x327   : > { %10101 = vmatprep.subr.bf16.mxu1 %v14175_v34  ;;  %9876 = vmatpush3.bf16.msra.mxu0 %v11160_v32  ;;  %v11226_v32 = vld [vmem:[#allocation2 + $0x157] sm:$0xff] }
 0x328   : > { %9877 = vmatprep.subr.bf16.mxu0 %v14175_v34  ;;  %v6990_v55 = vpack.c.bf16 %v11226_v32, %v11225_v5  ;;  %v11165_v5 = vld [vmem:[%s14066_s3 + $0xa0] sm:$0xff]  }
 0x32a   : > { %10102 = vmatpush3.bf16.msra.mxu1 %v11158_v21  ;;  %v14277_v21 = vld [vmem:[#allocation45_spill] sm:$0xff] }
 0x32b   : > { %10103 = vmatprep.subr.bf16.mxu1 %v14175_v34  ;;  %9878 = vmatpush3.bf16.msra.mxu0 %v11161_v13  ;;  %v14278_v13 = vpack.c.bf16 %v14276_v35, %v14277_v21  ;;  %v11168_v35 = vld [vmem:[%s14066_s3 + $0xc0] sm:$0xff]   ;;  %v14282_v21 = vld [vmem:[#allocation48_spill] sm:$0xff] }
 0x32c   : > { %9860 = vmatmul.mubr.msk.bf16.gmra.mrb[104].mxu0 %vm277_vm2, %v14273_v23  ;;  %9879 = vmatprep.subr.bf16.mxu0 %v14175_v34 }
 0x32d   : > { %10084 = vmatmul.mubr.msk.bf16.gmra.mrb[104].mxu1 %vm277_vm2, %v6988_v26  ;;  %9863 = vmatprep.mubr.msk.bf16.mxu0 %vm11301_vm4, %v14175_v34 }
 0x32e   : > { %10087 = vmatprep.mubr.msk.bf16.mxu1 %vm11301_vm4, %v14175_v34  ;;  %10104 = vmatpush3.bf16.msra.mxu1 %v11159_v62  ;;  %v13551_v62 = vld [vmem:[#allocation2 + $0x167] sm:$0xff] }
 0x32f   : > { %v3808_v27 = vpop.f32.mrb[80].mxu0  ;;  %10105 = vmatprep.subr.bf16.mxu1 %v14175_v34  ;;  %9880 = vmatpush3.bf16.msra.mxu0 %v11163_v8 }
 0x330   : > { %v9465_v33 = vpop.f32.mrb[81].mxu0  ;;  %9881 = vmatprep.subr.bf16.mxu0 %v14175_v34 }
 0x331   : > { %v3811_v7 = vpop.f32.mrb[82].mxu0  ;;  %v11227_v33 = vld [vmem:[#allocation2 + $0x15f] sm:$0xff] }
 0x332   : > { %v9466_v37 = vpop.f32.mrb[83].mxu0  ;;  %10106 = vmatpush3.bf16.msra.mxu1 %v11162_v24 }
 0x333   : > { %9882 = vmatpush3.bf16.msra.mxu0 %v11164_v56  ;;  %10127 = vmatprep.subr.bf16.mxu1 %v14175_v34  ;;  %v6991_v37 = vpack.c.bf16 %v13551_v62, %v11227_v33  ;;  %v14285_v33 = vld [vmem:[#allocation49_spill] sm:$0xff] }
 0x334   : > { %9864 = vmatmul.mubr.msk.bf16.gmra.mrb[108].mxu0 %vm277_vm2, %v14275_v19  ;;  %9903 = vmatprep.subr.bf16.mxu0 %v14175_v34 }
 0x335   : > { %10088 = vmatmul.mubr.msk.bf16.gmra.mrb[108].mxu1 %vm277_vm2, %v6989_v57  ;;  %9867 = vmatprep.mubr.msk.bf16.mxu0 %vm11301_vm4, %v14175_v34  ;;  %v14280_v57 = vld [vmem:[#allocation46_spill] sm:$0xff] }
 0x336   : > { %10091 = vmatprep.mubr.msk.bf16.mxu1 %vm11301_vm4, %v14175_v34  ;;  %v14281_v10 = vpack.c.bf16 %v14279_v0, %v14280_v57 }
 0x337   : > { %v3816_v29 = vpop.f32.mrb[84].mxu0 }
 0x338   : > { %v9469_v40 = vpop.f32.mrb[85].mxu0 }
 0x339   : > { %v3819_v22 = vpop.f32.mrb[86].mxu0 }
 0x33a   : > { %v9470_v54 = vpop.f32.mrb[87].mxu0 }
 0x33c   : > { %9868 = vmatmul.mubr.msk.bf16.gmra.mrb[112].mxu0 %vm277_vm2, %v14278_v13  ;;  %v14283_v13 = vpack.c.bf16 %v14282_v21, %v14268_v43 }
 0x33d   : > { %10092 = vmatmul.mubr.msk.bf16.gmra.mrb[112].mxu1 %vm277_vm2, %v6990_v55  ;;  %9871 = vmatprep.mubr.msk.bf16.mxu0 %vm11301_vm4, %v14175_v34 }
 0x33e   : > { %10095 = vmatprep.mubr.msk.bf16.mxu1 %vm11301_vm4, %v14175_v34 }
 0x33f   : > { %v3824_v26 = vpop.f32.mrb[88].mxu0 }
 0x340   : > { %v9473_v8 = vpop.f32.mrb[89].mxu0 }
 0x341   : > { %v3827_v23 = vpop.f32.mrb[90].mxu0 }
 0x342   : > { %v3857_v24 = vmax.f32 %v3808_v27, %v3827_v23  ;;  %v9474_v56 = vpop.f32.mrb[91].mxu0 }
 0x343   : > { %v14284_v56 = vld [vmem:[#allocation50_spill] sm:$0xff] }
 0x344   : > { %3863 = vst.msk [vmem:[#allocation3] sm:$0xff] %vm3862_vm6, %v3857_v24  ;;  %9872 = vmatmul.mubr.msk.bf16.gmra.mrb[116].mxu0 %vm277_vm2, %v14281_v10  ;;  %v11167_v24 = vld [vmem:[%s14066_s3 + $0xb0] sm:$0xff]   ;;  %v11228_v10 = vld [vmem:[#allocation2 + $0x148] sm:$0xff] }
 0x345   : > { %10096 = vmatmul.mubr.msk.bf16.gmra.mrb[116].mxu1 %vm277_vm2, %v6991_v37  ;;  %9883 = vmatprep.mubr.msk.bf16.mxu0 %vm11301_vm4, %v14175_v34  ;;  %v14286_v37 = vpack.c.bf16 %v14284_v56, %v14285_v33 }
 0x346   : > { %10107 = vmatprep.mubr.msk.bf16.mxu1 %vm11301_vm4, %v14175_v34 }
 0x347   : > { %v3832_v27 = vpop.f32.mrb[92].mxu0 }
 0x348   : > { %v3858_v19 = vmax.f32 %v3811_v7, %v3832_v27  ;;  %v9477_v40 = vpop.f32.mrb[93].mxu0  ;;  %v11166_v7 = vld [vmem:[%s14066_s3 + $0xa8] sm:$0xff]   ;;  %v7134_v27 = vpack.c.bf16 %v11228_v10, %v13272_v46 }
 0x349   : > { %v3835_v54 = vpop.f32.mrb[94].mxu0 }
 0x34a   : > { %3864 = vst.msk [vmem:[#allocation3 + $0x8] sm:$0xff] %vm3862_vm6, %v3858_v19  ;;  %v3859_v32 = vmax.f32 %v3816_v29, %v3835_v54  ;;  %v9478_v55 = vpop.f32.mrb[95].mxu0  ;;  %v14287_v19 = vld [vmem:[#allocation53_spill] sm:$0xff] }
 0x34b   : > { %v14288_v40 = vpack.c.bf16 %v14287_v19, %v14269_v59  ;;  %v11229_v55 = vld [vmem:[#allocation2 + $0x150] sm:$0xff] }
 0x34c   : > { %3865 = vst.msk [vmem:[#allocation3 + $0x10] sm:$0xff] %vm3862_vm6, %v3859_v32  ;;  %9884 = vmatmul.mubr.msk.bf16.vlgmr.msra.gmra.mrb[100].mxu0 %vm277_vm2, %v14283_v13  ;;  %v14289_v59 = vld [vmem:[#allocation56_spill] sm:$0xff]  ;;  %v14290_v13 = vld [vmem:[#allocation54_spill] sm:$0xff] }
 0x34d   : > { %10108 = vmatmul.mubr.msk.bf16.vlgmr.msra.gmra.mrb[100].mxu1 %vm277_vm2, %v7132_v47  ;;  %9887 = vmatprep.mubr.msk.bf16.mxu0 %vm11301_vm4, %v14175_v34 }
 0x34e   : > { %10128 = vmatpush3.bf16.msra.mxu1 %v11165_v5  ;;  %10111 = vmatprep.mubr.msk.bf16.mxu1 %vm11301_vm4, %v14175_v34 }
 0x34f   : > { %10129 = vmatprep.subr.bf16.mxu1 %v14175_v34  ;;  %v3840_v43 = vpop.f32.mrb[96].mxu0  ;;  %9904 = vmatpush3.bf16.msra.mxu0 %v11168_v35  ;;  %v11230_v35 = vld [vmem:[#allocation2 + $0x158] sm:$0xff] }
 0x350   : > { %v3860_v16 = vmax.f32 %v3819_v22, %v3840_v43  ;;  %v9481_v47 = vpop.f32.mrb[97].mxu0  ;;  %9905 = vmatprep.subr.bf16.mxu0 %v14175_v34  ;;  %v11171_v22 = vld [vmem:[%s14066_s3 + $0xd0] sm:$0xff]   ;;  %v7135_v21 = vpack.c.bf16 %v11230_v35, %v11229_v55  ;;  %v11234_v55 = vld [vmem:[#allocation2 + $0x159] sm:$0xff]  ;;  %v11235_v35 = vld [vmem:[#allocation2 + $0x161] sm:$0xff] }
 0x351   : > { %v3843_v29 = vpop.f32.mrb[98].mxu0  ;;  %v13648_v56 = vld [vmem:[#allocation3 + $0x1] ss:$2 sm:$0xff] }
 0x352   : > { %10130 = vmatpush3.bf16.msra.mxu1 %v11166_v7  ;;  %3866 = vst.msk [vmem:[#allocation3 + $0x18] sm:$0xff] %vm3862_vm6, %v3860_v16  ;;  %v3861_v8 = vmax.f32 %v3824_v26, %v3843_v29  ;;  %v9482_v23 = vpop.f32.mrb[99].mxu0  ;;  %v11170_v26 = vld [vmem:[%s14066_s3 + $0xb8] sm:$0xff]   ;;  %v14291_v7 = vpack.c.bf16 %v14289_v59, %v14290_v13  ;;  %v6230_v59 = vld [vmem:[#allocation2 + $0x100] sm:$0xff] }
 0x353   : > { %10131 = vmatprep.subr.bf16.mxu1 %v14175_v34  ;;  %9906 = vmatpush3.bf16.msra.mxu0 %v11169_v4  ;;  %v13643_v4 = vld [vmem:[#allocation2 + $0x168] sm:$0xff]  ;;  %v11231_v23 = vld [vmem:[#allocation2 + $0x160] sm:$0xff] }
 0x354   : > { %3867 = vst.msk [vmem:[#allocation3 + $0x20] sm:$0xff] %vm3862_vm6, %v3861_v8  ;;  %9888 = vmatmul.mubr.msk.bf16.gmra.mrb[104].mxu0 %vm277_vm2, %v14286_v37  ;;  %9907 = vmatprep.subr.bf16.mxu0 %v14175_v34  ;;  %v11181_v13 = vld [vmem:[%s14066_s3 + $0xe0] sm:$0xff]  }
 0x355   : > { %10112 = vmatmul.mubr.msk.bf16.gmra.mrb[104].mxu1 %vm277_vm2, %v7133_v9  ;;  %9891 = vmatprep.mubr.msk.bf16.mxu0 %vm11301_vm4, %v14175_v34 }
 0x356   : > { %10115 = vmatprep.mubr.msk.bf16.mxu1 %vm11301_vm4, %v14175_v34  ;;  %10132 = vmatpush3.bf16.msra.mxu1 %v11167_v24  ;;  %v7136_v24 = vpack.c.bf16 %v13643_v4, %v11231_v23  ;;  %v6233_v23 = vld [vmem:[#allocation2 + $0x118] sm:$0xff] }
 0x357   : > { %10133 = vmatprep.subr.bf16.mxu1 %v14175_v34  ;;  %9908 = vmatpush3.bf16.msra.mxu0 %v11171_v22  ;;  %v13646_v22 = vld [vmem:[#allocation3] ss:$2 sm:$0xff] }
 0x358   : > { %v5142_v0 = vpop.f32.mrb[80].mxu1  ;;  %9909 = vmatprep.subr.bf16.mxu0 %v14175_v34 }
 0x359   : > { %v9717_v18 = vpop.f32.mrb[81].mxu1 }
 0x35a   : > { %v5145_v9 = vpop.f32.mrb[82].mxu1  ;;  %10134 = vmatpush3.bf16.msra.mxu1 %v11170_v26  ;;  %v13666_v18 = vld [vmem:[#allocation3 + $0x11] ss:$2 sm:$0xff] }
 0x35b   : > { %v9718_v57 = vpop.f32.mrb[83].mxu1  ;;  %9910 = vmatpush3.bf16.msra.mxu0 %v11172_v60  ;;  %10155 = vmatprep.subr.bf16.mxu1 %v14175_v34  ;;  %v11173_v60 = vld [vmem:[%s14066_s3 + $0xc0] sm:$0xff]  }
 0x35c   : > { %9892 = vmatmul.mubr.msk.bf16.gmra.mrb[108].mxu0 %vm277_vm2, %v14288_v40  ;;  %9931 = vmatprep.subr.bf16.mxu0 %v14175_v34  ;;  %v11176_v57 = vld [vmem:[%s14066_s3 + $0xe0] sm:$0xff]   ;;  %v11175_v40 = vld [vmem:[%s14066_s3 + $0xd0] sm:$0xff]  }
 0x35d   : > { %10116 = vmatmul.mubr.msk.bf16.gmra.mrb[108].mxu1 %vm277_vm2, %v7134_v27  ;;  %9895 = vmatprep.mubr.msk.bf16.mxu0 %vm11301_vm4, %v14175_v34 }
 0x35e   : > { %10119 = vmatprep.mubr.msk.bf16.mxu1 %vm11301_vm4, %v14175_v34 }
 0x360   : > { %v5150_v46 = vpop.f32.mrb[84].mxu1 }
 0x361   : > { %v9721_v54 = vpop.f32.mrb[85].mxu1 }
 0x362   : > { %v5153_v5 = vpop.f32.mrb[86].mxu1  ;;  %v13698_v54 = vld [vmem:[#allocation3 + $0x20] ss:$2 sm:$0x7] }
 0x363   : > { %v9722_v32 = vpop.f32.mrb[87].mxu1 }
 0x364   : > { %9896 = vmatmul.mubr.msk.bf16.gmra.mrb[112].mxu0 %vm277_vm2, %v14291_v7  ;;  %v11178_v32 = vld [vmem:[%s14066_s3 + $0xd8] sm:$0xff]  }
 0x365   : > { %10120 = vmatmul.mubr.msk.bf16.gmra.mrb[112].mxu1 %vm277_vm2, %v7135_v21  ;;  %9899 = vmatprep.mubr.msk.bf16.mxu0 %vm11301_vm4, %v14175_v34 }
 0x366   : > { %10123 = vmatprep.mubr.msk.bf16.mxu1 %vm11301_vm4, %v14175_v34 }
 0x368   : > { %v5158_v43 = vpop.f32.mrb[88].mxu1 }
 0x369   : > { %v9725_v16 = vpop.f32.mrb[89].mxu1 }
 0x36a   : > { %v5161_v47 = vpop.f32.mrb[90].mxu1  ;;  %v6231_v16 = vld [vmem:[#allocation2 + $0x108] sm:$0xff] }
 0x36b   : > { %v5191_v29 = vmax.f32 %v5142_v0, %v5161_v47  ;;  %v9726_v8 = vpop.f32.mrb[91].mxu1  ;;  %v6232_v47 = vld [vmem:[#allocation2 + $0x110] sm:$0xff] }
 0x36c   : > { %9900 = vmatmul.mubr.msk.bf16.gmra.mrb[116].mxu0 %vm277_vm2, %v5953_v50  ;;  %v13664_v50 = vld [vmem:[#allocation3 + $0x10] ss:$2 sm:$0xff]  ;;  %v6240_v53 = vpack.c.bf16 %v6232_v47, %v6231_v16  ;;  %v14292_v8 = vpack.c.bf16 %v12693_v20, %v12691_v44 }
 0x36d   : > { %5196 = vst.msk [vmem:[#allocation3] sm:$0xff] %vm3862_vm6, %v5191_v29  ;;  %10124 = vmatmul.mubr.msk.bf16.gmra.mrb[116].mxu1 %vm277_vm2, %v7136_v24  ;;  %9911 = vmatprep.mubr.msk.bf16.mxu0 %vm11301_vm4, %v14175_v34  ;;  %v11187_v29 = vld [vmem:[%s14066_s3 + $0x110] sm:$0xff]   ;;  %v11186_v24 = vld [vmem:[%s14066_s3 + $0xf8] sm:$0xff]  }
 0x36e   : > { %10135 = vmatprep.mubr.msk.bf16.mxu1 %vm11301_vm4, %v14175_v34  ;;  %v11188_v44 = vld [vmem:[%s14066_s3 + $0x118] sm:$0xff]  }
 0x370   : > { %v5166_v33 = vpop.f32.mrb[92].mxu1 }
 0x371   : > { %v5192_v37 = vmax.f32 %v5145_v9, %v5166_v33  ;;  %v9729_v26 = vpop.f32.mrb[93].mxu1  ;;  %v11174_v9 = vld [vmem:[%s14066_s3 + $0xc8] sm:$0xff]   ;;  %v6234_v33 = vld [vmem:[#allocation2 + $0x120] sm:$0xff] }
 0x372   : > { %v5169_v0 = vpop.f32.mrb[94].mxu1  ;;  %v6241_v20 = vpack.c.bf16 %v6234_v33, %v6233_v23 }
 0x373   : > { %5197 = vst.msk [vmem:[#allocation3 + $0x8] sm:$0xff] %vm3862_vm6, %v5192_v37  ;;  %v5193_v1 = vmax.f32 %v5150_v46, %v5169_v0  ;;  %v9730_v31 = vpop.f32.mrb[95].mxu1  ;;  %v11179_v46 = vld [vmem:[%s14066_s3 + $0xf0] sm:$0xff]  }
 0x374   : > { %9912 = vmatmul.mubr.msk.bf16.vlgmr.msra.gmra.mrb[100].mxu0 %vm277_vm2, %v13292_v63  ;;  %v7417_v37 = vld [vmem:[#allocation2 + $0x16f] sm:$0xff]  ;;  %v7418_v0 = vld [vmem:[#allocation2 + $0x177] sm:$0xff] }
 0x375   : > { %5198 = vst.msk [vmem:[#allocation3 + $0x10] sm:$0xff] %vm3862_vm6, %v5193_v1  ;;  %10136 = vmatmul.mubr.msk.bf16.vlgmr.msra.gmra.mrb[100].mxu1 %vm277_vm2, %v7277_v61  ;;  %9915 = vmatprep.mubr.msk.bf16.mxu0 %vm11301_vm4, %v14175_v34  ;;  %v7424_v26 = vpack.c.bf16 %v7417_v37, %v13551_v62  ;;  %v6235_v1 = vld [vmem:[#allocation2 + $0x128] sm:$0xff]  ;;  %v6236_v31 = vld [vmem:[#allocation2 + $0x130] sm:$0xff] }
 0x376   : > { %10156 = vmatpush3.bf16.msra.mxu1 %v11173_v60  ;;  %10139 = vmatprep.mubr.msk.bf16.mxu1 %vm11301_vm4, %v14175_v34  ;;  %v7419_v60 = vld [vmem:[#allocation2 + $0x17f] sm:$0xff]  ;;  %v6242_v62 = vpack.c.bf16 %v6236_v31, %v6235_v1 }
 0x377   : > { %10157 = vmatprep.subr.bf16.mxu1 %v14175_v34  ;;  %9932 = vmatpush3.bf16.msra.mxu0 %v11176_v57  ;;  %v7425_v57 = vpack.c.bf16 %v7419_v60, %v7418_v0 }
 0x378   : > { %v5174_v10 = vpop.f32.mrb[96].mxu1  ;;  %9933 = vmatprep.subr.bf16.mxu0 %v14175_v34 }
 0x379   : > { %v5194_v15 = vmax.f32 %v5153_v5, %v5174_v10  ;;  %v9733_v61 = vpop.f32.mrb[97].mxu1  ;;  %v13700_v5 = vld [vmem:[#allocation3 + $0x21] ss:$2 sm:$0x7]  ;;  %v7421_v10 = vld [vmem:[#allocation2 + $0x18f] sm:$0xff] }
 0x37a   : > { %v5177_v63 = vpop.f32.mrb[98].mxu1  ;;  %10158 = vmatpush3.bf16.msra.mxu1 %v11174_v9  ;;  %v7420_v9 = vld [vmem:[#allocation2 + $0x187] sm:$0xff] }
 0x37b   : > { %5199 = vst.msk [vmem:[#allocation3 + $0x18] sm:$0xff] %vm3862_vm6, %v5194_v15  ;;  %v5195_v27 = vmax.f32 %v5158_v43, %v5177_v63  ;;  %v9734_v19 = vpop.f32.mrb[99].mxu1  ;;  %10159 = vmatprep.subr.bf16.mxu1 %v14175_v34  ;;  %9934 = vmatpush3.bf16.msra.mxu0 %v11177_v12  ;;  %v11184_v43 = vld [vmem:[%s14066_s3 + $0x100] sm:$0xff]   ;;  %v6237_v12 = vld [vmem:[#allocation2 + $0x138] sm:$0xff]  ;;  %v7426_v61 = vpack.c.bf16 %v7421_v10, %v7420_v9 }
 0x37c   : > { %9916 = vmatmul.mubr.msk.bf16.gmra.mrb[104].mxu0 %vm277_vm2, %v13319_v28  ;;  %9935 = vmatprep.subr.bf16.mxu0 %v14175_v34  ;;  %v11233_v28 = vld [vmem:[#allocation2 + $0x151] sm:$0xff]  ;;  %v6238_v15 = vld [vmem:[#allocation2 + $0x140] sm:$0xff] }
 0x37d   : > { %5200 = vst.msk [vmem:[#allocation3 + $0x20] sm:$0xff] %vm3862_vm6, %v5195_v27  ;;  %10140 = vmatmul.mubr.msk.bf16.gmra.mrb[104].mxu1 %vm277_vm2, %v7278_v2  ;;  %9919 = vmatprep.mubr.msk.bf16.mxu0 %vm11301_vm4, %v14175_v34  ;;  %v7279_v2 = vpack.c.bf16 %v11232_v45, %v13464_v49  ;;  %v7280_v49 = vpack.c.bf16 %v11234_v55, %v11233_v28  ;;  %v6374_v27 = vld [vmem:[#allocation2 + $0xf9] sm:$0xff]  ;;  %v6375_v19 = vld [vmem:[#allocation2 + $0x101] sm:$0xff]  ;;  %v6376_v45 = vld [vmem:[#allocation2 + $0x109] sm:$0xff] }
 0x37e   : > { %10143 = vmatprep.mubr.msk.bf16.mxu1 %vm11301_vm4, %v14175_v34  ;;  %10160 = vmatpush3.bf16.msra.mxu1 %v11175_v40  ;;  %v6243_v63 = vpack.c.bf16 %v6238_v15, %v6237_v12  ;;  %v11189_v40 = vld [vmem:[%s14066_s3 + $0x100] sm:$0xff]   ;;  %v11192_v55 = vld [vmem:[%s14066_s3 + $0x118] sm:$0xff]  }
 0x37f   : > { %10161 = vmatprep.subr.bf16.mxu1 %v14175_v34  ;;  %9936 = vmatpush3.bf16.msra.mxu0 %v11179_v46  ;;  %v6384_v46 = vpack.c.bf16 %v6375_v19, %v6374_v27  ;;  %v5201_v60 = vld [vmem:[#allocation3] ss:$2 sm:$0xff] }
 0x380   : > { %9937 = vmatprep.subr.bf16.mxu0 %v14175_v34 }
 0x382   : > { %10162 = vmatpush3.bf16.msra.mxu1 %v11178_v32  ;;  %v14293_v32 = vpack.c.bf16 %v12675_v51, %v12657_v39  ;;  %v11191_v39 = vld [vmem:[%s14066_s3 + $0x110] sm:$0xff]   ;;  %v14294_v51 = vpack.c.bf16 %v12681_v3, %v12695_v36  ;;  %v7563_v36 = vld [vmem:[#allocation2 + $0x178] sm:$0xff] }
 0x383   : > { %9938 = vmatpush3.bf16.msra.mxu0 %v11180_v30  ;;  %10183 = vmatprep.subr.bf16.mxu1 %v14175_v34  ;;  %v11190_v30 = vld [vmem:[%s14066_s3 + $0x108] sm:$0xff]   ;;  %v13891_v12 = vld [vmem:[#allocation3 + $0x10] ss:$2 sm:$0xff]  ;;  %v13893_v15 = vld [vmem:[#allocation3 + $0x11] ss:$2 sm:$0xff] }
 0x384   : > { %9920 = vmatmul.mubr.msk.bf16.gmra.mrb[108].mxu0 %vm277_vm2, %v13351_v25  ;;  %9959 = vmatprep.subr.bf16.mxu0 %v14175_v34  ;;  %v13739_v25 = vld [vmem:[#allocation2 + $0x169] sm:$0xff] }
 0x385   : > { %10144 = vmatmul.mubr.msk.bf16.gmra.mrb[108].mxu1 %vm277_vm2, %v7279_v2  ;;  %9923 = vmatprep.mubr.msk.bf16.mxu0 %vm11301_vm4, %v14175_v34  ;;  %v7281_v21 = vpack.c.bf16 %v13739_v25, %v11235_v35  ;;  %v6377_v2 = vld [vmem:[#allocation2 + $0x111] sm:$0xff]  ;;  %v6379_v35 = vld [vmem:[#allocation2 + $0x121] sm:$0xff] }
 0x386   : > { %10147 = vmatprep.mubr.msk.bf16.mxu1 %vm11301_vm4, %v14175_v34  ;;  %v6385_v28 = vpack.c.bf16 %v6377_v2, %v6376_v45 }
 0x38c   : > { %9924 = vmatmul.mubr.msk.bf16.gmra.mrb[112].mxu0 %vm277_vm2, %v13369_v58  ;;  %v6229_v58 = vld [vmem:[#allocation2 + $0xf8] sm:$0xff] }
 0x38d   : > { %10148 = vmatmul.mubr.msk.bf16.gmra.mrb[112].mxu1 %vm277_vm2, %v7280_v49  ;;  %9927 = vmatprep.mubr.msk.bf16.mxu0 %vm11301_vm4, %v14175_v34  ;;  %v6239_v7 = vpack.c.bf16 %v6230_v59, %v6229_v58  ;;  %v6378_v49 = vld [vmem:[#allocation2 + $0x119] sm:$0xff] }
 0x38e   : > { %10151 = vmatprep.mubr.msk.bf16.mxu1 %vm11301_vm4, %v14175_v34  ;;  %v6386_v58 = vpack.c.bf16 %v6379_v35, %v6378_v49  ;;  %v7564_v59 = vld [vmem:[#allocation2 + $0x180] sm:$0xff] }
 0x394   : > { %9928 = vmatmul.mubr.msk.bf16.gmra.mrb[116].mxu0 %vm277_vm2, %v13385_v42  ;;  %v11182_v42 = vld [vmem:[%s14066_s3 + $0xe8] sm:$0xff]  }
 0x395   : > { %10152 = vmatmul.mubr.msk.bf16.gmra.mrb[116].mxu1 %vm277_vm2, %v7281_v21  ;;  %9939 = vmatprep.mubr.msk.bf16.mxu0 %vm11301_vm4, %v14175_v34  ;;  %v7562_v21 = vld [vmem:[#allocation2 + $0x170] sm:$0xff] }
 0x396   : > { %10163 = vmatprep.mubr.msk.bf16.mxu1 %vm11301_vm4, %v14175_v34  ;;  %v7569_v3 = vpack.c.bf16 %v7562_v21, %v13643_v4  ;;  %v7565_v4 = vld [vmem:[#allocation2 + $0x188] sm:$0xff] }
 0x39c   : > { %9940 = vmatmul.mubr.msk.bf16.vlgmr.msra.gmra.mrb[100].mxu0 %vm277_vm2, %v6239_v7  ;;  %v7566_v7 = vld [vmem:[#allocation2 + $0x190] sm:$0xff] }
 0x39d   : > { %10164 = vmatmul.mubr.msk.bf16.vlgmr.msra.gmra.mrb[100].mxu1 %vm277_vm2, %v7422_v17  ;;  %9943 = vmatprep.mubr.msk.bf16.mxu0 %vm11301_vm4, %v14175_v34  ;;  %v11183_v17 = vld [vmem:[%s14066_s3 + $0xf0] sm:$0xff]  }
 0x39e   : > { %10184 = vmatpush3.bf16.msra.mxu1 %v11181_v13  ;;  %10167 = vmatprep.mubr.msk.bf16.mxu1 %vm11301_vm4, %v14175_v34  ;;  %v7570_v13 = vpack.c.bf16 %v7564_v59, %v7563_v36 }
 0x39f   : > { %10185 = vmatprep.subr.bf16.mxu1 %v14175_v34  ;;  %9960 = vmatpush3.bf16.msra.mxu0 %v11184_v43  ;;  %v7571_v43 = vpack.c.bf16 %v7566_v7, %v7565_v4 }
 0x3a0   : > { %9961 = vmatprep.subr.bf16.mxu0 %v14175_v34 }
 0x3a2   : > { %10186 = vmatpush3.bf16.msra.mxu1 %v11182_v42  ;;  %v14296_v42 = vpack.c.bf16 %v12709_v52, %v12707_v14  ;;  %v7710_v14 = vld [vmem:[#allocation2 + $0x189] sm:$0xff]  ;;  %v7711_v52 = vld [vmem:[#allocation2 + $0x191] sm:$0xff] }
 0x3a3   : > { %10187 = vmatprep.subr.bf16.mxu1 %v14175_v34  ;;  %9962 = vmatpush3.bf16.msra.mxu0 %v11185_v41  ;;  %v7716_v41 = vpack.c.bf16 %v7711_v52, %v7710_v14 }
 0x3a4   : > { %9944 = vmatmul.mubr.msk.bf16.gmra.mrb[104].mxu0 %vm277_vm2, %v6240_v53  ;;  %9963 = vmatprep.subr.bf16.mxu0 %v14175_v34 }
 0x3a5   : > { %10168 = vmatmul.mubr.msk.bf16.gmra.mrb[104].mxu1 %vm277_vm2, %v14292_v8  ;;  %9947 = vmatprep.mubr.msk.bf16.mxu0 %vm11301_vm4, %v14175_v34 }
 0x3a6   : > { %10171 = vmatprep.mubr.msk.bf16.mxu1 %vm11301_vm4, %v14175_v34  ;;  %10188 = vmatpush3.bf16.msra.mxu1 %v11183_v17 }
 0x3a7   : > { %10189 = vmatprep.subr.bf16.mxu1 %v14175_v34  ;;  %9964 = vmatpush3.bf16.msra.mxu0 %v11187_v29 }
 0x3a8   : > { %9965 = vmatprep.subr.bf16.mxu0 %v14175_v34 }
 0x3aa   : > { %10190 = vmatpush3.bf16.msra.mxu1 %v11186_v24 }
 0x3ab   : > { %9966 = vmatpush3.bf16.msra.mxu0 %v11188_v44  ;;  %10211 = vmatprep.subr.bf16.mxu1 %v14175_v34 }
 0x3ac   : > { %9948 = vmatmul.mubr.msk.bf16.gmra.mrb[108].mxu0 %vm277_vm2, %v6241_v20 }
 0x3ad   : > { %10172 = vmatmul.mubr.msk.bf16.gmra.mrb[108].mxu1 %vm277_vm2, %v7424_v26  ;;  %9951 = vmatprep.mubr.msk.bf16.mxu0 %vm11301_vm4, %v14175_v34 }
 0x3ae   : > { %10175 = vmatprep.mubr.msk.bf16.mxu1 %vm11301_vm4, %v14175_v34 }
 0x3b4   : > { %9952 = vmatmul.mubr.msk.bf16.gmra.mrb[112].mxu0 %vm277_vm2, %v6242_v62 }
 0x3b5   : > { %10176 = vmatmul.mubr.msk.bf16.gmra.mrb[112].mxu1 %vm277_vm2, %v7425_v57  ;;  %9955 = vmatprep.mubr.msk.bf16.mxu0 %vm11301_vm4, %v14175_v34 }
 0x3b6   : > { %10179 = vmatprep.mubr.msk.bf16.mxu1 %vm11301_vm4, %v14175_v34 }
 0x3bc   : > { %9956 = vmatmul.mubr.msk.bf16.gmra.mrb[116].mxu0 %vm277_vm2, %v6243_v63 }
 0x3bd   : > { %10180 = vmatmul.mubr.msk.bf16.gmra.mrb[116].mxu1 %vm277_vm2, %v7426_v61  ;;  %9967 = vmatprep.mubr.msk.bf16.mxu0 %vm11301_vm4, %v14175_v34 }
 0x3be   : > { %10191 = vmatprep.mubr.msk.bf16.mxu1 %vm11301_vm4, %v14175_v34 }
 0x3c4   : > { %9968 = vmatmul.mubr.msk.bf16.vlgmr.msra.gmra.mrb[100].mxu0 %vm277_vm2, %v6384_v46 }
 0x3c5   : > { %10192 = vmatmul.mubr.msk.bf16.vlgmr.msra.gmra.mrb[100].mxu1 %vm277_vm2, %v14293_v32  ;;  %9971 = vmatprep.mubr.msk.bf16.mxu0 %vm11301_vm4, %v14175_v34  ;;  %v13897_v32 = vld [vmem:[#allocation3 + $0x20] ss:$2 sm:$0x7] }
 0x3c6   : > { %10212 = vmatpush3.bf16.msra.mxu1 %v11189_v40  ;;  %10195 = vmatprep.mubr.msk.bf16.mxu1 %vm11301_vm4, %v14175_v34 }
 0x3c7   : > { %10213 = vmatprep.subr.bf16.mxu1 %v14175_v34 }
 0x3ca   : > { %10214 = vmatpush3.bf16.msra.mxu1 %v11190_v30  ;;  %v13899_v30 = vld [vmem:[#allocation3 + $0x21] ss:$2 sm:$0x7] }
 0x3cb   : > { %10215 = vmatprep.subr.bf16.mxu1 %v14175_v34 }
 0x3cc   : > { %9972 = vmatmul.mubr.msk.bf16.gmra.mrb[104].mxu0 %vm277_vm2, %v6385_v28 }
 0x3cd   : > { %10196 = vmatmul.mubr.msk.bf16.gmra.mrb[104].mxu1 %vm277_vm2, %v14294_v51  ;;  %9975 = vmatprep.mubr.msk.bf16.mxu0 %vm11301_vm4, %v14175_v34 }
 0x3ce   : > { %10199 = vmatprep.mubr.msk.bf16.mxu1 %vm11301_vm4, %v14175_v34  ;;  %10216 = vmatpush3.bf16.msra.mxu1 %v11191_v39 }
 0x3cf   : > { %10217 = vmatprep.subr.bf16.mxu1 %v14175_v34 }
 0x3d2   : > { %10218 = vmatpush3.bf16.msra.mxu1 %v11192_v55 }
 0x3d4   : > { %9976 = vmatmul.mubr.msk.bf16.gmra.mrb[108].mxu0 %vm277_vm2, %v6386_v58 }
 0x3d5   : > { %10200 = vmatmul.mubr.msk.bf16.gmra.mrb[108].mxu1 %vm277_vm2, %v7569_v3  ;;  %9979 = vmatprep.mubr.msk.bf16.mxu0 %vm11301_vm4, %v14175_v34 }
 0x3d6   : > { %10203 = vmatprep.mubr.msk.bf16.mxu1 %vm11301_vm4, %v14175_v34 }
 0x3dc   : > { %9980 = vmatmul.mubr.msk.bf16.gmra.mrb[112].mxu0 %vm277_vm2, %v13455_v11  ;;  %v14295_v11 = vpack.c.bf16 %v12701_v38, %v12699_v48  ;;  %v7708_v48 = vld [vmem:[#allocation2 + $0x179] sm:$0xff]  ;;  %v7709_v38 = vld [vmem:[#allocation2 + $0x181] sm:$0xff] }
 0x3dd   : > { %10204 = vmatmul.mubr.msk.bf16.gmra.mrb[112].mxu1 %vm277_vm2, %v7570_v13  ;;  %9983 = vmatprep.mubr.msk.bf16.mxu0 %vm11301_vm4, %v14175_v34  ;;  %v7715_v47 = vpack.c.bf16 %v7709_v38, %v7708_v48 }
 0x3de   : > { %10207 = vmatprep.mubr.msk.bf16.mxu1 %vm11301_vm4, %v14175_v34 }
 0x3e4   : > { %9984 = vmatmul.mubr.msk.bf16.gmra.mrb[116].mxu0 %vm277_vm2, %v13469_v6  ;;  %v7707_v6 = vld [vmem:[#allocation2 + $0x171] sm:$0xff] }
 0x3e5   : > { %10208 = vmatmul.mubr.msk.bf16.gmra.mrb[116].mxu1 %vm277_vm2, %v7571_v43  ;;  %v7714_v16 = vpack.c.bf16 %v7707_v6, %v13739_v25 }
 0x3e6   : > { %10219 = vmatprep.mubr.msk.bf16.mxu1 %vm11301_vm4, %v14175_v34 }
 0x3ed   : > { %10220 = vmatmul.mubr.msk.bf16.vlgmr.msra.gmra.mrb[100].mxu1 %vm277_vm2, %v14295_v11  ;;  %v3879_v11 = vmax.f32 %v13646_v22, %v13648_v56  ;;  %v3880_v22 = vmax.f32 %v13664_v50, %v13666_v18  ;;  %v5225_v50 = vld [vmem:[%s14068_s5 + $0x78] sm:$0xff] }
 0x3ee   : > { %10223 = vmatprep.mubr.msk.bf16.mxu1 %vm11301_vm4, %v14175_v34  ;;  %v5216_v18 = vld [vmem:[%s14068_s5 + $0x18] sm:$0xff] }
 0x3f5   : > { %10224 = vmatmul.mubr.msk.bf16.gmra.mrb[104].mxu1 %vm277_vm2, %v14296_v42 }
 0x3f6   : > { %10227 = vmatprep.mubr.msk.bf16.mxu1 %vm11301_vm4, %v14175_v34 }
 0x3fd   : > { %10228 = vmatmul.mubr.msk.bf16.gmra.mrb[108].mxu1 %vm277_vm2, %v7714_v16  ;;  %v13910_v16 = vld [vmem:[%s14067_s4] ss:$0 sm:$0xff] }
 0x3fe   : > { %10231 = vmatprep.mubr.msk.bf16.mxu1 %vm11301_vm4, %v14175_v34 }
 0x405   : > { %10232 = vmatmul.mubr.msk.bf16.gmra.mrb[112].mxu1 %vm277_vm2, %v7715_v47 }
 0x406   : > { %10235 = vmatprep.mubr.msk.bf16.mxu1 %vm11301_vm4, %v14175_v34  ;;  %v5204_v34 = vld [vmem:[#allocation3 + $0x1] ss:$2 sm:$0xff] }
 0x407   : > { %v5207_v7 = vmax.f32 %v5201_v60, %v5204_v34  ;;  %v6553_v34 = vld [vmem:[%s14068_s5 + $0x90] sm:$0xff] }
 0x409   : > { %v5210_v47 = vadd.f32 %v13910_v16, %v5207_v7  ;;  %v5226_v7 = vld [vmem:[%s14068_s5 + $0x80] sm:$0xff] }
 0x40d   : > { %10236 = vmatmul.mubr.msk.bf16.gmra.mrb[116].mxu1 %vm277_vm2, %v7716_v41  ;;  %v3882_v41 = vadd.f32 %v13910_v16, %v3879_v11  ;;  %v3890_v11 = vld [vmem:[%s14068_s5 + $0x10] sm:$0x7] }
 0x497   : > { %v6470_v53 = vpop.f32.mrb[100].mxu0 }
 0x498   : > { %v9969_v25 = vpop.f32.mrb[101].mxu0 }
 0x499   : > { %v6473_v17 = vpop.f32.mrb[102].mxu0 }
 0x49a   : > { %v9970_v29 = vpop.f32.mrb[103].mxu0 }
 0x49b   : > { %v5208_v29 = vmax.f32 %v13891_v12, %v13893_v15 }
 0x49f   : > { %v6478_v8 = vpop.f32.mrb[104].mxu0 }
 0x4a0   : > { %v9973_v23 = vpop.f32.mrb[105].mxu0 }
 0x4a1   : > { %v6481_v24 = vpop.f32.mrb[106].mxu0 }
 0x4a2   : > { %v9974_v33 = vpop.f32.mrb[107].mxu0 }
 0x4a7   : > { %v6486_v37 = vpop.f32.mrb[108].mxu0 }
 0x4a8   : > { %v9977_v44 = vpop.f32.mrb[109].mxu0 }
 0x4a9   : > { %v6489_v20 = vpop.f32.mrb[110].mxu0  ;;  %v3883_v44 = vadd.f32 %v13910_v16, %v3880_v22 }
 0x4aa   : > { %v6519_v26 = vmax.f32 %v6470_v53, %v6489_v20  ;;  %v9978_v0 = vpop.f32.mrb[111].mxu0 }
 0x4ac   : > { %6524 = vst.msk [vmem:[#allocation3] sm:$0xff] %vm3862_vm6, %v6519_v26  ;;  %v5209_v26 = vmax.f32 %v13897_v32, %v13899_v30  ;;  %v3886_v32 = vmax.f32 %v3883_v44, 0.0 }
 0x4af   : > { %v6494_v1 = vpop.f32.mrb[112].mxu0 }
 0x4b0   : > { %v6520_v31 = vmax.f32 %v6473_v17, %v6494_v1  ;;  %v9981_v57 = vpop.f32.mrb[113].mxu0  ;;  %v5213_v17 = vmax.f32 %v5210_v47, 0.0  ;;  %v3888_v1 = vld [vmem:[%s14068_s5] sm:$0xff] }
 0x4b1   : > { %v6497_v62 = vpop.f32.mrb[114].mxu0 }
 0x4b2   : > { %v6521_v9 = vmax.f32 %v6478_v8, %v6497_v62  ;;  %v9982_v10 = vpop.f32.mrb[115].mxu0  ;;  %6525 = vst.msk [vmem:[#allocation3 + $0x8] sm:$0xff] %vm3862_vm6, %v6520_v31  ;;  %v3881_v8 = vmax.f32 %v13698_v54, %v13700_v5  ;;  %v3897_v5 = vld [vmem:[%s14068_s5 + $0x60] sm:$0xff] }
 0x4b3   : > { %v5211_v10 = vadd.f32 %v13910_v16, %v5208_v29 }
 0x4b4   : > { %6526 = vst.msk [vmem:[#allocation3 + $0x10] sm:$0xff] %vm3862_vm6, %v6521_v9  ;;  %v6544_v9 = vld [vmem:[%s14068_s5 + $0x30] sm:$0xff]  ;;  %v3884_v12 = vadd.f32 %v13910_v16, %v3881_v8 }
 0x4b7   : > { %v6502_v61 = vpop.f32.mrb[116].mxu0 }
 0x4b8   : > { %v6522_v63 = vmax.f32 %v6481_v24, %v6502_v61  ;;  %v9985_v27 = vpop.f32.mrb[117].mxu0 }
 0x4b9   : > { %v6505_v19 = vpop.f32.mrb[118].mxu0  ;;  %v6529_v13 = vld [vmem:[#allocation3] ss:$2 sm:$0xff]  ;;  %v6532_v4 = vld [vmem:[#allocation3 + $0x1] ss:$2 sm:$0xff]  ;;  %v5228_v27 = vmul.f32 %v5225_v50, %v5213_v17 }
 0x4ba   : > { %v6523_v40 = vmax.f32 %v6486_v37, %v6505_v19  ;;  %v9986_v46 = vpop.f32.mrb[119].mxu0  ;;  %6527 = vst.msk [vmem:[#allocation3 + $0x18] sm:$0xff] %vm3862_vm6, %v6522_v63  ;;  %v6535_v48 = vmax.f32 %v6529_v13, %v6532_v4  ;;  %v3885_v37 = vmax.f32 %v3882_v41, 0.0 }
 0x4bc   : > { %6528 = vst.msk [vmem:[#allocation3 + $0x20] sm:$0xff] %vm3862_vm6, %v6523_v40  ;;  %v6538_v25 = vadd.f32 %v13910_v16, %v6535_v48  ;;  %v5219_v40 = vmul.f32 %v5216_v18, %v5213_v17  ;;  %v3900_v46 = vmul.f32 %v3897_v5, %v3885_v37  ;;  %v5218_v17 = vld [vmem:[%s14068_s5 + $0x28] sm:$0x7] }
 0x4be   : > { %v6541_v60 = vmax.f32 %v6538_v25, 0.0  ;;  %v6545_v25 = vld [vmem:[%s14068_s5 + $0x38] sm:$0xff] }
 0x4c0   : > { %v7798_v45 = vpop.f32.mrb[100].mxu1 }
 0x4c1   : > { %v10221_v2 = vpop.f32.mrb[101].mxu1  ;;  %v6530_v56 = vld [vmem:[#allocation3 + $0x10] ss:$2 sm:$0xff]  ;;  %v6533_v53 = vld [vmem:[#allocation3 + $0x11] ss:$2 sm:$0xff] }
 0x4c2   : > { %v7801_v28 = vpop.f32.mrb[102].mxu1  ;;  %v6536_v20 = vmax.f32 %v6530_v56, %v6533_v53  ;;  %v6556_v2 = vmul.f32 %v6553_v34, %v6541_v60  ;;  %v6554_v53 = vld [vmem:[%s14068_s5 + $0x98] sm:$0xff] }
 0x4c3   : > { %v10222_v39 = vpop.f32.mrb[103].mxu1  ;;  %v6531_v23 = vld [vmem:[#allocation3 + $0x20] ss:$2 sm:$0x7] }
 0x4c4   : > { %v6534_v24 = vld [vmem:[#allocation3 + $0x21] ss:$2 sm:$0x7]  ;;  %v6539_v30 = vadd.f32 %v13910_v16, %v6536_v20  ;;  %v3891_v39 = vmul.f32 %v3888_v1, %v3885_v37 }
 0x4c5   : > { %v6537_v15 = vmax.f32 %v6531_v23, %v6534_v24 }
 0x4c6   : > { %v5222_v4 = vadd.f32 %v5219_v40, %v3891_v39 }
 0x4c8   : > { %v7806_v51 = vpop.f32.mrb[104].mxu1 }
 0x4c9   : > { %v10225_v55 = vpop.f32.mrb[105].mxu1 }
 0x4ca   : > { %v7809_v49 = vpop.f32.mrb[106].mxu1  ;;  %v3898_v55 = vld [vmem:[%s14068_s5 + $0x68] sm:$0xff] }
 0x4cb   : > { %v10226_v35 = vpop.f32.mrb[107].mxu1 }
 0x4cc   : > { %v7881_v35 = vld [vmem:[%s14068_s5 + $0xa8] sm:$0xff] }
 0x4d0   : > { %v13902_v21 = vpop.f32.mrb[108].mxu1 }
 0x4d1   : > { %v10229_v58 = vpop.f32.mrb[109].mxu1 }
 0x4d2   : > { %v7817_v3 = vpop.f32.mrb[110].mxu1  ;;  %v5214_v58 = vmax.f32 %v5211_v10, 0.0 }
 0x4d3   : > { %v7847_v36 = vmax.f32 %v7798_v45, %v7817_v3  ;;  %v10230_v59 = vpop.f32.mrb[111].mxu1  ;;  %v5212_v45 = vadd.f32 %v13910_v16, %v5209_v26  ;;  %v3887_v3 = vmax.f32 %v3884_v12, 0.0  ;;  %v6555_v26 = vld [vmem:[%s14068_s5 + $0xa0] sm:$0x7] }
 0x4d4   : > { %v5231_v59 = vadd.f32 %v5228_v27, %v3900_v46  ;;  %v5229_v29 = vmul.f32 %v5226_v7, %v5214_v58 }
 0x4d5   : > { %7852 = vst.msk [vmem:[#allocation3] sm:$0xff] %vm3862_vm6, %v7847_v36  ;;  %v6540_v36 = vadd.f32 %v13910_v16, %v6537_v15  ;;  %v5215_v47 = vmax.f32 %v5212_v45, 0.0  ;;  %v3893_v37 = vmul.f32 %v3890_v11, %v3887_v3  ;;  %v7882_v15 = vld [vmem:[%s14068_s5 + $0xb0] sm:$0xff]  ;;  %v7883_v45 = vld [vmem:[%s14068_s5 + $0xb8] sm:$0x7] }
 0x4d8   : > { %v7822_v43 = vpop.f32.mrb[112].mxu1 }
 0x4d9   : > { %v7848_v42 = vmax.f32 %v7801_v28, %v7822_v43  ;;  %v10233_v6 = vpop.f32.mrb[113].mxu1  ;;  %v3899_v43 = vld [vmem:[%s14068_s5 + $0x70] sm:$0x7] }
 0x4da   : > { %v7825_v38 = vpop.f32.mrb[114].mxu1  ;;  %v6542_v6 = vmax.f32 %v6539_v30, 0.0  ;;  %v3902_v24 = vmul.f32 %v3899_v43, %v3887_v3 }
 0x4db   : > { %v7849_v14 = vmax.f32 %v7806_v51, %v7825_v38  ;;  %v10234_v52 = vpop.f32.mrb[115].mxu1  ;;  %7853 = vst.msk [vmem:[#allocation3 + $0x8] sm:$0xff] %vm3862_vm6, %v7848_v42  ;;  %v6547_v51 = vmul.f32 %v6544_v9, %v6541_v60  ;;  %v3901_v42 = vmul.f32 %v3898_v55, %v3886_v32  ;;  %v5217_v38 = vld [vmem:[%s14068_s5 + $0x20] sm:$0xff] }
 0x4dc   : > { %v6559_v52 = vadd.f32 %v6556_v2, %v5231_v59  ;;  %v5220_v20 = vmul.f32 %v5217_v38, %v5214_v58  ;;  %v6548_v5 = vmul.f32 %v6545_v25, %v6542_v6 }
 0x4dd   : > { %7854 = vst.msk [vmem:[#allocation3 + $0x10] sm:$0xff] %vm3862_vm6, %v7849_v14  ;;  %v5227_v14 = vld [vmem:[%s14068_s5 + $0x88] sm:$0x7]  ;;  %v6550_v22 = vadd.f32 %v6547_v51, %v5222_v4  ;;  %v5232_v12 = vadd.f32 %v5229_v29, %v3901_v42 }
 0x4de   : > { %v5230_v60 = vmul.f32 %v5227_v14, %v5215_v47 }
 0x4e0   : > { %v7830_v33 = vpop.f32.mrb[116].mxu1  ;;  %v5233_v30 = vadd.f32 %v5230_v60, %v3902_v24 }
 0x4e1   : > { %v7850_v0 = vmax.f32 %v7809_v49, %v7830_v33  ;;  %v10237_v54 = vpop.f32.mrb[117].mxu1  ;;  %v3889_v49 = vld [vmem:[%s14068_s5 + $0x8] sm:$0xff]  ;;  %v6543_v33 = vmax.f32 %v6540_v36, 0.0 }
 0x4e2   : > { %v7833_v31 = vpop.f32.mrb[118].mxu1  ;;  %v7857_v57 = vld [vmem:[#allocation3] ss:$2 sm:$0xff]  ;;  %v7860_v62 = vld [vmem:[#allocation3 + $0x1] ss:$2 sm:$0xff]  ;;  %v3892_v48 = vmul.f32 %v3889_v49, %v3886_v32  ;;  %v6557_v54 = vmul.f32 %v6554_v53, %v6542_v6 }
 0x4e3   : > { %v7851_v61 = vmax.f32 %v13902_v21, %v7833_v31  ;;  %v10238_v63 = vpop.f32.mrb[119].mxu1  ;;  %v7863_v19 = vmax.f32 %v7857_v57, %v7860_v62  ;;  %7855 = vst.msk [vmem:[#allocation3 + $0x18] sm:$0xff] %vm3862_vm6, %v7850_v0  ;;  %v7872_v21 = vld [vmem:[%s14068_s5 + $0x48] sm:$0xff]  ;;  %v6546_v0 = vld [vmem:[%s14068_s5 + $0x40] sm:$0x7]  ;;  %v5221_v31 = vmul.f32 %v5218_v17, %v5215_v47 }
 0x4e4   : > { %v6558_v63 = vmul.f32 %v6555_v26, %v6543_v33  ;;  %v6549_v27 = vmul.f32 %v6546_v0, %v6543_v33  ;;  %v5223_v40 = vadd.f32 %v5220_v20, %v3892_v48  ;;  %v6560_v32 = vadd.f32 %v6557_v54, %v5232_v12  ;;  %v7930_v0 = vld [vmem:[%s14069_s6] sm:$0x1] }
 0x4e5   : > { %v7866_v28 = vadd.f32 %v13910_v16, %v7863_v19  ;;  %7856 = vst.msk [vmem:[#allocation3 + $0x20] sm:$0xff] %vm3862_vm6, %v7851_v61  ;;  %v7873_v61 = vld [vmem:[%s14068_s5 + $0x50] sm:$0xff]  ;;  %v5224_v2 = vadd.f32 %v5221_v31, %v3893_v37 }
 0x4e6   : > { %v6551_v51 = vadd.f32 %v6548_v5, %v5223_v40 }
 0x4e7   : > { %v7869_v13 = vmax.f32 %v7866_v28, 0.0  ;;  %v7874_v28 = vld [vmem:[%s14068_s5 + $0x58] sm:$0x7] }
 0x4e9   : > { %v7884_v41 = vmul.f32 %v7881_v35, %v7869_v13  ;;  %v7875_v56 = vmul.f32 %v7872_v21, %v7869_v13  ;;  %v6561_v35 = vadd.f32 %v6558_v63, %v5233_v30  ;;  %v6552_v21 = vadd.f32 %v6549_v27, %v5224_v2 }
 0x4ea   : > { %v7858_v8 = vld [vmem:[#allocation3 + $0x10] ss:$2 sm:$0xff]  ;;  %v7861_v23 = vld [vmem:[#allocation3 + $0x11] ss:$2 sm:$0xff] }
 0x4eb   : > { %v7887_v50 = vadd.f32 %v7884_v41, %v6559_v52  ;;  %v7878_v18 = vadd.f32 %v7875_v56, %v6550_v22  ;;  %v7864_v44 = vmax.f32 %v7858_v8, %v7861_v23 }
 0x4ec   : > { %v7859_v34 = vld [vmem:[#allocation3 + $0x20] ss:$2 sm:$0x7]  ;;  %v7862_v1 = vld [vmem:[#allocation3 + $0x21] ss:$2 sm:$0x7] }
 0x4ed   : > { %v7910_v57 = vsel %vm3862_vm6, %v7887_v50, 0.0  ;;  %v7890_v62 = vsel %vm3862_vm6, %v7878_v18, 0.0  ;;  %v7867_v9 = vadd.f32 %v13910_v16, %v7864_v44  ;;  %v7865_v10 = vmax.f32 %v7859_v34, %v7862_v1 }
 0x4ee   : > { %7911 = vadd.xlane.f32.xlu1 %v7910_v57  ;;  %7891 = vadd.xlane.f32.xlu0 %v7890_v62 }
 0x4ef   : > { %v7870_v19 = vmax.f32 %v7867_v9, 0.0  ;;  %v7868_v46 = vadd.f32 %v13910_v16, %v7865_v10 }
 0x4f1   : > { %v7885_v39 = vmul.f32 %v7882_v15, %v7870_v19  ;;  %v7876_v55 = vmul.f32 %v7873_v61, %v7870_v19  ;;  %v7871_v49 = vmax.f32 %v7868_v46, 0.0 }
 0x4f3   : > { %v7888_v58 = vadd.f32 %v7885_v39, %v6560_v32  ;;  %v7879_v3 = vadd.f32 %v7876_v55, %v6551_v51  ;;  %v7886_v16 = vmul.f32 %v7883_v45, %v7871_v49  ;;  %v7877_v36 = vmul.f32 %v7874_v28, %v7871_v49 }
 0x4f5   : > { %v7913_v59 = vsel %vm3862_vm6, %v7888_v58, 0.0  ;;  %v7893_v13 = vsel %vm3862_vm6, %v7879_v3, 0.0  ;;  %v7889_v4 = vadd.f32 %v7886_v16, %v6561_v35  ;;  %v7880_v7 = vadd.f32 %v7877_v36, %v6552_v21 }
 0x4f6   : > { %7914 = vadd.xlane.f32.xlu1 %v7913_v59  ;;  %7894 = vadd.xlane.f32.xlu0 %v7893_v13 }
 0x4f7   : > { %v7916_v43 = vsel %vm7896_vm7, %v7889_v4, 0.0  ;;  %v7897_v11 = vsel %vm7896_vm7, %v7880_v7, 0.0 }
 0x4fa   : > { %7917 = vadd.xlane.f32.xlu1 %v7916_v43  ;;  %7898 = vadd.xlane.f32.xlu0 %v7897_v11 }
 0x57b   : > { %v7912_v42 = vpop.xlane.xlu1 %7911  ;;  %v7892_v6 = vpop.xlane.xlu0 %7891 }
 0x583   : > { %v7915_v48 = vpop.xlane.xlu1 %7914  ;;  %v7895_v38 = vpop.xlane.xlu0 %7894 }
 0x584   : > { %v7919_v47 = vadd.f32 %v7915_v48, %v7912_v42  ;;  %v7900_v14 = vadd.f32 %v7895_v38, %v7892_v6 }
 0x587   : > { %v7918_v52 = vpop.xlane.xlu1 %7917  ;;  %v7899_v41 = vpop.xlane.xlu0 %7898 }
 0x588   : > { %v7920_v22 = vsel %vm7901_vm8, %v7918_v52, 0.0  ;;  %v7902_v56 = vsel %vm7901_vm8, %v7899_v41, 0.0 }
 0x589   : > { %v7921_v53 = vadd.f32 %v7920_v22, %v7919_v47  ;;  %v7903_v25 = vadd.f32 %v7902_v56, %v7900_v14 }
 0x58b   : > { %v7922_v17 = vrot.slane %v7921_v53, 4  ;;  %v7904_v29 = vrot.slane %v7903_v25, 4 }
 0x58d   : > { %v7923_v8 = vadd.f32 %v7922_v17, %v7921_v53  ;;  %v7905_v23 = vadd.f32 %v7904_v29, %v7903_v25 }
 0x58f   : > { %v7924_v24 = vrot.slane %v7923_v8, 2  ;;  %v7906_v33 = vrot.slane %v7905_v23, 2 }
 0x591   : > { %v7925_v37 = vadd.f32 %v7924_v24, %v7923_v8  ;;  %v7907_v50 = vadd.f32 %v7906_v33, %v7905_v23 }
 0x593   : > { %v7926_v18 = vrot.slane %v7925_v37, 1  ;;  %v7908_v44 = vrot.slane %v7907_v50, 1 }
 0x595   : > { %v7927_v20 = vadd.f32 %v7926_v18, %v7925_v37  ;;  %v7909_v26 = vadd.f32 %v7908_v44, %v7907_v50 }
 0x597   : > { %v7929_v54 = vsel %vm7928_vm9, %v7909_v26, %v7927_v20 }
 0x598   : > { %v7931_v5 = vadd.f32 %v7930_v0, %v7929_v54 }
 0x59a   : > { %v7932_v60 = vand.u32 2147483647, %v7931_v5  ;;  %vm7936_vm11 = vcmp.ge.f32.partialorder %v7931_v5, 0.0 }
 0x59c   : > { %v7933_v34 = vsub.f32 0.0, %v7932_v60 }
 0x59e   : > { %v7934_v1 = vmul.f32 1.442695, %v7933_v34 }
 0x5a0   : > { %11193 = vpow2.f32 %v7934_v1 }
 0x5aa   : > { %v11194_v31 = vpop.eup %11193 }
 0x5ab   : > { %v7937_v57 = vadd.f32 1.0, %v11194_v31 }
 0x5ad   : > { %11195 = vrcp.f32 %v7937_v57 }
 0x5b7   : > { %v11196_v62 = vpop.eup %11195 }
 0x5b8   : > { %v7940_v9 = vmul.f32 %v11196_v62, %v11194_v31 }
 0x5ba   : > { %v7941_v10 = vsel %vm7936_vm11, %v11196_v62, %v7940_v9 }
 0x5bb   : > { %v7943_v12 = vsel %vm7942_vm10, %v7941_v10, 0.0 }
 0x5bc   : > { %7944 = vst [vmem:[%s270_s16] sm:$0x1] %v7943_v12 }
 0x5bd   : > { %11249 = shalt.err (!%p11246_p3)
}
 0x5be   : > { %s11250_s29 = scalar_lea.hbm %s14021_s20, 16  ;;  %s11254_s13 = scalar_lea.hbm %s14070_s7, 32 }
 0x5bf   : > { %p11251_p4 = scmp.ne.s32.totalorder %s14021_s20, %s11250_s29  ;;  %p11255_p9 = scmp.lt.u32.totalorder %s14021_s20, %s14070_s7 }
 0x5c0   : > { %p11256_p10 = scmp.lt.u32.totalorder %s11254_s13, %s11250_s29  ;;  %p11258_p12 = scmp.lt.u32.totalorder %s11250_s29, %s14021_s20 }
 0x5c1   : > { %p11252_p7 = pnand %p11251_p4, %p11381_p5 }
 0x5c2   : > { %p11257_p11 = por %p11256_p10, %p11255_p9 }
 0x5c3   : > { %p11253_p8 = pneg %p11252_p7 }
 0x5c4   : > { %p11259_p13 = por %p11258_p12, %p11257_p11 }
 0x5c6   : > { %p11260_p0 = pnand %p11259_p13, %p11253_p8 }
 0x5c8   : > { %11263 = shalt.err (!%p11260_p0)
}
 0x5c9   : > { %10888 = dma.vmem_to_hbm [thread:$0]  (%p11381_p5), %s14023_s17, 16, %s14021_s20, %s7946_s21  }
 0x5ca PF: > { %p10894_p1 = scmp.ge.s32.totalorder %s11298_s27, 2  ;;  %s7970_s18 = sand.u32 1, %s11286_s24  }
 0x5cb   : > { %s7971_s19 = scalar_lea.sflag [#allocation5], %s7970_s18 }
 0x5cc   : > { %p10891_p2 = pnand %p10894_p1, %p11385_p6 }
 0x5ce   : > { %11281 = dma.done.wait (!%p10891_p2), %s7971_s19, 16  }
 0x5cf   : > { %11283 = vsyncadd (!%p10891_p2), %s7971_s19, 4294967280  ;;  %p17_p3 = scmp.ge.s32.totalorder %s11368_s30, 4   ;;  %s14297_s24 = smov %s11290_s25 }
 0x5d0   : > { %s14298_s25 = smov %s11294_s26  ;;  %s14299_s26 = smov %s11379_s10 }
 0x5d1   : > { %s14300_s27 = smov %s11368_s30  ;;  %19 = sbr.rel (!%p17_p3) target bundleno = 3 (0x3), region = 88 }
 0x5d8   :  { %7975 = vsyncpa [#allocation5], 1 }
 0x5d9   :  { %7977 = vsyncpa [#allocation5 + $0x1], 1 }

</bundles_post_ra>
